<compile_context>
chip_gen: v6e
topology: v6e:2x2x1
jax: 0.10.0
libtpu: 0.0.40
codegen_flags: <defaults>
</compile_context>

<pallas_src>
import math
from functools import partial

import jax
import jax.numpy as jnp
from jax.experimental import pallas as pl
from jax.experimental.pallas import tpu as pltpu


_VMEM_LIMIT = 32 * 1024 * 1024
_VMEM = pl.BlockSpec(memory_space=pltpu.MemorySpace.VMEM)
_GELU_C = math.sqrt(2.0 / math.pi)


def _divisor_tile(n, target=256, mult=8):
    """Largest divisor of n that is <= target and a multiple of `mult`; else n (full)."""
    if n <= target:
        return n
    t = (target // mult) * mult
    while t >= mult:
        if n % t == 0:
            return t
        t -= mult
    return n


def _layernorm(x, g, b, eps=1e-5):
    mu = jnp.mean(x, axis=-1, keepdims=True)
    xc = x - mu
    var = jnp.mean(xc * xc, axis=-1, keepdims=True)
    return xc * jax.lax.rsqrt(var + eps) * g + b


# --------------------- kernel 1: LN + QKV + rotary + q-scale -----------------

def _attn_pre_kernel(x_ref, g_ref, b_ref, w_ref, cos_ref, se_ref, so_ref, o_ref):
    h = _layernorm(x_ref[0], g_ref[...], b_ref[...])                  # (tp, dim)
    qkv = jnp.dot(h.astype(jnp.bfloat16), w_ref[...],
                  preferred_element_type=jnp.float32)                 # (tp, 3*inner)
    w3 = qkv.shape[-1]
    nxt = pltpu.roll(qkv, w3 - 1, axis=1)   # lane i -> qkv[i+1]
    prv = pltpu.roll(qkv, 1, axis=1)        # lane i -> qkv[i-1]
    # rotate-every-two rotary + q scaling, folded into precomputed tables:
    #   q,k cols: out = t*cos + t[i+1]*(-sin) (even lanes) + t[i-1]*(+sin) (odd lanes)
    #   v cols:   cos==1, se==so==0  (identity)
    o_ref[0] = qkv * cos_ref[...] + nxt * se_ref[...] + prv * so_ref[...]


def attn_pre_pallas(x, ln_g, ln_b, w_qkv, cos3, se3, so3):
    B, P, dim = x.shape
    W3 = w_qkv.shape[1]
    tp = _divisor_tile(P)
    grid = (B, P // tp)
    return pl.pallas_call(
        _attn_pre_kernel,
        out_shape=jax.ShapeDtypeStruct((B, P, W3), jnp.float32),
        grid=grid,
        in_specs=[
            pl.BlockSpec((1, tp, dim), lambda b, p: (b, p, 0)),
            pl.BlockSpec((1, dim), lambda b, p: (0, 0)),
            pl.BlockSpec((1, dim), lambda b, p: (0, 0)),
            pl.BlockSpec((dim, W3), lambda b, p: (0, 0)),
            pl.BlockSpec((tp, W3), lambda b, p: (p, 0)),
            pl.BlockSpec((tp, W3), lambda b, p: (p, 0)),
            pl.BlockSpec((tp, W3), lambda b, p: (p, 0)),
        ],
        out_specs=pl.BlockSpec((1, tp, W3), lambda b, p: (b, p, 0)),
        compiler_params=pltpu.CompilerParams(
            dimension_semantics=("parallel", "parallel"),
            vmem_limit_bytes=_VMEM_LIMIT),
    )(x, ln_g.reshape(1, dim), ln_b.reshape(1, dim),
      w_qkv.astype(jnp.bfloat16), cos3, se3, so3)


# --------------------- kernel 2: per-block attention (MXU) --------------------

def _block_attn_kernel(q_ref, k_ref, v_ref, y_ref, a_ref):
    q = q_ref[...].astype(jnp.bfloat16)                               # (bb, Z, D)
    k = k_ref[...].astype(jnp.bfloat16)
    v = v_ref[...].astype(jnp.bfloat16)
    s = jnp.einsum('bzd,bwd->bzw', q, k, preferred_element_type=jnp.float32)
    m = jnp.max(s, axis=-1, keepdims=True)
    e = jnp.exp(s - m)                                                # (bb, Z, Z)
    y_ref[...] = jnp.einsum('bzw,bwd->bzd', e.astype(jnp.bfloat16), v,
                            preferred_element_type=jnp.float32)
    a_ref[...] = jnp.sum(e, axis=-1)                                  # (bb, Z)


def block_attention_pallas(qb, kb, vb):
    """qb/kb/vb: (num_blocks, Z, D) -> y (num_blocks, Z, D), a (num_blocks, Z)."""
    M, Z, D = qb.shape
    bb = _divisor_tile(M, 256, 8)
    grid = (M // bb,)
    return pl.pallas_call(
        _block_attn_kernel,
        out_shape=(jax.ShapeDtypeStruct((M, Z, D), jnp.float32),
                   jax.ShapeDtypeStruct((M, Z), jnp.float32)),
        grid=grid,
        in_specs=[pl.BlockSpec((bb, Z, D), lambda i: (i, 0, 0))] * 3,
        out_specs=(pl.BlockSpec((bb, Z, D), lambda i: (i, 0, 0)),
                   pl.BlockSpec((bb, Z), lambda i: (i, 0))),
        compiler_params=pltpu.CompilerParams(
            dimension_semantics=("parallel",),
            vmem_limit_bytes=_VMEM_LIMIT),
    )(qb, kb, vb)


# --------------------- kernel 3: to_out projection + residual -----------------

def _out_proj_kernel(o_ref, w_ref, b_ref, x_ref, y_ref):
    y_ref[...] = (x_ref[...]
                  + jnp.dot(o_ref[...].astype(jnp.bfloat16), w_ref[...],
                            preferred_element_type=jnp.float32)
                  + b_ref[...])


def out_proj_pallas(attn_out, w, b, x_res):
    R, inner = attn_out.shape
    dim = w.shape[1]
    tm = _divisor_tile(R)
    grid = (R // tm,)
    return pl.pallas_call(
        _out_proj_kernel,
        out_shape=jax.ShapeDtypeStruct((R, dim), jnp.float32),
        grid=grid,
        in_specs=[
            pl.BlockSpec((tm, inner), lambda i: (i, 0)),
            pl.BlockSpec((inner, dim), lambda i: (0, 0)),
            pl.BlockSpec((1, dim), lambda i: (0, 0)),
            pl.BlockSpec((tm, dim), lambda i: (i, 0)),
        ],
        out_specs=pl.BlockSpec((tm, dim), lambda i: (i, 0)),
        input_output_aliases={3: 0},          # residual stream updated in place
        compiler_params=pltpu.CompilerParams(
            dimension_semantics=("parallel",),
            vmem_limit_bytes=_VMEM_LIMIT),
    )(attn_out, w.astype(jnp.bfloat16), b.reshape(1, dim), x_res)


# --------------------- kernel 4: LN + FeedForward + residual ------------------

def _ff_kernel(x_ref, g_ref, b_ref, w1_ref, b1_ref, w2_ref, b2_ref, y_ref):
    x = x_ref[...]
    h = _layernorm(x, g_ref[...], b_ref[...])
    u = jnp.dot(h.astype(jnp.bfloat16), w1_ref[...],
                preferred_element_type=jnp.float32) + b1_ref[...]
    # TODO(synk): exact-erf GELU replaced by in-kernel tanh approximation (erf lowering
    #             in Mosaic not guaranteed); difference is ~1e-3 relative.
    u = 0.5 * u * (1.0 + jnp.tanh(_GELU_C * (u + 0.044715 * u * u * u)))
    y_ref[...] = (x
                  + jnp.dot(u.astype(jnp.bfloat16), w2_ref[...],
                            preferred_element_type=jnp.float32)
                  + b2_ref[...])


def ff_pallas(x, g, b, w1, b1, w2, b2):
    R, dim = x.shape
    hidden = w1.shape[1]
    tm = _divisor_tile(R)
    grid = (R // tm,)
    return pl.pallas_call(
        _ff_kernel,
        out_shape=jax.ShapeDtypeStruct((R, dim), jnp.float32),
        grid=grid,
        in_specs=[
            pl.BlockSpec((tm, dim), lambda i: (i, 0)),
            pl.BlockSpec((1, dim), lambda i: (0, 0)),
            pl.BlockSpec((1, dim), lambda i: (0, 0)),
            pl.BlockSpec((dim, hidden), lambda i: (0, 0)),
            pl.BlockSpec((1, hidden), lambda i: (0, 0)),
            pl.BlockSpec((hidden, dim), lambda i: (0, 0)),
            pl.BlockSpec((1, dim), lambda i: (0, 0)),
        ],
        out_specs=pl.BlockSpec((tm, dim), lambda i: (i, 0)),
        input_output_aliases={0: 0},          # residual stream updated in place
        compiler_params=pltpu.CompilerParams(
            dimension_semantics=("parallel",),
            vmem_limit_bytes=_VMEM_LIMIT),
    )(x, g.reshape(1, dim), b.reshape(1, dim),
      w1.astype(jnp.bfloat16), b1.reshape(1, hidden),
      w2.astype(jnp.bfloat16), b2.reshape(1, dim))


# --------------------- kernel 5: CLS head (LN + to_logits + MLP) --------------

def _head_kernel(x_ref, g_ref, b_ref, wl_ref, bl_ref, wm_ref, bm_ref, o_ref):
    h = _layernorm(x_ref[...], g_ref[...], b_ref[...])
    logits = jnp.dot(h.astype(jnp.bfloat16), wl_ref[...],
                     preferred_element_type=jnp.float32) + bl_ref[...]
    o_ref[...] = jnp.dot(logits.astype(jnp.bfloat16), wm_ref[...],
                         preferred_element_type=jnp.float32) + bm_ref[...]


def cls_head_pallas(x_cls, g, b, w_logits, b_logits, w_mlp, b_mlp):
    B, dim = x_cls.shape
    nt = w_logits.shape[1]
    nc = w_mlp.shape[1]
    return pl.pallas_call(
        _head_kernel,
        out_shape=jax.ShapeDtypeStruct((B, nc), jnp.float32),
        in_specs=[_VMEM] * 7,
        out_specs=_VMEM,
        compiler_params=pltpu.CompilerParams(vmem_limit_bytes=_VMEM_LIMIT),
    )(x_cls, g.reshape(1, dim), b.reshape(1, dim),
      w_logits.astype(jnp.bfloat16), b_logits.reshape(1, nt),
      w_mlp.astype(jnp.bfloat16), b_mlp.reshape(1, nc))


# --------------------- rotary tables (hoisted, layer-invariant) ---------------

def rotary_tables(n, dim_head, heads, scale):
    """Folded (pos, 3*inner) rotary tables for the fused QKV kernel.

    q columns carry rotary*scale, k columns rotary, v columns identity; the
    rotate-every-two swap is expressed as two lane rolls masked by s_even/s_odd.
    """
    inv_freq = 1.0 / (10000.0 ** (jnp.arange(0, dim_head, 2, dtype=jnp.float32) / dim_head))
    freqs = jnp.arange(n, dtype=jnp.float32)[:, None] * inv_freq[None, :]   # (n, dh/2)
    freqs = jnp.repeat(freqs, 2, axis=-1)                                   # (n, dh) pair-repeated
    cos = jnp.cos(freqs)
    sin = jnp.sin(freqs)
    alt = jnp.tile(jnp.array([-1.0, 1.0], jnp.float32), dim_head // 2)      # pair-swap sign
    even = jnp.tile(jnp.array([1.0, 0.0], jnp.float32), dim_head // 2)
    s_even = sin * alt * even            # applied to roll(x, -1): even lanes take x[i+1]
    s_odd = sin * alt * (1.0 - even)     # applied to roll(x, +1): odd lanes take x[i-1]

    tile_h = lambda t: jnp.tile(t, (1, heads))
    cos_h, se_h, so_h = tile_h(cos), tile_h(s_even), tile_h(s_odd)
    inner = heads * dim_head
    ones = jnp.ones((n, inner), jnp.float32)
    zeros = jnp.zeros((n, inner), jnp.float32)
    cos3 = jnp.concatenate([cos_h * scale, cos_h, ones], axis=1)
    se3 = jnp.concatenate([se_h * scale, se_h, zeros], axis=1)
    so3 = jnp.concatenate([so_h * scale, so_h, zeros], axis=1)
    return cos3, se3, so3


# --------------------- hierarchical attention (glue + kernel 2) ---------------

def h_attention(q, k, v, block_size, eps=1e-8):
    """Hierarchical 1D attention (non-causal, no mask). q already rotary'd + scaled."""
    BH, Np, D = q.shape
    num_levels = int(math.log2(Np // block_size)) - 2
    assert num_levels >= 0, 'number of levels must be at least 0'

    # TODO(synk): pooling / block-flip / coarse->fine combine remain XLA glue; folding
    #             them into the block-attention kernel (VMEM scratch per level) is a
    #             further optimization.
    qkvs = [(q, k, v)]
    for _ in range(num_levels):
        q = q.reshape(BH, -1, 2, D).mean(axis=2)   # mean-pool queries
        k = k.reshape(BH, -1, 2, D).mean(axis=2)   # mean-pool keys
        v = v.reshape(BH, -1, 2, D).sum(axis=2)    # sum-pool values
        qkvs.append((q, k, v))

    Ys = []
    for ind, (ql, kl, vl) in enumerate(reversed(qkvs)):       # coarse -> fine
        is_last = ind == len(qkvs) - 1
        nb = ql.shape[1] // block_size
        qb = ql.reshape(BH, nb, block_size, D)
        kb = kl.reshape(BH, nb, block_size, D)
        vb = vl.reshape(BH, nb, block_size, D)
        if not is_last:  # attend to off-diagonal neighbor blocks at coarser levels
            kb = kb.reshape(BH, nb // 2, 2, block_size, D)[:, :, ::-1].reshape(BH, nb, block_size, D)
            vb = vb.reshape(BH, nb // 2, 2, block_size, D)[:, :, ::-1].reshape(BH, nb, block_size, D)
        y, a = block_attention_pallas(qb.reshape(BH * nb, block_size, D),
                                      kb.reshape(BH * nb, block_size, D),
                                      vb.reshape(BH * nb, block_size, D))
        Ys.append((y.reshape(BH, nb * block_size, D), a.reshape(BH, nb * block_size)))

    Y = None
    A = None
    for y_l, a_l in Ys:  # coarse -> fine interpolation
        if Y is None:
            Y, A = y_l, a_l
        else:
            Y = y_l + jnp.repeat(Y, 2, axis=1)
            A = a_l + jnp.repeat(A, 2, axis=1)
    return Y / (A + eps)[..., None]


# ----------------------------- model ------------------------------------------

def init_params(key, *, num_tokens, dim, depth, heads, dim_head, n_class, ff_mult=4):
    inner = heads * dim_head
    keys = iter(jax.random.split(key, 8 + 8 * depth))

    def rnd(shape, scale=0.02):
        return scale * jax.random.normal(next(keys), shape, dtype=jnp.float32)

    layers = []
    for _ in range(depth):
        layers.append(dict(
            attn_ln_g=jnp.ones((dim,), jnp.float32),
            attn_ln_b=jnp.zeros((dim,), jnp.float32),
            to_qkv_w=rnd((dim, 3 * inner)),           # no bias (matches module)
            to_out_w=rnd((inner, dim)),
            to_out_b=rnd((dim,)),
            ff_ln_g=jnp.ones((dim,), jnp.float32),
            ff_ln_b=jnp.zeros((dim,), jnp.float32),
            ff_w1=rnd((dim, ff_mult * dim)),
            ff_b1=rnd((ff_mult * dim,)),
            ff_w2=rnd((ff_mult * dim, dim)),
            ff_b2=rnd((dim,)),
        ))
    return dict(
        token_emb=rnd((num_tokens, dim), 1.0),
        layers=layers,
        final_ln_g=jnp.ones((dim,), jnp.float32),
        final_ln_b=jnp.zeros((dim,), jnp.float32),
        to_logits_w=rnd((dim, num_tokens)),
        to_logits_b=rnd((num_tokens,)),
        mlp_w=rnd((dim, n_class)),                    # HIGENTRA head (num_tokens == dim)
        mlp_b=rnd((n_class,)),
    )


def higentra_forward(params, tokens, *, heads, dim_head, block_size, max_seq_len):
    B, N = tokens.shape
    assert N <= max_seq_len
    dim = params['token_emb'].shape[1]
    inner = heads * dim_head
    scale = dim_head ** -0.5

    pad_to = 2 ** int(math.ceil(math.log2(N)))        # pad sequence once, slice never
    x = params['token_emb'][tokens]                   # (B, N, dim) embedding gather
    if pad_to != N:
        # TODO(synk): padded key/value positions are not masked out of the softmax
        #             denominator (same behavior as previous version; test uses N == pad_to).
        x = jnp.pad(x, ((0, 0), (0, pad_to - N), (0, 0)))

    cos3, se3, so3 = rotary_tables(pad_to, dim_head, heads, scale)   # hoisted out of depth loop
    rows = B * pad_to

    for lp in params['layers']:
        # ---- fused PreNorm + QKV projection + rotary + q-scale (kernel 1) ----
        qkv = attn_pre_pallas(x, lp['attn_ln_g'], lp['attn_ln_b'], lp['to_qkv_w'],
                              cos3, se3, so3)          # (B, pad_to, 3*inner) f32
        qkv = qkv.reshape(B, pad_to, 3, heads, dim_head)
        q = qkv[:, :, 0].transpose(0, 2, 1, 3).reshape(B * heads, pad_to, dim_head)
        k = qkv[:, :, 1].transpose(0, 2, 1, 3).reshape(B * heads, pad_to, dim_head)
        v = qkv[:, :, 2].transpose(0, 2, 1, 3).reshape(B * heads, pad_to, dim_head)

        # ---- hierarchical block attention (kernel 2 per level) ----
        out = h_attention(q, k, v, block_size)         # (B*heads, pad_to, dim_head)
        out = out.reshape(B, heads, pad_to, dim_head).transpose(0, 2, 1, 3).reshape(rows, inner)

        # ---- to_out projection + residual (kernel 3), then LN+FF+residual (kernel 4) ----
        x2 = out_proj_pallas(out, lp['to_out_w'], lp['to_out_b'], x.reshape(rows, dim))
        x2 = ff_pallas(x2, lp['ff_ln_g'], lp['ff_ln_b'],
                       lp['ff_w1'], lp['ff_b1'], lp['ff_w2'], lp['ff_b2'])
        x = x2.reshape(B, pad_to, dim)

    # CLS-only final LayerNorm + to_logits + MLP head (row-wise, so slicing first is exact)
    x_cls = x[:, 0, :]
    return cls_head_pallas(x_cls, params['final_ln_g'], params['final_ln_b'],
                           params['to_logits_w'], params['to_logits_b'],
                           params['mlp_w'], params['mlp_b'])


# ----------------------------- main --------------------------------------------

if __name__ == "__main__":
    # small, module-consistent shapes
    B, N = 2, 16
    dim = 32
    num_tokens = 32          # must equal dim for the module's forward to type-check
    depth = 2
    heads = 2
    dim_head = 32
    block_size = 2
    n_class = 2
    max_seq_len = 128        # power-of-2 block count, >= N

    key = jax.random.PRNGKey(0)
    pkey, tkey = jax.random.split(key)
    params = init_params(pkey, num_tokens=num_tokens, dim=dim, depth=depth,
                         heads=heads, dim_head=dim_head, n_class=n_class)
    tokens = jax.random.randint(tkey, (B, N), 0, num_tokens, dtype=jnp.int32)

    fwd = jax.jit(partial(higentra_forward, heads=heads, dim_head=dim_head,
                          block_size=block_size, max_seq_len=max_seq_len))
    out = fwd(params, tokens)
    jax.block_until_ready(out)
    assert out.shape == (B, n_class) and out.dtype == jnp.float32
    print("KERNEL_OK")
</pallas_src>

<mosaic_0001>
module attributes {stable_mosaic.version = 11 : i64} {
  func.func @_attn_pre_kernel(%arg0: i32, %arg1: i32, %arg2: memref<1x16x32xf32, #tpu.memory_space<vmem>>, %arg3: memref<1x32xf32, #tpu.memory_space<vmem>>, %arg4: memref<1x32xf32, #tpu.memory_space<vmem>>, %arg5: memref<32x192xbf16, #tpu.memory_space<vmem>>, %arg6: memref<16x192xf32, #tpu.memory_space<vmem>>, %arg7: memref<16x192xf32, #tpu.memory_space<vmem>>, %arg8: memref<16x192xf32, #tpu.memory_space<vmem>>, %arg9: memref<1x16x192xf32, #tpu.memory_space<vmem>>) attributes {dimension_semantics = [#tpu.dimension_semantics<parallel>, #tpu.dimension_semantics<parallel>], iteration_bounds = array<i64: 2, 1>, scalar_prefetch = 0 : i64, scratch_operands = 0 : i64, tpu.core_type = #tpu.core_type<tc>, window_params = [{transform_indices = @transform_0, window_bounds = array<i64: 1, 16, 32>}, {pipeline_mode = #tpu.pipeline_mode<synchronous>, transform_indices = @transform_1, window_bounds = array<i64: 1, 32>}, {pipeline_mode = #tpu.pipeline_mode<synchronous>, transform_indices = @transform_2, window_bounds = array<i64: 1, 32>}, {pipeline_mode = #tpu.pipeline_mode<synchronous>, transform_indices = @transform_3, window_bounds = array<i64: 32, 192>}, {transform_indices = @transform_4, window_bounds = array<i64: 16, 192>}, {transform_indices = @transform_5, window_bounds = array<i64: 16, 192>}, {transform_indices = @transform_6, window_bounds = array<i64: 16, 192>}, {transform_indices = @transform_7, window_bounds = array<i64: 1, 16, 192>}]} {
    %c0 = arith.constant 0 : index
    %c0_0 = arith.constant 0 : index
    %c0_1 = arith.constant 0 : index
    %0 = vector.load %arg2[%c0, %c0_0, %c0_1] : memref<1x16x32xf32, #tpu.memory_space<vmem>>, vector<1x16x32xf32>
    %1 = vector.shape_cast %0 : vector<1x16x32xf32> to vector<16x32xf32>
    %c0_2 = arith.constant 0 : index
    %c0_3 = arith.constant 0 : index
    %2 = vector.load %arg3[%c0_2, %c0_3] : memref<1x32xf32, #tpu.memory_space<vmem>>, vector<1x32xf32>
    %c0_4 = arith.constant 0 : index
    %c0_5 = arith.constant 0 : index
    %3 = vector.load %arg4[%c0_4, %c0_5] : memref<1x32xf32, #tpu.memory_space<vmem>>, vector<1x32xf32>
    %cst = arith.constant dense<0.000000e+00> : vector<16xf32>
    %4 = vector.multi_reduction <add>, %1, %cst [1] : vector<16x32xf32> to vector<16xf32>
    %5 = vector.shape_cast %4 : vector<16xf32> to vector<16x1xf32>
    %cst_6 = arith.constant 3.200000e+01 : f32
    %6 = vector.broadcast %cst_6 : f32 to vector<16x1xf32>
    %7 = arith.divf %5, %6 : vector<16x1xf32>
    %8 = vector.broadcast %7 : vector<16x1xf32> to vector<16x32xf32>
    %9 = arith.subf %1, %8 : vector<16x32xf32>
    %10 = arith.mulf %9, %9 : vector<16x32xf32>
    %cst_7 = arith.constant dense<0.000000e+00> : vector<16xf32>
    %11 = vector.multi_reduction <add>, %10, %cst_7 [1] : vector<16x32xf32> to vector<16xf32>
    %12 = vector.shape_cast %11 : vector<16xf32> to vector<16x1xf32>
    %cst_8 = arith.constant 3.200000e+01 : f32
    %13 = vector.broadcast %cst_8 : f32 to vector<16x1xf32>
    %14 = arith.divf %12, %13 : vector<16x1xf32>
    %cst_9 = arith.constant 9.99999974E-6 : f32
    %15 = vector.broadcast %cst_9 : f32 to vector<16x1xf32>
    %16 = arith.addf %14, %15 : vector<16x1xf32>
    %17 = math.rsqrt %16 : vector<16x1xf32>
    %18 = vector.broadcast %17 : vector<16x1xf32> to vector<16x32xf32>
    %19 = arith.mulf %9, %18 : vector<16x32xf32>
    %20 = vector.broadcast %2 : vector<1x32xf32> to vector<16x32xf32>
    %21 = arith.mulf %19, %20 : vector<16x32xf32>
    %22 = vector.broadcast %3 : vector<1x32xf32> to vector<16x32xf32>
    %23 = arith.addf %21, %22 : vector<16x32xf32>
    %24 = arith.truncf %23 : vector<16x32xf32> to vector<16x32xbf16>
    %c0_10 = arith.constant 0 : index
    %c0_11 = arith.constant 0 : index
    %25 = vector.load %arg5[%c0_10, %c0_11] : memref<32x192xbf16, #tpu.memory_space<vmem>>, vector<32x192xbf16>
    %cst_12 = arith.constant dense<0.000000e+00> : vector<16x192xf32>
    %26 = tpu.matmul %24, %25, %cst_12 {dimension_numbers = #tpu.dot_dimension_numbers<[1], [0], [0], [1], [0, 0, 1, 1], [], []>} : vector<16x32xbf16>, vector<32x192xbf16>, vector<16x192xf32> -> vector<16x192xf32>
    %c191_i32 = arith.constant 191 : i32
    %27 = tpu.dynamic_rotate %26 by %c191_i32 dim 1 : vector<16x192xf32>, i32 -> vector<16x192xf32>
    %c1_i32 = arith.constant 1 : i32
    %28 = tpu.dynamic_rotate %26 by %c1_i32 dim 1 : vector<16x192xf32>, i32 -> vector<16x192xf32>
    %c0_13 = arith.constant 0 : index
    %c0_14 = arith.constant 0 : index
    %29 = vector.load %arg6[%c0_13, %c0_14] : memref<16x192xf32, #tpu.memory_space<vmem>>, vector<16x192xf32>
    %30 = arith.mulf %26, %29 : vector<16x192xf32>
    %c0_15 = arith.constant 0 : index
    %c0_16 = arith.constant 0 : index
    %31 = vector.load %arg7[%c0_15, %c0_16] : memref<16x192xf32, #tpu.memory_space<vmem>>, vector<16x192xf32>
    %32 = arith.mulf %27, %31 : vector<16x192xf32>
    %33 = arith.addf %30, %32 : vector<16x192xf32>
    %c0_17 = arith.constant 0 : index
    %c0_18 = arith.constant 0 : index
    %34 = vector.load %arg8[%c0_17, %c0_18] : memref<16x192xf32, #tpu.memory_space<vmem>>, vector<16x192xf32>
    %35 = arith.mulf %28, %34 : vector<16x192xf32>
    %36 = arith.addf %33, %35 : vector<16x192xf32>
    %c0_19 = arith.constant 0 : index
    %c0_20 = arith.constant 0 : index
    %c0_21 = arith.constant 0 : index
    %37 = vector.load %arg9[%c0_19, %c0_20, %c0_21] : memref<1x16x192xf32, #tpu.memory_space<vmem>>, vector<1x16x192xf32>
    %38 = vector.shape_cast %37 : vector<1x16x192xf32> to vector<16x192xf32>
    %39 = vector.shape_cast %36 : vector<16x192xf32> to vector<1x16x192xf32>
    tpu.vector_store %arg9[%c0_19, %c0_20, %c0_21], %39 {strides = array<i32>} : memref<1x16x192xf32, #tpu.memory_space<vmem>>, vector<1x16x192xf32>,
    return
  }
  func.func @transform_0(%arg0: i32, %arg1: i32) -> (i32, i32, i32) {
    %c0_i32 = arith.constant 0 : i32
    %c0_i32_0 = arith.constant 0 : i32
    return %arg0, %arg1, %c0_i32 : i32, i32, i32
  }
  func.func @transform_1(%arg0: i32, %arg1: i32) -> (i32, i32) {
    %c0_i32 = arith.constant 0 : i32
    %c0_i32_0 = arith.constant 0 : i32
    %c0_i32_1 = arith.constant 0 : i32
    return %c0_i32, %c0_i32_0 : i32, i32
  }
  func.func @transform_2(%arg0: i32, %arg1: i32) -> (i32, i32) {
    %c0_i32 = arith.constant 0 : i32
    %c0_i32_0 = arith.constant 0 : i32
    %c0_i32_1 = arith.constant 0 : i32
    return %c0_i32, %c0_i32_0 : i32, i32
  }
  func.func @transform_3(%arg0: i32, %arg1: i32) -> (i32, i32) {
    %c0_i32 = arith.constant 0 : i32
    %c0_i32_0 = arith.constant 0 : i32
    %c0_i32_1 = arith.constant 0 : i32
    return %c0_i32, %c0_i32_0 : i32, i32
  }
  func.func @transform_4(%arg0: i32, %arg1: i32) -> (i32, i32) {
    %c0_i32 = arith.constant 0 : i32
    %c0_i32_0 = arith.constant 0 : i32
    return %arg1, %c0_i32 : i32, i32
  }
  func.func @transform_5(%arg0: i32, %arg1: i32) -> (i32, i32) {
    %c0_i32 = arith.constant 0 : i32
    %c0_i32_0 = arith.constant 0 : i32
    return %arg1, %c0_i32 : i32, i32
  }
  func.func @transform_6(%arg0: i32, %arg1: i32) -> (i32, i32) {
    %c0_i32 = arith.constant 0 : i32
    %c0_i32_0 = arith.constant 0 : i32
    return %arg1, %c0_i32 : i32, i32
  }
  func.func @transform_7(%arg0: i32, %arg1: i32) -> (i32, i32, i32) {
    %c0_i32 = arith.constant 0 : i32
    %c0_i32_0 = arith.constant 0 : i32
    return %arg0, %arg1, %c0_i32 : i32, i32, i32
  }
}

module attributes {stable_mosaic.version = 11 : i64} {
  func.func @_block_attn_kernel(%arg0: i32, %arg1: memref<16x2x32xf32, #tpu.memory_space<vmem>>, %arg2: memref<16x2x32xf32, #tpu.memory_space<vmem>>, %arg3: memref<16x2x32xf32, #tpu.memory_space<vmem>>, %arg4: memref<16x2x32xf32, #tpu.memory_space<vmem>>, %arg5: memref<16x2xf32, #tpu.memory_space<vmem>>) attributes {dimension_semantics = [#tpu.dimension_semantics<parallel>], iteration_bounds = array<i64: 1>, scalar_prefetch = 0 : i64, scratch_operands = 0 : i64, tpu.core_type = #tpu.core_type<tc>, window_params = [{transform_indices = @transform_0, window_bounds = array<i64: 16, 2, 32>}, {transform_indices = @transform_1, window_bounds = array<i64: 16, 2, 32>}, {transform_indices = @transform_2, window_bounds = array<i64: 16, 2, 32>}, {transform_indices = @transform_3, window_bounds = array<i64: 16, 2, 32>}, {transform_indices = @transform_4, window_bounds = array<i64: 16, 2>}]} {
    %c0 = arith.constant 0 : index
    %c0_0 = arith.constant 0 : index
    %c0_1 = arith.constant 0 : index
    %0 = vector.load %arg1[%c0, %c0_0, %c0_1] : memref<16x2x32xf32, #tpu.memory_space<vmem>>, vector<16x2x32xf32>
    %1 = arith.truncf %0 : vector<16x2x32xf32> to vector<16x2x32xbf16>
    %c0_2 = arith.constant 0 : index
    %c0_3 = arith.constant 0 : index
    %c0_4 = arith.constant 0 : index
    %2 = vector.load %arg2[%c0_2, %c0_3, %c0_4] : memref<16x2x32xf32, #tpu.memory_space<vmem>>, vector<16x2x32xf32>
    %3 = arith.truncf %2 : vector<16x2x32xf32> to vector<16x2x32xbf16>
    %c0_5 = arith.constant 0 : index
    %c0_6 = arith.constant 0 : index
    %c0_7 = arith.constant 0 : index
    %4 = vector.load %arg3[%c0_5, %c0_6, %c0_7] : memref<16x2x32xf32, #tpu.memory_space<vmem>>, vector<16x2x32xf32>
    %5 = arith.truncf %4 : vector<16x2x32xf32> to vector<16x2x32xbf16>
    "tpu.trace_start"() <{level = 10 : i32, message = "bzd,bwd->bzw"}> : () -> ()
    %cst = arith.constant dense<0.000000e+00> : vector<16x2x2xf32>
    %6 = tpu.matmul %1, %3, %cst {dimension_numbers = #tpu.dot_dimension_numbers<[2], [2], [1], [1], [0, 0, 0, 1, 1, 1], [0], [0]>} : vector<16x2x32xbf16>, vector<16x2x32xbf16>, vector<16x2x2xf32> -> vector<16x2x2xf32>
    "tpu.trace_stop"() : () -> ()
    %cst_8 = arith.constant dense<0xFF800000> : vector<16x2xf32>
    %7 = vector.multi_reduction <maximumf>, %6, %cst_8 [2] : vector<16x2x2xf32> to vector<16x2xf32>
    %8 = vector.shape_cast %7 : vector<16x2xf32> to vector<16x2x1xf32>
    %9 = vector.broadcast %8 : vector<16x2x1xf32> to vector<16x2x2xf32>
    %10 = arith.subf %6, %9 : vector<16x2x2xf32>
    %11 = math.exp %10 : vector<16x2x2xf32>
    %12 = arith.truncf %11 : vector<16x2x2xf32> to vector<16x2x2xbf16>
    "tpu.trace_start"() <{level = 10 : i32, message = "bzw,bwd->bzd"}> : () -> ()
    %cst_9 = arith.constant dense<0.000000e+00> : vector<16x2x32xf32>
    %13 = tpu.matmul %12, %5, %cst_9 {dimension_numbers = #tpu.dot_dimension_numbers<[2], [1], [1], [2], [0, 0, 0, 1, 1, 2], [0], [0]>} : vector<16x2x2xbf16>, vector<16x2x32xbf16>, vector<16x2x32xf32> -> vector<16x2x32xf32>
    "tpu.trace_stop"() : () -> ()
    %c0_10 = arith.constant 0 : index
    %c0_11 = arith.constant 0 : index
    %c0_12 = arith.constant 0 : index
    %14 = vector.load %arg4[%c0_10, %c0_11, %c0_12] : memref<16x2x32xf32, #tpu.memory_space<vmem>>, vector<16x2x32xf32>
    tpu.vector_store %arg4[%c0_10, %c0_11, %c0_12], %13 {strides = array<i32>} : memref<16x2x32xf32, #tpu.memory_space<vmem>>, vector<16x2x32xf32>,
    %cst_13 = arith.constant dense<0.000000e+00> : vector<16x2xf32>
    %15 = vector.multi_reduction <add>, %11, %cst_13 [2] : vector<16x2x2xf32> to vector<16x2xf32>
    %c0_14 = arith.constant 0 : index
    %c0_15 = arith.constant 0 : index
    %16 = vector.load %arg5[%c0_14, %c0_15] : memref<16x2xf32, #tpu.memory_space<vmem>>, vector<16x2xf32>
    tpu.vector_store %arg5[%c0_14, %c0_15], %15 {strides = array<i32>} : memref<16x2xf32, #tpu.memory_space<vmem>>, vector<16x2xf32>,
    return
  }
  func.func @transform_0(%arg0: i32) -> (i32, i32, i32) {
    %c0_i32 = arith.constant 0 : i32
    %c0_i32_0 = arith.constant 0 : i32
    %c0_i32_1 = arith.constant 0 : i32
    return %arg0, %c0_i32, %c0_i32_0 : i32, i32, i32
  }
  func.func @transform_1(%arg0: i32) -> (i32, i32, i32) {
    %c0_i32 = arith.constant 0 : i32
    %c0_i32_0 = arith.constant 0 : i32
    %c0_i32_1 = arith.constant 0 : i32
    return %arg0, %c0_i32, %c0_i32_0 : i32, i32, i32
  }
  func.func @transform_2(%arg0: i32) -> (i32, i32, i32) {
    %c0_i32 = arith.constant 0 : i32
    %c0_i32_0 = arith.constant 0 : i32
    %c0_i32_1 = arith.constant 0 : i32
    return %arg0, %c0_i32, %c0_i32_0 : i32, i32, i32
  }
  func.func @transform_3(%arg0: i32) -> (i32, i32, i32) {
    %c0_i32 = arith.constant 0 : i32
    %c0_i32_0 = arith.constant 0 : i32
    %c0_i32_1 = arith.constant 0 : i32
    return %arg0, %c0_i32, %c0_i32_0 : i32, i32, i32
  }
  func.func @transform_4(%arg0: i32) -> (i32, i32) {
    %c0_i32 = arith.constant 0 : i32
    %c0_i32_0 = arith.constant 0 : i32
    return %arg0, %c0_i32 : i32, i32
  }
}

module attributes {stable_mosaic.version = 11 : i64} {
  func.func @_block_attn_kernel(%arg0: i32, %arg1: memref<32x2x32xf32, #tpu.memory_space<vmem>>, %arg2: memref<32x2x32xf32, #tpu.memory_space<vmem>>, %arg3: memref<32x2x32xf32, #tpu.memory_space<vmem>>, %arg4: memref<32x2x32xf32, #tpu.memory_space<vmem>>, %arg5: memref<32x2xf32, #tpu.memory_space<vmem>>) attributes {dimension_semantics = [#tpu.dimension_semantics<parallel>], iteration_bounds = array<i64: 1>, scalar_prefetch = 0 : i64, scratch_operands = 0 : i64, tpu.core_type = #tpu.core_type<tc>, window_params = [{transform_indices = @transform_0, window_bounds = array<i64: 32, 2, 32>}, {transform_indices = @transform_1, window_bounds = array<i64: 32, 2, 32>}, {transform_indices = @transform_2, window_bounds = array<i64: 32, 2, 32>}, {transform_indices = @transform_3, window_bounds = array<i64: 32, 2, 32>}, {transform_indices = @transform_4, window_bounds = array<i64: 32, 2>}]} {
    %c0 = arith.constant 0 : index
    %c0_0 = arith.constant 0 : index
    %c0_1 = arith.constant 0 : index
    %0 = vector.load %arg1[%c0, %c0_0, %c0_1] : memref<32x2x32xf32, #tpu.memory_space<vmem>>, vector<32x2x32xf32>
    %1 = arith.truncf %0 : vector<32x2x32xf32> to vector<32x2x32xbf16>
    %c0_2 = arith.constant 0 : index
    %c0_3 = arith.constant 0 : index
    %c0_4 = arith.constant 0 : index
    %2 = vector.load %arg2[%c0_2, %c0_3, %c0_4] : memref<32x2x32xf32, #tpu.memory_space<vmem>>, vector<32x2x32xf32>
    %3 = arith.truncf %2 : vector<32x2x32xf32> to vector<32x2x32xbf16>
    %c0_5 = arith.constant 0 : index
    %c0_6 = arith.constant 0 : index
    %c0_7 = arith.constant 0 : index
    %4 = vector.load %arg3[%c0_5, %c0_6, %c0_7] : memref<32x2x32xf32, #tpu.memory_space<vmem>>, vector<32x2x32xf32>
    %5 = arith.truncf %4 : vector<32x2x32xf32> to vector<32x2x32xbf16>
    "tpu.trace_start"() <{level = 10 : i32, message = "bzd,bwd->bzw"}> : () -> ()
    %cst = arith.constant dense<0.000000e+00> : vector<32x2x2xf32>
    %6 = tpu.matmul %1, %3, %cst {dimension_numbers = #tpu.dot_dimension_numbers<[2], [2], [1], [1], [0, 0, 0, 1, 1, 1], [0], [0]>} : vector<32x2x32xbf16>, vector<32x2x32xbf16>, vector<32x2x2xf32> -> vector<32x2x2xf32>
    "tpu.trace_stop"() : () -> ()
    %cst_8 = arith.constant dense<0xFF800000> : vector<32x2xf32>
    %7 = vector.multi_reduction <maximumf>, %6, %cst_8 [2] : vector<32x2x2xf32> to vector<32x2xf32>
    %8 = vector.shape_cast %7 : vector<32x2xf32> to vector<32x2x1xf32>
    %9 = vector.broadcast %8 : vector<32x2x1xf32> to vector<32x2x2xf32>
    %10 = arith.subf %6, %9 : vector<32x2x2xf32>
    %11 = math.exp %10 : vector<32x2x2xf32>
    %12 = arith.truncf %11 : vector<32x2x2xf32> to vector<32x2x2xbf16>
    "tpu.trace_start"() <{level = 10 : i32, message = "bzw,bwd->bzd"}> : () -> ()
    %cst_9 = arith.constant dense<0.000000e+00> : vector<32x2x32xf32>
    %13 = tpu.matmul %12, %5, %cst_9 {dimension_numbers = #tpu.dot_dimension_numbers<[2], [1], [1], [2], [0, 0, 0, 1, 1, 2], [0], [0]>} : vector<32x2x2xbf16>, vector<32x2x32xbf16>, vector<32x2x32xf32> -> vector<32x2x32xf32>
    "tpu.trace_stop"() : () -> ()
    %c0_10 = arith.constant 0 : index
    %c0_11 = arith.constant 0 : index
    %c0_12 = arith.constant 0 : index
    %14 = vector.load %arg4[%c0_10, %c0_11, %c0_12] : memref<32x2x32xf32, #tpu.memory_space<vmem>>, vector<32x2x32xf32>
    tpu.vector_store %arg4[%c0_10, %c0_11, %c0_12], %13 {strides = array<i32>} : memref<32x2x32xf32, #tpu.memory_space<vmem>>, vector<32x2x32xf32>,
    %cst_13 = arith.constant dense<0.000000e+00> : vector<32x2xf32>
    %15 = vector.multi_reduction <add>, %11, %cst_13 [2] : vector<32x2x2xf32> to vector<32x2xf32>
    %c0_14 = arith.constant 0 : index
    %c0_15 = arith.constant 0 : index
    %16 = vector.load %arg5[%c0_14, %c0_15] : memref<32x2xf32, #tpu.memory_space<vmem>>, vector<32x2xf32>
    tpu.vector_store %arg5[%c0_14, %c0_15], %15 {strides = array<i32>} : memref<32x2xf32, #tpu.memory_space<vmem>>, vector<32x2xf32>,
    return
  }
  func.func @transform_0(%arg0: i32) -> (i32, i32, i32) {
    %c0_i32 = arith.constant 0 : i32
    %c0_i32_0 = arith.constant 0 : i32
    %c0_i32_1 = arith.constant 0 : i32
    return %arg0, %c0_i32, %c0_i32_0 : i32, i32, i32
  }
  func.func @transform_1(%arg0: i32) -> (i32, i32, i32) {
    %c0_i32 = arith.constant 0 : i32
    %c0_i32_0 = arith.constant 0 : i32
    %c0_i32_1 = arith.constant 0 : i32
    return %arg0, %c0_i32, %c0_i32_0 : i32, i32, i32
  }
  func.func @transform_2(%arg0: i32) -> (i32, i32, i32) {
    %c0_i32 = arith.constant 0 : i32
    %c0_i32_0 = arith.constant 0 : i32
    %c0_i32_1 = arith.constant 0 : i32
    return %arg0, %c0_i32, %c0_i32_0 : i32, i32, i32
  }
  func.func @transform_3(%arg0: i32) -> (i32, i32, i32) {
    %c0_i32 = arith.constant 0 : i32
    %c0_i32_0 = arith.constant 0 : i32
    %c0_i32_1 = arith.constant 0 : i32
    return %arg0, %c0_i32, %c0_i32_0 : i32, i32, i32
  }
  func.func @transform_4(%arg0: i32) -> (i32, i32) {
    %c0_i32 = arith.constant 0 : i32
    %c0_i32_0 = arith.constant 0 : i32
    return %arg0, %c0_i32 : i32, i32
  }
}

module attributes {stable_mosaic.version = 11 : i64} {
  func.func @_out_proj_kernel(%arg0: i32, %arg1: memref<32x64xf32, #tpu.memory_space<vmem>>, %arg2: memref<64x32xbf16, #tpu.memory_space<vmem>>, %arg3: memref<1x32xf32, #tpu.memory_space<vmem>>, %arg4: memref<32x32xf32, #tpu.memory_space<vmem>>, %arg5: memref<32x32xf32, #tpu.memory_space<vmem>>) attributes {dimension_semantics = [#tpu.dimension_semantics<parallel>], iteration_bounds = array<i64: 1>, scalar_prefetch = 0 : i64, scratch_operands = 0 : i64, tpu.core_type = #tpu.core_type<tc>, window_params = [{transform_indices = @transform_0, window_bounds = array<i64: 32, 64>}, {pipeline_mode = #tpu.pipeline_mode<synchronous>, transform_indices = @transform_1, window_bounds = array<i64: 64, 32>}, {pipeline_mode = #tpu.pipeline_mode<synchronous>, transform_indices = @transform_2, window_bounds = array<i64: 1, 32>}, {transform_indices = @transform_3, window_bounds = array<i64: 32, 32>}, {transform_indices = @transform_4, window_bounds = array<i64: 32, 32>}]} {
    %c0 = arith.constant 0 : index
    %c0_0 = arith.constant 0 : index
    %0 = vector.load %arg4[%c0, %c0_0] : memref<32x32xf32, #tpu.memory_space<vmem>>, vector<32x32xf32>
    %c0_1 = arith.constant 0 : index
    %c0_2 = arith.constant 0 : index
    %1 = vector.load %arg1[%c0_1, %c0_2] : memref<32x64xf32, #tpu.memory_space<vmem>>, vector<32x64xf32>
    %2 = arith.truncf %1 : vector<32x64xf32> to vector<32x64xbf16>
    %c0_3 = arith.constant 0 : index
    %c0_4 = arith.constant 0 : index
    %3 = vector.load %arg2[%c0_3, %c0_4] : memref<64x32xbf16, #tpu.memory_space<vmem>>, vector<64x32xbf16>
    %cst = arith.constant dense<0.000000e+00> : vector<32x32xf32>
    %4 = tpu.matmul %2, %3, %cst {dimension_numbers = #tpu.dot_dimension_numbers<[1], [0], [0], [1], [0, 0, 1, 1], [], []>} : vector<32x64xbf16>, vector<64x32xbf16>, vector<32x32xf32> -> vector<32x32xf32>
    %5 = arith.addf %0, %4 : vector<32x32xf32>
    %c0_5 = arith.constant 0 : index
    %c0_6 = arith.constant 0 : index
    %6 = vector.load %arg3[%c0_5, %c0_6] : memref<1x32xf32, #tpu.memory_space<vmem>>, vector<1x32xf32>
    %7 = vector.broadcast %6 : vector<1x32xf32> to vector<32x32xf32>
    %8 = arith.addf %5, %7 : vector<32x32xf32>
    %c0_7 = arith.constant 0 : index
    %c0_8 = arith.constant 0 : index
    %9 = vector.load %arg5[%c0_7, %c0_8] : memref<32x32xf32, #tpu.memory_space<vmem>>, vector<32x32xf32>
    tpu.vector_store %arg5[%c0_7, %c0_8], %8 {strides = array<i32>} : memref<32x32xf32, #tpu.memory_space<vmem>>, vector<32x32xf32>,
    return
  }
  func.func @transform_0(%arg0: i32) -> (i32, i32) {
    %c0_i32 = arith.constant 0 : i32
    %c0_i32_0 = arith.constant 0 : i32
    return %arg0, %c0_i32 : i32, i32
  }
  func.func @transform_1(%arg0: i32) -> (i32, i32) {
    %c0_i32 = arith.constant 0 : i32
    %c0_i32_0 = arith.constant 0 : i32
    %c0_i32_1 = arith.constant 0 : i32
    return %c0_i32, %c0_i32_0 : i32, i32
  }
  func.func @transform_2(%arg0: i32) -> (i32, i32) {
    %c0_i32 = arith.constant 0 : i32
    %c0_i32_0 = arith.constant 0 : i32
    %c0_i32_1 = arith.constant 0 : i32
    return %c0_i32, %c0_i32_0 : i32, i32
  }
  func.func @transform_3(%arg0: i32) -> (i32, i32) {
    %c0_i32 = arith.constant 0 : i32
    %c0_i32_0 = arith.constant 0 : i32
    return %arg0, %c0_i32 : i32, i32
  }
  func.func @transform_4(%arg0: i32) -> (i32, i32) {
    %c0_i32 = arith.constant 0 : i32
    %c0_i32_0 = arith.constant 0 : i32
    return %arg0, %c0_i32 : i32, i32
  }
}

module attributes {stable_mosaic.version = 11 : i64} {
  func.func @_ff_kernel(%arg0: i32, %arg1: memref<32x32xf32, #tpu.memory_space<vmem>>, %arg2: memref<1x32xf32, #tpu.memory_space<vmem>>, %arg3: memref<1x32xf32, #tpu.memory_space<vmem>>, %arg4: memref<32x128xbf16, #tpu.memory_space<vmem>>, %arg5: memref<1x128xf32, #tpu.memory_space<vmem>>, %arg6: memref<128x32xbf16, #tpu.memory_space<vmem>>, %arg7: memref<1x32xf32, #tpu.memory_space<vmem>>, %arg8: memref<32x32xf32, #tpu.memory_space<vmem>>) attributes {dimension_semantics = [#tpu.dimension_semantics<parallel>], iteration_bounds = array<i64: 1>, scalar_prefetch = 0 : i64, scratch_operands = 0 : i64, tpu.core_type = #tpu.core_type<tc>, window_params = [{transform_indices = @transform_0, window_bounds = array<i64: 32, 32>}, {pipeline_mode = #tpu.pipeline_mode<synchronous>, transform_indices = @transform_1, window_bounds = array<i64: 1, 32>}, {pipeline_mode = #tpu.pipeline_mode<synchronous>, transform_indices = @transform_2, window_bounds = array<i64: 1, 32>}, {pipeline_mode = #tpu.pipeline_mode<synchronous>, transform_indices = @transform_3, window_bounds = array<i64: 32, 128>}, {pipeline_mode = #tpu.pipeline_mode<synchronous>, transform_indices = @transform_4, window_bounds = array<i64: 1, 128>}, {pipeline_mode = #tpu.pipeline_mode<synchronous>, transform_indices = @transform_5, window_bounds = array<i64: 128, 32>}, {pipeline_mode = #tpu.pipeline_mode<synchronous>, transform_indices = @transform_6, window_bounds = array<i64: 1, 32>}, {transform_indices = @transform_7, window_bounds = array<i64: 32, 32>}]} {
    %c0 = arith.constant 0 : index
    %c0_0 = arith.constant 0 : index
    %0 = vector.load %arg1[%c0, %c0_0] : memref<32x32xf32, #tpu.memory_space<vmem>>, vector<32x32xf32>
    %c0_1 = arith.constant 0 : index
    %c0_2 = arith.constant 0 : index
    %1 = vector.load %arg2[%c0_1, %c0_2] : memref<1x32xf32, #tpu.memory_space<vmem>>, vector<1x32xf32>
    %c0_3 = arith.constant 0 : index
    %c0_4 = arith.constant 0 : index
    %2 = vector.load %arg3[%c0_3, %c0_4] : memref<1x32xf32, #tpu.memory_space<vmem>>, vector<1x32xf32>
    %cst = arith.constant dense<0.000000e+00> : vector<32xf32>
    %3 = vector.multi_reduction <add>, %0, %cst [1] : vector<32x32xf32> to vector<32xf32>
    %4 = vector.shape_cast %3 : vector<32xf32> to vector<32x1xf32>
    %cst_5 = arith.constant 3.200000e+01 : f32
    %5 = vector.broadcast %cst_5 : f32 to vector<32x1xf32>
    %6 = arith.divf %4, %5 : vector<32x1xf32>
    %7 = vector.broadcast %6 : vector<32x1xf32> to vector<32x32xf32>
    %8 = arith.subf %0, %7 : vector<32x32xf32>
    %9 = arith.mulf %8, %8 : vector<32x32xf32>
    %cst_6 = arith.constant dense<0.000000e+00> : vector<32xf32>
    %10 = vector.multi_reduction <add>, %9, %cst_6 [1] : vector<32x32xf32> to vector<32xf32>
    %11 = vector.shape_cast %10 : vector<32xf32> to vector<32x1xf32>
    %cst_7 = arith.constant 3.200000e+01 : f32
    %12 = vector.broadcast %cst_7 : f32 to vector<32x1xf32>
    %13 = arith.divf %11, %12 : vector<32x1xf32>
    %cst_8 = arith.constant 9.99999974E-6 : f32
    %14 = vector.broadcast %cst_8 : f32 to vector<32x1xf32>
    %15 = arith.addf %13, %14 : vector<32x1xf32>
    %16 = math.rsqrt %15 : vector<32x1xf32>
    %17 = vector.broadcast %16 : vector<32x1xf32> to vector<32x32xf32>
    %18 = arith.mulf %8, %17 : vector<32x32xf32>
    %19 = vector.broadcast %1 : vector<1x32xf32> to vector<32x32xf32>
    %20 = arith.mulf %18, %19 : vector<32x32xf32>
    %21 = vector.broadcast %2 : vector<1x32xf32> to vector<32x32xf32>
    %22 = arith.addf %20, %21 : vector<32x32xf32>
    %23 = arith.truncf %22 : vector<32x32xf32> to vector<32x32xbf16>
    %c0_9 = arith.constant 0 : index
    %c0_10 = arith.constant 0 : index
    %24 = vector.load %arg4[%c0_9, %c0_10] : memref<32x128xbf16, #tpu.memory_space<vmem>>, vector<32x128xbf16>
    %cst_11 = arith.constant dense<0.000000e+00> : vector<32x128xf32>
    %25 = tpu.matmul %23, %24, %cst_11 {dimension_numbers = #tpu.dot_dimension_numbers<[1], [0], [0], [1], [0, 0, 1, 1], [], []>} : vector<32x32xbf16>, vector<32x128xbf16>, vector<32x128xf32> -> vector<32x128xf32>
    %c0_12 = arith.constant 0 : index
    %c0_13 = arith.constant 0 : index
    %26 = vector.load %arg5[%c0_12, %c0_13] : memref<1x128xf32, #tpu.memory_space<vmem>>, vector<1x128xf32>
    %27 = vector.broadcast %26 : vector<1x128xf32> to vector<32x128xf32>
    %28 = arith.addf %25, %27 : vector<32x128xf32>
    %cst_14 = arith.constant 5.000000e-01 : f32
    %29 = vector.broadcast %cst_14 : f32 to vector<32x128xf32>
    %30 = arith.mulf %29, %28 : vector<32x128xf32>
    %cst_15 = arith.constant 4.471500e-02 : f32
    %31 = vector.broadcast %cst_15 : f32 to vector<32x128xf32>
    %32 = arith.mulf %31, %28 : vector<32x128xf32>
    %33 = arith.mulf %32, %28 : vector<32x128xf32>
    %34 = arith.mulf %33, %28 : vector<32x128xf32>
    %35 = arith.addf %28, %34 : vector<32x128xf32>
    %cst_16 = arith.constant 0.797884583 : f32
    %36 = vector.broadcast %cst_16 : f32 to vector<32x128xf32>
    %37 = arith.mulf %36, %35 : vector<32x128xf32>
    %38 = math.tanh %37 : vector<32x128xf32>
    %cst_17 = arith.constant 1.000000e+00 : f32
    %39 = vector.broadcast %cst_17 : f32 to vector<32x128xf32>
    %40 = arith.addf %39, %38 : vector<32x128xf32>
    %41 = arith.mulf %30, %40 : vector<32x128xf32>
    %42 = arith.truncf %41 : vector<32x128xf32> to vector<32x128xbf16>
    %c0_18 = arith.constant 0 : index
    %c0_19 = arith.constant 0 : index
    %43 = vector.load %arg6[%c0_18, %c0_19] : memref<128x32xbf16, #tpu.memory_space<vmem>>, vector<128x32xbf16>
    %cst_20 = arith.constant dense<0.000000e+00> : vector<32x32xf32>
    %44 = tpu.matmul %42, %43, %cst_20 {dimension_numbers = #tpu.dot_dimension_numbers<[1], [0], [0], [1], [0, 0, 1, 1], [], []>} : vector<32x128xbf16>, vector<128x32xbf16>, vector<32x32xf32> -> vector<32x32xf32>
    %45 = arith.addf %0, %44 : vector<32x32xf32>
    %c0_21 = arith.constant 0 : index
    %c0_22 = arith.constant 0 : index
    %46 = vector.load %arg7[%c0_21, %c0_22] : memref<1x32xf32, #tpu.memory_space<vmem>>, vector<1x32xf32>
    %47 = vector.broadcast %46 : vector<1x32xf32> to vector<32x32xf32>
    %48 = arith.addf %45, %47 : vector<32x32xf32>
    %c0_23 = arith.constant 0 : index
    %c0_24 = arith.constant 0 : index
    %49 = vector.load %arg8[%c0_23, %c0_24] : memref<32x32xf32, #tpu.memory_space<vmem>>, vector<32x32xf32>
    tpu.vector_store %arg8[%c0_23, %c0_24], %48 {strides = array<i32>} : memref<32x32xf32, #tpu.memory_space<vmem>>, vector<32x32xf32>,
    return
  }
  func.func @transform_0(%arg0: i32) -> (i32, i32) {
    %c0_i32 = arith.constant 0 : i32
    %c0_i32_0 = arith.constant 0 : i32
    return %arg0, %c0_i32 : i32, i32
  }
  func.func @transform_1(%arg0: i32) -> (i32, i32) {
    %c0_i32 = arith.constant 0 : i32
    %c0_i32_0 = arith.constant 0 : i32
    %c0_i32_1 = arith.constant 0 : i32
    return %c0_i32, %c0_i32_0 : i32, i32
  }
  func.func @transform_2(%arg0: i32) -> (i32, i32) {
    %c0_i32 = arith.constant 0 : i32
    %c0_i32_0 = arith.constant 0 : i32
    %c0_i32_1 = arith.constant 0 : i32
    return %c0_i32, %c0_i32_0 : i32, i32
  }
  func.func @transform_3(%arg0: i32) -> (i32, i32) {
    %c0_i32 = arith.constant 0 : i32
    %c0_i32_0 = arith.constant 0 : i32
    %c0_i32_1 = arith.constant 0 : i32
    return %c0_i32, %c0_i32_0 : i32, i32
  }
  func.func @transform_4(%arg0: i32) -> (i32, i32) {
    %c0_i32 = arith.constant 0 : i32
    %c0_i32_0 = arith.constant 0 : i32
    %c0_i32_1 = arith.constant 0 : i32
    return %c0_i32, %c0_i32_0 : i32, i32
  }
  func.func @transform_5(%arg0: i32) -> (i32, i32) {
    %c0_i32 = arith.constant 0 : i32
    %c0_i32_0 = arith.constant 0 : i32
    %c0_i32_1 = arith.constant 0 : i32
    return %c0_i32, %c0_i32_0 : i32, i32
  }
  func.func @transform_6(%arg0: i32) -> (i32, i32) {
    %c0_i32 = arith.constant 0 : i32
    %c0_i32_0 = arith.constant 0 : i32
    %c0_i32_1 = arith.constant 0 : i32
    return %c0_i32, %c0_i32_0 : i32, i32
  }
  func.func @transform_7(%arg0: i32) -> (i32, i32) {
    %c0_i32 = arith.constant 0 : i32
    %c0_i32_0 = arith.constant 0 : i32
    return %arg0, %c0_i32 : i32, i32
  }
}

module attributes {stable_mosaic.version = 11 : i64} {
  func.func @_head_kernel(%arg0: memref<2x32xf32, #tpu.memory_space<vmem>>, %arg1: memref<1x32xf32, #tpu.memory_space<vmem>>, %arg2: memref<1x32xf32, #tpu.memory_space<vmem>>, %arg3: memref<32x32xbf16, #tpu.memory_space<vmem>>, %arg4: memref<1x32xf32, #tpu.memory_space<vmem>>, %arg5: memref<32x2xbf16, #tpu.memory_space<vmem>>, %arg6: memref<1x2xf32, #tpu.memory_space<vmem>>, %arg7: memref<2x2xf32, #tpu.memory_space<vmem>>) attributes {dimension_semantics = [], scalar_prefetch = 0 : i64, scratch_operands = 0 : i64, tpu.core_type = #tpu.core_type<tc>} {
    %c0 = arith.constant 0 : index
    %c0_0 = arith.constant 0 : index
    %0 = vector.load %arg0[%c0, %c0_0] : memref<2x32xf32, #tpu.memory_space<vmem>>, vector<2x32xf32>
    %c0_1 = arith.constant 0 : index
    %c0_2 = arith.constant 0 : index
    %1 = vector.load %arg1[%c0_1, %c0_2] : memref<1x32xf32, #tpu.memory_space<vmem>>, vector<1x32xf32>
    %c0_3 = arith.constant 0 : index
    %c0_4 = arith.constant 0 : index
    %2 = vector.load %arg2[%c0_3, %c0_4] : memref<1x32xf32, #tpu.memory_space<vmem>>, vector<1x32xf32>
    %cst = arith.constant dense<0.000000e+00> : vector<2xf32>
    %3 = vector.multi_reduction <add>, %0, %cst [1] : vector<2x32xf32> to vector<2xf32>
    %4 = vector.shape_cast %3 : vector<2xf32> to vector<2x1xf32>
    %cst_5 = arith.constant 3.200000e+01 : f32
    %5 = vector.broadcast %cst_5 : f32 to vector<2x1xf32>
    %6 = arith.divf %4, %5 : vector<2x1xf32>
    %7 = vector.broadcast %6 : vector<2x1xf32> to vector<2x32xf32>
    %8 = arith.subf %0, %7 : vector<2x32xf32>
    %9 = arith.mulf %8, %8 : vector<2x32xf32>
    %cst_6 = arith.constant dense<0.000000e+00> : vector<2xf32>
    %10 = vector.multi_reduction <add>, %9, %cst_6 [1] : vector<2x32xf32> to vector<2xf32>
    %11 = vector.shape_cast %10 : vector<2xf32> to vector<2x1xf32>
    %cst_7 = arith.constant 3.200000e+01 : f32
    %12 = vector.broadcast %cst_7 : f32 to vector<2x1xf32>
    %13 = arith.divf %11, %12 : vector<2x1xf32>
    %cst_8 = arith.constant 9.99999974E-6 : f32
    %14 = vector.broadcast %cst_8 : f32 to vector<2x1xf32>
    %15 = arith.addf %13, %14 : vector<2x1xf32>
    %16 = math.rsqrt %15 : vector<2x1xf32>
    %17 = vector.broadcast %16 : vector<2x1xf32> to vector<2x32xf32>
    %18 = arith.mulf %8, %17 : vector<2x32xf32>
    %19 = vector.broadcast %1 : vector<1x32xf32> to vector<2x32xf32>
    %20 = arith.mulf %18, %19 : vector<2x32xf32>
    %21 = vector.broadcast %2 : vector<1x32xf32> to vector<2x32xf32>
    %22 = arith.addf %20, %21 : vector<2x32xf32>
    %23 = arith.truncf %22 : vector<2x32xf32> to vector<2x32xbf16>
    %c0_9 = arith.constant 0 : index
    %c0_10 = arith.constant 0 : index
    %24 = vector.load %arg3[%c0_9, %c0_10] : memref<32x32xbf16, #tpu.memory_space<vmem>>, vector<32x32xbf16>
    %cst_11 = arith.constant dense<0.000000e+00> : vector<2x32xf32>
    %25 = tpu.matmul %23, %24, %cst_11 {dimension_numbers = #tpu.dot_dimension_numbers<[1], [0], [0], [1], [0, 0, 1, 1], [], []>} : vector<2x32xbf16>, vector<32x32xbf16>, vector<2x32xf32> -> vector<2x32xf32>
    %c0_12 = arith.constant 0 : index
    %c0_13 = arith.constant 0 : index
    %26 = vector.load %arg4[%c0_12, %c0_13] : memref<1x32xf32, #tpu.memory_space<vmem>>, vector<1x32xf32>
    %27 = vector.broadcast %26 : vector<1x32xf32> to vector<2x32xf32>
    %28 = arith.addf %25, %27 : vector<2x32xf32>
    %29 = arith.truncf %28 : vector<2x32xf32> to vector<2x32xbf16>
    %c0_14 = arith.constant 0 : index
    %c0_15 = arith.constant 0 : index
    %30 = vector.load %arg5[%c0_14, %c0_15] : memref<32x2xbf16, #tpu.memory_space<vmem>>, vector<32x2xbf16>
    %cst_16 = arith.constant dense<0.000000e+00> : vector<2x2xf32>
    %31 = tpu.matmul %29, %30, %cst_16 {dimension_numbers = #tpu.dot_dimension_numbers<[1], [0], [0], [1], [0, 0, 1, 1], [], []>} : vector<2x32xbf16>, vector<32x2xbf16>, vector<2x2xf32> -> vector<2x2xf32>
    %c0_17 = arith.constant 0 : index
    %c0_18 = arith.constant 0 : index
    %32 = vector.load %arg6[%c0_17, %c0_18] : memref<1x2xf32, #tpu.memory_space<vmem>>, vector<1x2xf32>
    %33 = vector.broadcast %32 : vector<1x2xf32> to vector<2x2xf32>
    %34 = arith.addf %31, %33 : vector<2x2xf32>
    %c0_19 = arith.constant 0 : index
    %c0_20 = arith.constant 0 : index
    %35 = vector.load %arg7[%c0_19, %c0_20] : memref<2x2xf32, #tpu.memory_space<vmem>>, vector<2x2xf32>
    tpu.vector_store %arg7[%c0_19, %c0_20], %34 {strides = array<i32>} : memref<2x2xf32, #tpu.memory_space<vmem>>, vector<2x2xf32>,
    return
  }
}

</mosaic_0001>

<bundles_post_ra>
// kernel: tile.30
= control target key start
LH: loop header
LB: loop body
LE: loop exit
PB: predicated region body
PF: predicated region fallthrough
CT: control target
= control target key end

     0   :  { %s28_s0 = inlined_call_operand.vmem [shape: f32[2], index: 0, kind: input, shape index: {}]   ;;  %s29_s1 = inlined_call_operand.vmem [shape: f32[16,2], index: 1, kind: output, shape index: {}]  }
   0x1   :  { %v4_v0 = vld [vmem:[%s28_s0] ss:$0 sm:$0xff] }
   0x2   :  { %5 = vst [vmem:[%s29_s1] sm:$0xff] %v4_v0  ;;  %8 = vst [vmem:[%s29_s1 + $0x8] sm:$0xff] %v4_v0 }

// kernel: tile.44
= control target key start
LH: loop header
LB: loop body
LE: loop exit
PB: predicated region body
PF: predicated region fallthrough
CT: control target
= control target key end

     0   :  { %vm83_vm0 = vcmask 1047556   ;;  %vm85_vm1 = vcmask 261120   ;;  %vm104_vm2 = vcmask 523520   ;;  %s226_s0 = inlined_call_operand.vmem [shape: f32[16,2,32], index: 0, kind: input, shape index: {}]   ;;  %s227_s1 = inlined_call_operand.vmem [shape: f32[16,64], index: 1, kind: output, shape index: {}]  }
   0x1   :  { %v139_v0 = vld [vmem:[%s226_s0 + $0xe] sm:$0x3]  ;;  %v140_v1 = vld [vmem:[%s226_s0 + $0xc] sm:$0x3]  ;;  %v141_v2 = vld [vmem:[%s226_s0 + $0xa] sm:$0x3] }
   0x2   :  { %49 = vst [vmem:[#allocation0 + $0x38] sm:$0x3] %v139_v0  ;;  %54 = vst [vmem:[#allocation0 + $0x30] sm:$0x3] %v140_v1  ;;  %v142_v3 = vld [vmem:[%s226_s0 + $0x8] sm:$0x3] }
   0x3   :  { %59 = vst [vmem:[#allocation0 + $0x28] sm:$0x3] %v141_v2  ;;  %v143_v4 = vld [vmem:[%s226_s0 + $0x6] sm:$0x3]  ;;  %v144_v5 = vld [vmem:[%s226_s0 + $0x4] sm:$0x3] }
   0x4   :  { %64 = vst [vmem:[#allocation0 + $0x20] sm:$0x3] %v142_v3  ;;  %69 = vst [vmem:[#allocation0 + $0x18] sm:$0x3] %v143_v4  ;;  %v145_v6 = vld [vmem:[%s226_s0 + $0x2] sm:$0x3] }
   0x5   :  { %74 = vst [vmem:[#allocation0 + $0x10] sm:$0x3] %v144_v5  ;;  %v79_v7 = vld [vmem:[%s226_s0] sm:$0x3]  ;;  %78 = vst [vmem:[#allocation0 + $0x8] sm:$0x3] %v145_v6 }
   0x6   :  { %80 = vst [vmem:[#allocation0] sm:$0x3] %v79_v7  ;;  %v131_v8 = vld [vmem:[%s226_s0 + $0x1e] sm:$0x3]  ;;  %v132_v9 = vld [vmem:[%s226_s0 + $0x1c] sm:$0x3] }
   0x7   :  { %v133_v10 = vld [vmem:[%s226_s0 + $0x1a] sm:$0x3]  ;;  %9 = vst [vmem:[#allocation0 + $0x78] sm:$0x3] %v131_v8  ;;  %14 = vst [vmem:[#allocation0 + $0x70] sm:$0x3] %v132_v9 }
   0x8   :  { %19 = vst [vmem:[#allocation0 + $0x68] sm:$0x3] %v133_v10  ;;  %v134_v11 = vld [vmem:[%s226_s0 + $0x18] sm:$0x3]  ;;  %v135_v12 = vld [vmem:[%s226_s0 + $0x16] sm:$0x3] }
   0x9   :  { %v136_v13 = vld [vmem:[%s226_s0 + $0x14] sm:$0x3]  ;;  %24 = vst [vmem:[#allocation0 + $0x60] sm:$0x3] %v134_v11  ;;  %29 = vst [vmem:[#allocation0 + $0x58] sm:$0x3] %v135_v12 }
   0xa   :  { %34 = vst [vmem:[#allocation0 + $0x50] sm:$0x3] %v136_v13  ;;  %v137_v14 = vld [vmem:[%s226_s0 + $0x12] sm:$0x3]  ;;  %v138_v15 = vld [vmem:[%s226_s0 + $0x10] sm:$0x3] }
   0xb   :  { %39 = vst [vmem:[#allocation0 + $0x48] sm:$0x3] %v137_v14  ;;  %44 = vst [vmem:[#allocation0 + $0x40] sm:$0x3] %v138_v15  ;;  %s149_s0 = smov 32  }
   0xc   :  { %v99_v16 = vld [vmem:[#allocation0 + $0x1] ss:$8 sm:$0xf0]   ;;  %v82_v17 = vld [vmem:[#allocation0] ss:$8 sm:$0xf0]  }
   0xd   :  { %v97_v18 = vld [vmem:[#allocation0 + $0x1] ss:$8 sm:$0xf]   ;;  %v81_v19 = vld [vmem:[#allocation0] ss:$8 sm:$0xf]  }
   0xe   :  { %v101_v20 = vsel %vm83_vm0, %v99_v16, %v97_v18  ;;  %v84_v21 = vsel %vm83_vm0, %v82_v17, %v81_v19 }
   0xf   :  { %102 = vrot.lane.b32.xlu0 %v101_v20, %s149_s0  ;;  %86 = vst.msk [vmem:[%s227_s1] sm:$0xff] %vm85_vm1, %v84_v21  }
  0x10   :  { %v109_v22 = vld [vmem:[#allocation0 + $0x41] ss:$8 sm:$0xf0]   ;;  %v90_v23 = vld [vmem:[#allocation0 + $0x40] ss:$8 sm:$0xf0]  }
  0x12   :  { %v107_v24 = vld [vmem:[#allocation0 + $0x41] ss:$8 sm:$0xf]   ;;  %v88_v25 = vld [vmem:[#allocation0 + $0x40] ss:$8 sm:$0xf]  }
  0x13   :  { %v111_v26 = vsel %vm83_vm0, %v109_v22, %v107_v24  ;;  %v92_v27 = vsel %vm83_vm0, %v90_v23, %v88_v25 }
  0x14   :  { %146 = vst.msk [vmem:[%s227_s1 + $0x8] sm:$0xff] %vm85_vm1, %v92_v27   ;;  %112 = vrot.lane.b32.xlu0 %v111_v26, %s149_s0 }
  0x81   :  { %v103_v28 = vpop.permute.xlu0 %102  }
  0x82   :  { %105 = vst.msk [vmem:[%s227_s1] sm:$0xff] %vm104_vm2, %v103_v28  }
  0x86   :  { %v113_v29 = vpop.permute.xlu0 %112  }
  0x87   :  { %147 = vst.msk [vmem:[%s227_s1 + $0x8] sm:$0xff] %vm104_vm2, %v113_v29  }

// kernel: higentra_forward.11
= control target key start
LH: loop header
LB: loop body
LE: loop exit
PB: predicated region body
PF: predicated region fallthrough
CT: control target
= control target key end

     0   :  { %s912_s24 = smov 0   ;;  %s914_s25 = smov 0   ;;  %s1036_s0 = inlined_call_operand.vmem [shape: f32[2,16,32], index: 0, kind: input, shape index: {}]   ;;  %s1037_s1 = inlined_call_operand.vmem [shape: f32[1,32], index: 1, kind: input, shape index: {}]   ;;  %s1038_s2 = inlined_call_operand.vmem [shape: f32[1,32], index: 2, kind: input, shape index: {}]   ;;  %s1039_s3 = inlined_call_operand.vmem [shape: bf16[32,192], index: 3, kind: input, shape index: {}]   ;;  %s1040_s4 = inlined_call_operand.vmem [shape: f32[16,192], index: 4, kind: input, shape index: {}]   ;;  %s1041_s5 = inlined_call_operand.vmem [shape: f32[16,192], index: 5, kind: input, shape index: {}]   ;;  %s1042_s6 = inlined_call_operand.vmem [shape: f32[16,192], index: 6, kind: input, shape index: {}]   ;;  %s1043_s7 = inlined_call_operand.vmem [shape: f32[2,16,192], index: 7, kind: output, shape index: {}]  }
   0x1   :  { %s916_s26 = smov 0  }
   0x2 LB: > { %s29_s27 = sadd.s32 1, %s860_s25  ;;  %p786_p0 = scmp.ge.s32.totalorder %s864_s26, 1  ;;  %s864_s26 = sphi %s916_s26, %s17_s26   ;;  %s860_s25 = sphi %s914_s25, %s1045_s25   ;;  %s856_s24 = sphi %s912_s24, %s1044_s24  }
   0x3   : > { %p31_p1 = scmp.ge.s32.totalorder %s29_s27, 2  ;;  %p294_p2 = scmp.lt.s32.totalorder %s864_s26, 3 }
   0x5   : > { %s1047_s27 = smov (%p31_p1, %s29_s27), 0  ;;  %p295_p3 = pnand %p786_p0, %p294_p2 }
   0x6   : > { %p354_p4 = scmp.lt.s32.totalorder (!%p295_p3), %s856_s24, 1  ;;  %s867_s21 = smov (!%p295_p3), 64  }
   0x7   : > { %298 = sbr.rel (%p295_p3) target bundleno = 884 (0x374), region = 48  ;;  %s869_s10 = smov (!%p295_p3), 63  }
   0x8   : > { %s870_s22 = smov (!%p295_p3), 127  }
   0xc   : > { %s1049_s24 = smov (!%p354_p4, %s856_s24), 1  ;;  %vm400_vm0 = vcmask 261120   ;;  %v832_v14 = vld [vmem:[%s1039_s3 + $0x14] ss:$8 sps:$4 sm:$0xff]   ;;  %v834_v15 = vld [vmem:[%s1039_s3 + $0x10] ss:$8 sps:$4 sm:$0xff]  }
   0xd   : > { %s800_s28 = sshll.u32 %s1049_s24, 4  ;;  %v835_v16 = vld [vmem:[%s1039_s3 + $0x4] ss:$8 sps:$4 sm:$0xff]   ;;  %484 = vmatprep.subr.bf16.mxu0 %v832_v14  ;;  %v866_v17 = vmov 0   ;;  %v837_v18 = vld [vmem:[%s1039_s3] ss:$8 sps:$4 sm:$0xff]  }
   0xe   : > { %s361_s8 = scalar_lea.vmem %s1036_s0, %s800_s28  ;;  %504 = vmatprep.mubr.bf16.mxu0 %v866_v17  ;;  %485 = vmatpush1.bf16.msra.mxu0 %v834_v15  ;;  %v791_v27 = vld [vmem:[%s1037_s1] ss:$0 sm:$0xff]  ;;  %v538_v38 = vld [vmem:[%s1041_s5 + $0x10] sm:$0xff]  ;;  %s868_s28 = smov 1   ;;  %v537_v42 = vld [vmem:[%s1041_s5 + $0x8] sm:$0xff]  ;;  %vm515_vm1 = vcmask 1048064  }
   0xf   : > { %v396_v0 = vld [vmem:[%s361_s8] sm:$0xff]  ;;  %v397_v1 = vld [vmem:[%s361_s8 + $0x8] sm:$0xff]  ;;  %486 = vmatprep.subr.bf16.mxu0 %v835_v16  ;;  %v539_v43 = vld [vmem:[%s1041_s5 + $0x18] sm:$0xff]  ;;  %vm552_vm2 = vcmask 7168   ;;  %vm602_vm3 = vcmask 515072   ;;  %vm575_vm4 = vcmask 1039360  }
  0x10   : > { %v401_v2 = vsel %vm400_vm0, %v396_v0, 0.0  ;;  %v404_v3 = vsel %vm400_vm0, %v397_v1, 0.0  ;;  %v792_v31 = vld [vmem:[%s1038_s2] ss:$0 sm:$0xff]  ;;  %v587_v44 = vld [vmem:[%s1042_s6 + $0x8] sm:$0xff]  ;;  %v588_v47 = vld [vmem:[%s1042_s6 + $0x10] sm:$0xff] }
  0x11   : > { %402 = vadd.xlane.f32.xlu0 %v401_v2  ;;  %v586_v40 = vld [vmem:[%s1042_s6] sm:$0xff]  ;;  %v589_v51 = vld [vmem:[%s1042_s6 + $0x18] sm:$0xff]  ;;  %v529_v14 = vld [vmem:[%s1040_s4 + $0x8] sm:$0xff]  ;;  %s801_s8 = sshll.u32 %s1049_s24, 5  ;;  %vm625_vm5 = vcmask 531456   ;;  %vm637_vm6 = vcmask 523264  }
  0x12   : > { %487 = vmatpush1.bf16.msra.mxu0 %v837_v18  ;;  %v536_v41 = vld [vmem:[%s1041_s5] sm:$0xff]  ;;  %s393_s11 = scalar_lea.vmem %s1043_s7, %s801_s8 }
  0x13   : > { %v528_v16 = vld [vmem:[%s1040_s4] sm:$0xff] }
  0x15   : > { %405 = vadd.xlane.f32.xlu0 %v404_v3 }
  0x9a   : > { %v403_v4 = vpop.xlane.xlu0 %402 }
  0x9b   : > { %v408_v5 = vmul.f32 0.03125, %v403_v4 }
  0x9d   : > { %v410_v6 = vsub.f32 %v396_v0, %v408_v5 }
  0x9e   : > { %v406_v7 = vpop.xlane.xlu0 %405 }
  0x9f   : > { %v409_v8 = vmul.f32 0.03125, %v406_v7  ;;  %v412_v9 = vmul.f32 %v410_v6, %v410_v6 }
  0xa1   : > { %v411_v10 = vsub.f32 %v397_v1, %v409_v8  ;;  %v414_v11 = vsel %vm400_vm0, %v412_v9, 0.0 }
  0xa2   : > { %415 = vadd.xlane.f32.xlu1 %v414_v11 }
  0xa3   : > { %v413_v12 = vmul.f32 %v411_v10, %v411_v10 }
  0xa5   : > { %v417_v13 = vsel %vm400_vm0, %v413_v12, 0.0 }
  0xa6   : > { %418 = vadd.xlane.f32.xlu1 %v417_v13 }
 0x12b   : > { %v416_v19 = vpop.xlane.xlu1 %415 }
 0x12c   : > { %v420_v20 = vmul.f32 0.03125, %v416_v19 }
 0x12e   : > { %v422_v21 = vadd.f32 1e-05, %v420_v20 }
 0x12f   : > { %v419_v22 = vpop.xlane.xlu1 %418 }
 0x130   : > { %838 = vrsqrt.f32 %v422_v21  ;;  %v421_v23 = vmul.f32 0.03125, %v419_v22 }
 0x132   : > { %v423_v24 = vadd.f32 1e-05, %v421_v23 }
 0x134   : > { %840 = vrsqrt.f32 %v423_v24 }
 0x13d   : > { %v839_v25 = vpop.eup %838 }
 0x13e   : > { %v426_v26 = vmul.f32 %v839_v25, %v410_v6 }
 0x140   : > { %v434_v30 = vmul.f32 %v791_v27, %v426_v26 }
 0x141   : > { %v841_v28 = vpop.eup %840 }
 0x142   : > { %v427_v29 = vmul.f32 %v841_v28, %v411_v10  ;;  %v442_v33 = vadd.f32 %v792_v31, %v434_v30 }
 0x144   : > { %v435_v32 = vmul.f32 %v791_v27, %v427_v29  ;;  %v531_v27 = vld [vmem:[%s1040_s4 + $0x18] sm:$0xff]  ;;  %v530_v29 = vld [vmem:[%s1040_s4 + $0x10] sm:$0xff] }
 0x146   : > { %v443_v34 = vadd.f32 %v792_v31, %v435_v32 }
 0x148   : > { %v444_v35 = vpack.c.bf16 %v443_v34, %v442_v33 }
 0x14a   : > { %797 = vmatmul.mubr.msk.bf16.vlgmr.msra.gmra.mxu0 %vm400_vm0, %v444_v35 }
 0x20a   : > { %v959_v36 = vpop.f32.mrf.mxu0 }
 0x20b   : > { %516 = vrot.lane.b32.xlu0 %v959_v36, %s867_s21  ;;  %v532_v20 = vmul.f32 %v528_v16, %v959_v36 }
 0x20c   : > { %v962_v37 = vpop.f32.mrf.mxu0 }
 0x20d   : > { %v533_v18 = vmul.f32 %v529_v14, %v962_v37 }
 0x20e   : > { %v967_v39 = vpop.f32.mrf.mxu0 }
 0x20f   : > { %548 = vrot.lane.b32.xlu0 %v538_v38, %s868_s28  ;;  %518 = vrot.lane.b32.xlu1 %v967_v39, %s867_s21  ;;  %v534_v32 = vmul.f32 %v530_v29, %v967_v39 }
 0x210   : > { %v990_v48 = vpop.f32.mrf.mxu0 }
 0x211   : > { %v535_v30 = vmul.f32 %v531_v27, %v990_v48 }
 0x213   : > { %594 = vrot.lane.b32.xlu0 %v586_v40, %s869_s10  ;;  %544 = vrot.lane.b32.xlu1 %v536_v41, %s868_s28 }
 0x217   : > { %546 = vrot.lane.b32.xlu1 %v537_v42, %s868_s28 }
 0x21b   : > { %550 = vrot.lane.b32.xlu1 %v539_v43, %s868_s28 }
 0x21f   : > { %596 = vrot.lane.b32.xlu1 %v587_v44, %s869_s10 }
 0x27d   : > { %v517_v45 = vpop.permute.xlu0 %516 }
 0x27e   : > { %v520_v46 = vsel %vm515_vm1, %v517_v45, %v962_v37 }
 0x27f   : > { %522 = vrot.lane.b32.xlu0 %v520_v46, %s867_s21 }
 0x281   : > { %v519_v49 = vpop.permute.xlu1 %518  ;;  %v549_v52 = vpop.permute.xlu0 %548 }
 0x282   : > { %v521_v50 = vsel %vm515_vm1, %v519_v49, %v990_v48  ;;  %v561_v56 = vmul.f32 %v549_v52, %v967_v39 }
 0x283   : > { %598 = vrot.lane.b32.xlu0 %v588_v47, %s869_s10  ;;  %524 = vrot.lane.b32.xlu1 %v521_v50, %s867_s21  ;;  %s871_s21 = smov 65  }
 0x285   : > { %v545_v53 = vpop.permute.xlu1 %544  ;;  %v595_v58 = vpop.permute.xlu0 %594 }
 0x286   : > { %v559_v54 = vmul.f32 %v545_v53, %v959_v36  ;;  %v609_v61 = vmul.f32 %v595_v58, %v520_v46 }
 0x287   : > { %600 = vrot.lane.b32.xlu1 %v589_v51, %s869_s10 }
 0x288   : > { %567 = vrot.lane.b32.xlu0 %v559_v54, %s870_s22 }
 0x289   : > { %v547_v55 = vpop.permute.xlu1 %546 }
 0x28a   : > { %v553_v57 = vsel %vm552_vm2, %v545_v53, %v547_v55 }
 0x28b   : > { %v560_v59 = vmul.f32 %v553_v57, %v520_v46 }
 0x28c   : > { %571 = vrot.lane.b32.xlu0 %v561_v56, %s870_s22 }
 0x28d   : > { %v551_v60 = vpop.permute.xlu1 %550  ;;  %569 = vrot.lane.b32.xlu1 %v560_v59, %s870_s22 }
 0x28e   : > { %v554_v62 = vsel %vm552_vm2, %v549_v52, %v551_v60 }
 0x28f   : > { %v562_v63 = vmul.f32 %v554_v62, %v521_v50 }
 0x290   : > { %617 = vrot.lane.b32.xlu0 %v609_v61, %s871_s21 }
 0x291   : > { %573 = vrot.lane.b32.xlu1 %v562_v63, %s870_s22  ;;  %v597_v0 = vpop.permute.xlu1 %596 }
 0x292   : > { %v603_v1 = vsel %vm602_vm3, %v595_v58, %v597_v0 }
 0x2f1   : > { %v523_v2 = vpop.permute.xlu0 %522 }
 0x2f2   : > { %v526_v3 = vsel %vm515_vm1, %v523_v2, %v517_v45 }
 0x2f3   : > { %v610_v4 = vmul.f32 %v603_v1, %v526_v3 }
 0x2f5   : > { %v599_v5 = vpop.permute.xlu0 %598  ;;  %v525_v6 = vpop.permute.xlu1 %524  ;;  %619 = vrot.lane.b32.xlu1 %v610_v4, %s871_s21 }
 0x2f6   : > { %v611_v7 = vmul.f32 %v599_v5, %v521_v50  ;;  %v527_v9 = vsel %vm515_vm1, %v525_v6, %v519_v49 }
 0x2f8   : > { %621 = vrot.lane.b32.xlu0 %v611_v7, %s871_s21 }
 0x2f9   : > { %v601_v8 = vpop.permute.xlu1 %600 }
 0x2fa   : > { %v604_v10 = vsel %vm602_vm3, %v599_v5, %v601_v8  ;;  %v568_v12 = vpop.permute.xlu0 %567 }
 0x2fb   : > { %v612_v11 = vmul.f32 %v604_v10, %v527_v9 }
 0x2fd   : > { %623 = vrot.lane.b32.xlu1 %v612_v11, %s871_s21 }
 0x2fe   : > { %v572_v15 = vpop.permute.xlu0 %571 }
 0x2ff   : > { %v570_v13 = vpop.permute.xlu1 %569 }
 0x300   : > { %v576_v19 = vsel %vm575_vm4, %v568_v12, %v570_v13  ;;  %v583_v21 = vadd.f32 %v570_v13, %v533_v18 }
 0x301   : > { %v582_v22 = vadd.f32 %v576_v19, %v532_v20 }
 0x302   : > { %v618_v23 = vpop.permute.xlu0 %617 }
 0x303   : > { %v574_v17 = vpop.permute.xlu1 %573 }
 0x304   : > { %v577_v31 = vsel %vm575_vm4, %v572_v15, %v574_v17  ;;  %v585_v33 = vadd.f32 %v574_v17, %v535_v30 }
 0x305   : > { %v584_v34 = vadd.f32 %v577_v31, %v534_v32 }
 0x367   : > { %v620_v24 = vpop.permute.xlu1 %619 }
 0x368   : > { %v626_v25 = vsel %vm625_vm5, %v618_v23, %v620_v24  ;;  %v633_v26 = vadd.f32 %v620_v24, %v583_v21 }
 0x369   : > { %v632_v28 = vadd.f32 %v626_v25, %v582_v22 }
 0x36a   : > { %638 = vst.msk [vmem:[%s393_s11 + $0x8] sm:$0xff] %vm637_vm6, %v633_v26  ;;  %v622_v35 = vpop.permute.xlu0 %621 }
 0x36b   : > { %636 = vst [vmem:[%s393_s11] sm:$0xff] %v632_v28 }
 0x36f   : > { %v624_v36 = vpop.permute.xlu1 %623 }
 0x370   : > { %v627_v37 = vsel %vm625_vm5, %v622_v35, %v624_v36  ;;  %v635_v38 = vadd.f32 %v624_v36, %v585_v33 }
 0x371   : > { %v634_v40 = vadd.f32 %v627_v37, %v584_v34 }
 0x372   : > { %640 = vst.msk [vmem:[%s393_s11 + $0x18] sm:$0xff] %vm637_vm6, %v635_v38 }
 0x373   : > { %639 = vst [vmem:[%s393_s11 + $0x10] sm:$0xff] %v634_v40 }
 0x374 PF: > { %s17_s26 = sadd.s32 1, %s864_s26   ;;  %s1044_s24 = smov %s860_s25 }
 0x375   : > { %p14_p5 = scmp.ge.s32.totalorder %s17_s26, 4   ;;  %s1045_s25 = smov %s1047_s27 }
 0x377   :  { %16 = sbr.rel (!%p14_p5) target bundleno = 2 (0x2), region = 87 }

// kernel: higentra_forward.12
= control target key start
LH: loop header
LB: loop body
LE: loop exit
PB: predicated region body
PF: predicated region fallthrough
CT: control target
= control target key end

     0   :  { %v2203_v0 = vmov 0.0   ;;  %vm113_vm0 = vcmask 261120   ;;  %vm2204_vm1 = vmmov 0   ;;  %vm850_vm2 = vcmask 9216   ;;  %s2758_s1 = inlined_call_operand.vmem [shape: f32[16,2,32], index: 1, kind: input, shape index: {}]   ;;  %s2759_s0 = inlined_call_operand.vmem [shape: f32[16,2,32], index: 0, kind: input, shape index: {}]   ;;  %s2760_s2 = inlined_call_operand.vmem [shape: f32[16,2,32], index: 2, kind: input, shape index: {}]   ;;  %s2761_s4 = inlined_call_operand.vmem [shape: f32[16,2], index: 4, kind: output, shape index: {1}]   ;;  %s2762_s3 = inlined_call_operand.vmem [shape: f32[16,2,32], index: 3, kind: output, shape index: {0}]  }
   0x1   :  { %1977 = vmatprep.subr.bf16.mxu0 %v2203_v0  ;;  %1983 = vmatprep.subr.bf16.mxu1 %v2203_v0  ;;  %v49_v1 = vld [vmem:[%s2758_s1] sm:$0x3]  ;;  %v50_v2 = vld [vmem:[%s2758_s1 + $0x2] sm:$0x3]  ;;  %v51_v5 = vld [vmem:[%s2758_s1 + $0x4] sm:$0x3] }
   0x2   :  { %v65_v3 = vpack.c.bf16 %v49_v1, %v49_v1  ;;  %v66_v4 = vpack.c.bf16 %v50_v2, %v50_v2  ;;  %1979 = vmatprep.mubr.msk.bf16.mxu0 %vm2204_vm1, %v2203_v0  ;;  %1985 = vmatprep.mubr.msk.bf16.mxu1 %vm2204_vm1, %v2203_v0  ;;  %v52_v6 = vld [vmem:[%s2758_s1 + $0x6] sm:$0x3]  ;;  %v17_v9 = vld [vmem:[%s2759_s0] sm:$0x3]  ;;  %v18_v10 = vld [vmem:[%s2759_s0 + $0x2] sm:$0x3]  ;;  %v67_v11 = vpack.c.bf16 %v51_v5, %v51_v5 }
   0x3   :  { %v68_v12 = vpack.c.bf16 %v52_v6, %v52_v6  ;;  %v33_v13 = vpack.c.bf16 %v17_v9, %v17_v9  ;;  %v34_v14 = vpack.c.bf16 %v18_v10, %v18_v10  ;;  %v53_v17 = vld [vmem:[%s2758_s1 + $0x8] sm:$0x3]  ;;  %v54_v18 = vld [vmem:[%s2758_s1 + $0xa] sm:$0x3]  ;;  %v19_v19 = vld [vmem:[%s2759_s0 + $0x4] sm:$0x3] }
   0x4   :  { %v118_v7 = vsel %vm113_vm0, %v65_v3, 0  ;;  %v164_v8 = vsel %vm113_vm0, %v66_v4, 0  ;;  %v210_v15 = vsel %vm113_vm0, %v67_v11, 0  ;;  %v20_v20 = vld [vmem:[%s2759_s0 + $0x6] sm:$0x3]  ;;  %v69_v21 = vpack.c.bf16 %v53_v17, %v53_v17 }
   0x5   :  { %1978 = vmatpush3.bf16.xpose.msra.mxu0 %v118_v7  ;;  %1984 = vmatpush3.bf16.xpose.msra.mxu1 %v164_v8  ;;  %v256_v16 = vsel %vm113_vm0, %v68_v12, 0  ;;  %v70_v22 = vpack.c.bf16 %v54_v18, %v54_v18  ;;  %v35_v23 = vpack.c.bf16 %v19_v19, %v19_v19  ;;  %v36_v24 = vpack.c.bf16 %v20_v20, %v20_v20  ;;  %v55_v27 = vld [vmem:[%s2758_s1 + $0xc] sm:$0x3]  ;;  %v56_v28 = vld [vmem:[%s2758_s1 + $0xe] sm:$0x3] }
   0x6   :  { %1989 = vmatprep.subr.bf16.mxu0 %v2203_v0  ;;  %1995 = vmatprep.subr.bf16.mxu1 %v2203_v0  ;;  %v302_v25 = vsel %vm113_vm0, %v69_v21, 0  ;;  %v21_v29 = vld [vmem:[%s2759_s0 + $0x8] sm:$0x3]  ;;  %v22_v30 = vld [vmem:[%s2759_s0 + $0xa] sm:$0x3]  ;;  %v71_v31 = vpack.c.bf16 %v55_v27, %v55_v27  ;;  %v72_v32 = vpack.c.bf16 %v56_v28, %v56_v28  ;;  %vm967_vm3 = vcmask 1040384  }
   0x7   :  { %v348_v26 = vsel %vm113_vm0, %v70_v22, 0  ;;  %v37_v33 = vpack.c.bf16 %v21_v29, %v21_v29  ;;  %v38_v34 = vpack.c.bf16 %v22_v30, %v22_v30  ;;  %v57_v37 = vld [vmem:[%s2758_s1 + $0x10] sm:$0x3]  ;;  %v58_v38 = vld [vmem:[%s2758_s1 + $0x12] sm:$0x3]  ;;  %vm963_vm4 = vcmask 15360  }
   0x8   :  { %v394_v35 = vsel %vm113_vm0, %v71_v31, 0  ;;  %v440_v36 = vsel %vm113_vm0, %v72_v32, 0  ;;  %v23_v39 = vld [vmem:[%s2759_s0 + $0xc] sm:$0x3]  ;;  %v24_v40 = vld [vmem:[%s2759_s0 + $0xe] sm:$0x3]  ;;  %v73_v41 = vpack.c.bf16 %v57_v37, %v57_v37  ;;  %v74_v42 = vpack.c.bf16 %v58_v38, %v58_v38 }
   0x9   :  { %v39_v43 = vpack.c.bf16 %v23_v39, %v23_v39  ;;  %v40_v44 = vpack.c.bf16 %v24_v40, %v24_v40  ;;  %v59_v47 = vld [vmem:[%s2758_s1 + $0x14] sm:$0x3]  ;;  %v60_v48 = vld [vmem:[%s2758_s1 + $0x16] sm:$0x3]  ;;  %v25_v49 = vld [vmem:[%s2759_s0 + $0x10] sm:$0x3] }
   0xa   :  { %v486_v45 = vsel %vm113_vm0, %v73_v41, 0  ;;  %v532_v46 = vsel %vm113_vm0, %v74_v42, 0  ;;  %v26_v50 = vld [vmem:[%s2759_s0 + $0x12] sm:$0x3]  ;;  %v75_v51 = vpack.c.bf16 %v59_v47, %v59_v47  ;;  %v76_v52 = vpack.c.bf16 %v60_v48, %v60_v48  ;;  %v61_v57 = vld [vmem:[%s2758_s1 + $0x18] sm:$0x3] }
   0xb   :  { %v41_v53 = vpack.c.bf16 %v25_v49, %v25_v49  ;;  %v42_v54 = vpack.c.bf16 %v26_v50, %v26_v50  ;;  %v62_v58 = vld [vmem:[%s2758_s1 + $0x1a] sm:$0x3]  ;;  %v27_v59 = vld [vmem:[%s2759_s0 + $0x14] sm:$0x3]  ;;  %v28_v60 = vld [vmem:[%s2759_s0 + $0x16] sm:$0x3]  ;;  %v77_v61 = vpack.c.bf16 %v61_v57, %v61_v57 }
   0xc   :  { %1980 = vmatmul.mubr.msk.bf16.vlgmr.msra.gmra.mxu0 %vm113_vm0, %v33_v13  ;;  %1986 = vmatmul.mubr.msk.bf16.vlgmr.msra.gmra.mxu1 %vm113_vm0, %v34_v14  ;;  %v578_v55 = vsel %vm113_vm0, %v75_v51, 0  ;;  %v624_v56 = vsel %vm113_vm0, %v76_v52, 0  ;;  %v78_v62 = vpack.c.bf16 %v62_v58, %v62_v58  ;;  %v43_v63 = vpack.c.bf16 %v27_v59, %v27_v59  ;;  %v63_v4 = vld [vmem:[%s2758_s1 + $0x1c] sm:$0x3]  ;;  %v64_v5 = vld [vmem:[%s2758_s1 + $0x1e] sm:$0x3] }
   0xd   :  { %1990 = vmatpush3.bf16.xpose.msra.mxu0 %v210_v15  ;;  %1996 = vmatpush3.bf16.xpose.msra.mxu1 %v256_v16  ;;  %v44_v1 = vpack.c.bf16 %v28_v60, %v28_v60  ;;  %v670_v2 = vsel %vm113_vm0, %v77_v61, 0  ;;  %v29_v6 = vld [vmem:[%s2759_s0 + $0x18] sm:$0x3]  ;;  %v30_v7 = vld [vmem:[%s2759_s0 + $0x1a] sm:$0x3]  ;;  %v79_v8 = vpack.c.bf16 %v63_v4, %v63_v4  ;;  %v80_v9 = vpack.c.bf16 %v64_v5, %v64_v5 }
   0xe   :  { %1991 = vmatprep.mubr.msk.bf16.mxu0 %vm2204_vm1, %v2203_v0  ;;  %1997 = vmatprep.mubr.msk.bf16.mxu1 %vm2204_vm1, %v2203_v0  ;;  %v716_v3 = vsel %vm113_vm0, %v78_v62, 0  ;;  %v45_v10 = vpack.c.bf16 %v29_v6, %v29_v6  ;;  %v46_v11 = vpack.c.bf16 %v30_v7, %v30_v7  ;;  %v31_v14 = vld [vmem:[%s2759_s0 + $0x1c] sm:$0x3]  ;;  %v32_v15 = vld [vmem:[%s2759_s0 + $0x1e] sm:$0x3]  ;;  %vm1848_vm5 = vcmask 1041409  }
   0xf   :  { %2001 = vmatprep.subr.bf16.mxu0 %v2203_v0  ;;  %2007 = vmatprep.subr.bf16.mxu1 %v2203_v0  ;;  %v762_v12 = vsel %vm113_vm0, %v79_v8, 0  ;;  %v808_v13 = vsel %vm113_vm0, %v80_v9, 0  ;;  %v47_v16 = vpack.c.bf16 %v31_v14, %v31_v14  ;;  %v48_v17 = vpack.c.bf16 %v32_v15, %v32_v15  ;;  %v82_v61 = vld [vmem:[%s2760_s2 + $0x2] sm:$0x3]  ;;  %v83_v7 = vld [vmem:[%s2760_s2 + $0x4] sm:$0x3] }
  0x10   :  { %v98_v62 = vpack.c.bf16 %v82_v61, %v82_v61  ;;  %v99_v8 = vpack.c.bf16 %v83_v7, %v83_v7  ;;  %v84_v14 = vld [vmem:[%s2760_s2 + $0x6] sm:$0x3]  ;;  %vm1850_vm6 = vcmask 1042434   ;;  %vm1852_vm7 = vcmask 1043459  }
  0x11   :  { %v100_v15 = vpack.c.bf16 %v84_v14, %v84_v14  ;;  %vm1854_vm8 = vcmask 1044484   ;;  %vm1856_vm9 = vcmask 1045509   ;;  %vm1858_vm10 = vcmask 1046534  }
  0x12   :  { %v1015_v4 = vsel %vm967_vm3, %v98_v62, 0  ;;  %vm1860_vm11 = vcmask 1047559   ;;  %vm1701_vm12 = vcmask 254976  }
  0x14   :  { %1992 = vmatmul.mubr.msk.bf16.vlgmr.msra.gmra.mxu0 %vm113_vm0, %v35_v23  ;;  %1998 = vmatmul.mubr.msk.bf16.vlgmr.msra.gmra.mxu1 %vm113_vm0, %v36_v24 }
  0x15   :  { %2002 = vmatpush3.bf16.xpose.msra.mxu0 %v302_v25  ;;  %2008 = vmatpush3.bf16.xpose.msra.mxu1 %v348_v26 }
  0x16   :  { %2003 = vmatprep.mubr.msk.bf16.mxu0 %vm2204_vm1, %v2203_v0  ;;  %2009 = vmatprep.mubr.msk.bf16.mxu1 %vm2204_vm1, %v2203_v0 }
  0x17   :  { %2013 = vmatprep.subr.bf16.mxu0 %v2203_v0  ;;  %2019 = vmatprep.subr.bf16.mxu1 %v2203_v0 }
  0x1c   :  { %2004 = vmatmul.mubr.msk.bf16.vlgmr.msra.gmra.mxu0 %vm113_vm0, %v37_v33  ;;  %2010 = vmatmul.mubr.msk.bf16.vlgmr.msra.gmra.mxu1 %vm113_vm0, %v38_v34 }
  0x1d   :  { %2014 = vmatpush3.bf16.xpose.msra.mxu0 %v394_v35  ;;  %2020 = vmatpush3.bf16.xpose.msra.mxu1 %v440_v36 }
  0x1e   :  { %2015 = vmatprep.mubr.msk.bf16.mxu0 %vm2204_vm1, %v2203_v0  ;;  %2021 = vmatprep.mubr.msk.bf16.mxu1 %vm2204_vm1, %v2203_v0 }
  0x1f   :  { %2025 = vmatprep.subr.bf16.mxu0 %v2203_v0  ;;  %2031 = vmatprep.subr.bf16.mxu1 %v2203_v0 }
  0x24   :  { %2016 = vmatmul.mubr.msk.bf16.vlgmr.msra.gmra.mxu0 %vm113_vm0, %v39_v43  ;;  %2022 = vmatmul.mubr.msk.bf16.vlgmr.msra.gmra.mxu1 %vm113_vm0, %v40_v44 }
  0x25   :  { %2026 = vmatpush3.bf16.xpose.msra.mxu0 %v486_v45  ;;  %2032 = vmatpush3.bf16.xpose.msra.mxu1 %v532_v46 }
  0x26   :  { %2027 = vmatprep.mubr.msk.bf16.mxu0 %vm2204_vm1, %v2203_v0  ;;  %2033 = vmatprep.mubr.msk.bf16.mxu1 %vm2204_vm1, %v2203_v0 }
  0x27   :  { %2037 = vmatprep.subr.bf16.mxu0 %v2203_v0  ;;  %2043 = vmatprep.subr.bf16.mxu1 %v2203_v0 }
  0x2c   :  { %2028 = vmatmul.mubr.msk.bf16.vlgmr.msra.gmra.mxu0 %vm113_vm0, %v41_v53  ;;  %2034 = vmatmul.mubr.msk.bf16.vlgmr.msra.gmra.mxu1 %vm113_vm0, %v42_v54  ;;  %v81_v54 = vld [vmem:[%s2760_s2] sm:$0x3] }
  0x2d   :  { %2038 = vmatpush3.bf16.xpose.msra.mxu0 %v578_v55  ;;  %2044 = vmatpush3.bf16.xpose.msra.mxu1 %v624_v56  ;;  %v97_v55 = vpack.c.bf16 %v81_v54, %v81_v54  ;;  %v88_v54 = vld [vmem:[%s2760_s2 + $0xe] sm:$0x3] }
  0x2e   :  { %2039 = vmatprep.mubr.msk.bf16.mxu0 %vm2204_vm1, %v2203_v0  ;;  %2045 = vmatprep.mubr.msk.bf16.mxu1 %vm2204_vm1, %v2203_v0 }
  0x2f   :  { %2049 = vmatprep.subr.bf16.mxu0 %v2203_v0  ;;  %2055 = vmatprep.subr.bf16.mxu1 %v2203_v0  ;;  %v969_v58 = vsel %vm967_vm3, %v97_v55, 0  ;;  %v104_v55 = vpack.c.bf16 %v88_v54, %v88_v54 }
  0x34   :  { %2040 = vmatmul.mubr.msk.bf16.vlgmr.msra.gmra.mxu0 %vm113_vm0, %v43_v63  ;;  %2046 = vmatmul.mubr.msk.bf16.vlgmr.msra.gmra.mxu1 %vm113_vm0, %v44_v1 }
  0x35   :  { %2050 = vmatpush3.bf16.xpose.msra.mxu0 %v670_v2  ;;  %2056 = vmatpush3.bf16.xpose.msra.mxu1 %v716_v3 }
  0x36   :  { %2051 = vmatprep.mubr.msk.bf16.mxu0 %vm2204_vm1, %v2203_v0  ;;  %2057 = vmatprep.mubr.msk.bf16.mxu1 %vm2204_vm1, %v2203_v0 }
  0x37   :  { %2061 = vmatprep.subr.bf16.mxu0 %v2203_v0  ;;  %2067 = vmatprep.subr.bf16.mxu1 %v2203_v0 }
  0x3c   :  { %2052 = vmatmul.mubr.msk.bf16.vlgmr.msra.gmra.mxu0 %vm113_vm0, %v45_v10  ;;  %2058 = vmatmul.mubr.msk.bf16.vlgmr.msra.gmra.mxu1 %vm113_vm0, %v46_v11  ;;  %v2466_v11 = vsel %vm967_vm3, %v99_v8, 0 }
  0x3d   :  { %2062 = vmatpush3.bf16.xpose.msra.mxu0 %v762_v12  ;;  %2068 = vmatpush3.bf16.xpose.msra.mxu1 %v808_v13 }
  0x3e   :  { %2063 = vmatprep.mubr.msk.bf16.mxu0 %vm2204_vm1, %v2203_v0  ;;  %2069 = vmatprep.mubr.msk.bf16.mxu1 %vm2204_vm1, %v2203_v0 }
  0x3f   :  { %2073 = vmatprep.subr.bf16.mxu0 %v2203_v0  ;;  %2079 = vmatprep.subr.bf16.mxu1 %v2203_v0 }
  0x44   :  { %2064 = vmatmul.mubr.msk.bf16.vlgmr.msra.gmra.mxu0 %vm113_vm0, %v47_v16  ;;  %2070 = vmatmul.mubr.msk.bf16.vlgmr.msra.gmra.mxu1 %vm113_vm0, %v48_v17 }
  0x45   :  { %2075 = vmatprep.mubr.msk.bf16.mxu0 %vm2204_vm1, %v2203_v0  ;;  %2081 = vmatprep.mubr.msk.bf16.mxu1 %vm2204_vm1, %v2203_v0 }
  0x46   :  { %2074 = vmatpush3.bf16.msra.mxu0 %v969_v58  ;;  %2080 = vmatpush3.bf16.msra.mxu1 %v1015_v4 }
  0x47   :  { %2085 = vmatprep.subr.bf16.mxu0 %v2203_v0  ;;  %2091 = vmatprep.subr.bf16.mxu1 %v2203_v0 }
  0xcc   :  { %v2412_v18 = vpop.f32.mrf.mxu0  ;;  %v2414_v19 = vpop.f32.mrf.mxu1 }
  0xcd   :  { %v851_v20 = vsel %vm850_vm2, %v2412_v18, -inf  ;;  %v854_v23 = vsel %vm850_vm2, %v2414_v19, -inf }
  0xce   :  { %v1987_v21 = vpop.f32.mrf.mxu1  ;;  %852 = vmax.xlane.f32.xlu0 %v851_v20  ;;  %v1981_v22 = vpop.f32.mrf.mxu0 }
  0xcf   :  { %v2480_v22 = vsel %vm967_vm3, %v100_v15, 0 }
  0xd0   :  { %v157_v24 = vpop.f32.mrf.mxu0  ;;  %v203_v25 = vpop.f32.mrf.mxu1 }
  0xd1   :  { %v85_v25 = vld [vmem:[%s2760_s2 + $0x8] sm:$0x3] }
  0xd2   :  { %v1988_v26 = vpop.f32.mrf.mxu1  ;;  %855 = vmax.xlane.f32.xlu0 %v854_v23  ;;  %v1982_v27 = vpop.f32.mrf.mxu0 }
  0xd3   :  { %v101_v26 = vpack.c.bf16 %v85_v25, %v85_v25 }
  0xd4   :  { %v2420_v28 = vpop.f32.mrf.mxu0  ;;  %v2422_v29 = vpop.f32.mrf.mxu1 }
  0xd5   :  { %v857_v30 = vsel %vm850_vm2, %v2420_v28, -inf  ;;  %v860_v33 = vsel %vm850_vm2, %v2422_v29, -inf }
  0xd6   :  { %v1999_v31 = vpop.f32.mrf.mxu1  ;;  %858 = vmax.xlane.f32.xlu1 %v857_v30  ;;  %v1993_v32 = vpop.f32.mrf.mxu0 }
  0xd7   :  { %v2486_v31 = vsel %vm967_vm3, %v101_v26, 0  ;;  %v94_v26 = vld [vmem:[%s2760_s2 + $0x1a] sm:$0x3] }
  0xd8   :  { %v249_v34 = vpop.f32.mrf.mxu0  ;;  %v295_v35 = vpop.f32.mrf.mxu1 }
  0xd9   :  { %v86_v34 = vld [vmem:[%s2760_s2 + $0xa] sm:$0x3] }
  0xda   :  { %v2000_v36 = vpop.f32.mrf.mxu1  ;;  %861 = vmax.xlane.f32.xlu1 %v860_v33  ;;  %v1994_v37 = vpop.f32.mrf.mxu0  ;;  %v102_v35 = vpack.c.bf16 %v86_v34, %v86_v34 }
  0xdc   :  { %v2428_v38 = vpop.f32.mrf.mxu0  ;;  %v2430_v39 = vpop.f32.mrf.mxu1 }
  0xdd   :  { %v866_v40 = vsel %vm850_vm2, %v2430_v39, -inf  ;;  %v863_v41 = vsel %vm850_vm2, %v2428_v38, -inf }
  0xde   :  { %v2011_v42 = vpop.f32.mrf.mxu1  ;;  %867 = vmax.xlane.f32.xlu1 %v866_v40  ;;  %864 = vmax.xlane.f32.xlu0 %v863_v41  ;;  %v2005_v43 = vpop.f32.mrf.mxu0 }
  0xdf   :  { %v2500_v42 = vsel %vm967_vm3, %v102_v35, 0  ;;  %v96_v35 = vld [vmem:[%s2760_s2 + $0x1e] sm:$0x3] }
  0xe0   :  { %v341_v44 = vpop.f32.mrf.mxu0  ;;  %v387_v45 = vpop.f32.mrf.mxu1 }
  0xe1   :  { %v87_v45 = vld [vmem:[%s2760_s2 + $0xc] sm:$0x3] }
  0xe2   :  { %v2006_v46 = vpop.f32.mrf.mxu0  ;;  %v2012_v47 = vpop.f32.mrf.mxu1 }
  0xe3   :  { %v103_v46 = vpack.c.bf16 %v87_v45, %v87_v45 }
  0xe4   :  { %v2436_v48 = vpop.f32.mrf.mxu0  ;;  %v2438_v49 = vpop.f32.mrf.mxu1 }
  0xe5   :  { %v872_v50 = vsel %vm850_vm2, %v2438_v49, -inf  ;;  %v869_v51 = vsel %vm850_vm2, %v2436_v48, -inf }
  0xe6   :  { %v2023_v52 = vpop.f32.mrf.mxu1  ;;  %873 = vmax.xlane.f32.xlu1 %v872_v50  ;;  %870 = vmax.xlane.f32.xlu0 %v869_v51  ;;  %v2017_v53 = vpop.f32.mrf.mxu0  ;;  %v2506_v51 = vsel %vm967_vm3, %v103_v46, 0 }
  0xe8   :  { %v433_v56 = vpop.f32.mrf.mxu0  ;;  %v479_v57 = vpop.f32.mrf.mxu1 }
  0xea   :  { %v2018_v59 = vpop.f32.mrf.mxu0  ;;  %v2024_v60 = vpop.f32.mrf.mxu1 }
  0xeb   :  { %v2520_v60 = vsel %vm967_vm3, %v104_v55, 0 }
  0xec   :  { %v2452_v63 = vpop.f32.mrf.mxu0  ;;  %v2454_v1 = vpop.f32.mrf.mxu1 }
  0xed   :  { %v878_v2 = vsel %vm850_vm2, %v2454_v1, -inf  ;;  %v875_v3 = vsel %vm850_vm2, %v2452_v63, -inf }
  0xee   :  { %v2035_v5 = vpop.f32.mrf.mxu1  ;;  %879 = vmax.xlane.f32.xlu1 %v878_v2  ;;  %876 = vmax.xlane.f32.xlu0 %v875_v3  ;;  %v2029_v6 = vpop.f32.mrf.mxu0  ;;  %v89_v2 = vld [vmem:[%s2760_s2 + $0x10] sm:$0x3] }
  0xef   :  { %v105_v3 = vpack.c.bf16 %v89_v2, %v89_v2 }
  0xf0   :  { %v525_v9 = vpop.f32.mrf.mxu0  ;;  %v571_v10 = vpop.f32.mrf.mxu1 }
  0xf1   :  { %v2526_v6 = vsel %vm967_vm3, %v105_v3, 0  ;;  %v90_v9 = vld [vmem:[%s2760_s2 + $0x12] sm:$0x3] }
  0xf2   :  { %v2030_v12 = vpop.f32.mrf.mxu0  ;;  %v2036_v13 = vpop.f32.mrf.mxu1  ;;  %v106_v10 = vpack.c.bf16 %v90_v9, %v90_v9 }
  0xf3   :  { %v91_v13 = vld [vmem:[%s2760_s2 + $0x14] sm:$0x3] }
  0xf4   :  { %v2471_v16 = vpop.f32.mrf.mxu0  ;;  %v2473_v17 = vpop.f32.mrf.mxu1  ;;  %v2532_v12 = vsel %vm967_vm3, %v106_v10, 0  ;;  %v107_v14 = vpack.c.bf16 %v91_v13, %v91_v13 }
  0xf5   :  { %v884_v20 = vsel %vm850_vm2, %v2473_v17, -inf  ;;  %v881_v21 = vsel %vm850_vm2, %v2471_v16, -inf }
  0xf6   :  { %v2047_v23 = vpop.f32.mrf.mxu1  ;;  %885 = vmax.xlane.f32.xlu1 %v884_v20  ;;  %882 = vmax.xlane.f32.xlu0 %v881_v21  ;;  %v2041_v24 = vpop.f32.mrf.mxu0  ;;  %v2538_v15 = vsel %vm967_vm3, %v107_v14, 0  ;;  %v92_v20 = vld [vmem:[%s2760_s2 + $0x16] sm:$0x3] }
  0xf7   :  { %v108_v21 = vpack.c.bf16 %v92_v20, %v92_v20  ;;  %v93_v24 = vld [vmem:[%s2760_s2 + $0x18] sm:$0x3] }
  0xf8   :  { %v617_v27 = vpop.f32.mrf.mxu0  ;;  %v663_v30 = vpop.f32.mrf.mxu1  ;;  %v109_v25 = vpack.c.bf16 %v93_v24, %v93_v24 }
  0xf9   :  { %v2544_v23 = vsel %vm967_vm3, %v108_v21, 0  ;;  %v110_v30 = vpack.c.bf16 %v94_v26, %v94_v26 }
  0xfa   :  { %v2042_v32 = vpop.f32.mrf.mxu0  ;;  %v2048_v33 = vpop.f32.mrf.mxu1  ;;  %v2553_v27 = vsel %vm967_vm3, %v109_v25, 0 }
  0xfb   :  { %v2556_v32 = vsel %vm967_vm3, %v110_v30, 0  ;;  %v95_v33 = vld [vmem:[%s2760_s2 + $0x1c] sm:$0x3] }
  0xfc   :  { %v2491_v36 = vpop.f32.mrf.mxu0  ;;  %v2493_v37 = vpop.f32.mrf.mxu1  ;;  %v111_v34 = vpack.c.bf16 %v95_v33, %v95_v33 }
  0xfd   :  { %v890_v40 = vsel %vm850_vm2, %v2493_v37, -inf  ;;  %v887_v41 = vsel %vm850_vm2, %v2491_v36, -inf }
  0xfe   :  { %v2059_v43 = vpop.f32.mrf.mxu1  ;;  %891 = vmax.xlane.f32.xlu1 %v890_v40  ;;  %888 = vmax.xlane.f32.xlu0 %v887_v41  ;;  %v2053_v44 = vpop.f32.mrf.mxu0  ;;  %v2565_v40 = vsel %vm967_vm3, %v111_v34, 0  ;;  %v112_v41 = vpack.c.bf16 %v96_v35, %v96_v35 }
 0x100   :  { %v709_v47 = vpop.f32.mrf.mxu0  ;;  %v755_v50 = vpop.f32.mrf.mxu1  ;;  %v2568_v43 = vsel %vm967_vm3, %v112_v41, 0 }
 0x102   :  { %v2054_v52 = vpop.f32.mrf.mxu0  ;;  %v2060_v53 = vpop.f32.mrf.mxu1 }
 0x104   :  { %v2511_v56 = vpop.f32.mrf.mxu0  ;;  %v2513_v57 = vpop.f32.mrf.mxu1 }
 0x105   :  { %v896_v58 = vsel %vm850_vm2, %v2513_v57, -inf  ;;  %v893_v59 = vsel %vm850_vm2, %v2511_v56, -inf }
 0x106   :  { %v2071_v61 = vpop.f32.mrf.mxu1  ;;  %897 = vmax.xlane.f32.xlu1 %v896_v58  ;;  %894 = vmax.xlane.f32.xlu0 %v893_v59  ;;  %v2065_v62 = vpop.f32.mrf.mxu0 }
 0x108   :  { %v801_v4 = vpop.f32.mrf.mxu0  ;;  %v847_v5 = vpop.f32.mrf.mxu1 }
 0x10a   :  { %v2066_v7 = vpop.f32.mrf.mxu0  ;;  %v2072_v8 = vpop.f32.mrf.mxu1 }
 0x157   :  { %v853_v44 = vpop.xlane.xlu0 %852 }
 0x158   :  { %v899_v45 = vsub.f32 %v2412_v18, %v853_v44 }
 0x15a   :  { %v915_v46 = vmul.f32 1.442695, %v899_v45 }
 0x15b   :  { %v856_v47 = vpop.xlane.xlu0 %855 }
 0x15c   :  { %2171 = vpow2.f32 %v915_v46  ;;  %v900_v50 = vsub.f32 %v2414_v19, %v856_v47 }
 0x15e   :  { %v917_v52 = vmul.f32 1.442695, %v900_v50 }
 0x15f   :  { %v859_v53 = vpop.xlane.xlu1 %858 }
 0x160   :  { %2173 = vpow2.f32 %v917_v52  ;;  %v901_v54 = vsub.f32 %v2420_v28, %v859_v53 }
 0x162   :  { %v919_v55 = vmul.f32 1.442695, %v901_v54 }
 0x163   :  { %v862_v58 = vpop.xlane.xlu1 %861 }
 0x164   :  { %2175 = vpow2.f32 %v919_v55  ;;  %v902_v59 = vsub.f32 %v2422_v29, %v862_v58 }
 0x166   :  { %v921_v61 = vmul.f32 1.442695, %v902_v59 }
 0x167   :  { %v868_v62 = vpop.xlane.xlu1 %867  ;;  %v865_v2 = vpop.xlane.xlu0 %864 }
 0x168   :  { %2177 = vpow2.f32 %v921_v61  ;;  %v904_v18 = vsub.f32 %v2430_v39, %v868_v62  ;;  %v903_v3 = vsub.f32 %v2428_v38, %v865_v2 }
 0x169   :  { %v2172_v4 = vpop.eup %2171 }
 0x16a   :  { %v925_v19 = vmul.f32 1.442695, %v904_v18  ;;  %v923_v5 = vmul.f32 1.442695, %v903_v3  ;;  %v1718_v7 = vsel %vm850_vm2, %v2172_v4, 0.0  ;;  %v947_v28 = vpack.c.bf16 %v2172_v4, %v2172_v4 }
 0x16b   :  { %1719 = vadd.xlane.f32.xlu0 %v1718_v7 }
 0x16c   :  { %2076 = vmatmul.mubr.msk.bf16.vlgmr.msra.gmra.mxu0 %vm963_vm4, %v947_v28  ;;  %2179 = vpow2.f32 %v923_v5 }
 0x16d   :  { %v2174_v8 = vpop.eup %2173  ;;  %2086 = vmatpush3.bf16.msra.mxu0 %v2466_v11  ;;  %2087 = vmatprep.mubr.msk.bf16.mxu0 %vm2204_vm1, %v2203_v0  ;;  %2181 = vpow2.f32 %v925_v19 }
 0x16e   :  { %v1721_v29 = vsel %vm850_vm2, %v2174_v8, 0.0  ;;  %v948_v38 = vpack.c.bf16 %v2174_v8, %v2174_v8  ;;  %2097 = vmatprep.subr.bf16.mxu0 %v2203_v0 }
 0x16f   :  { %1722 = vadd.xlane.f32.xlu1 %v1721_v29  ;;  %v874_v39 = vpop.xlane.xlu1 %873  ;;  %v871_v9 = vpop.xlane.xlu0 %870 }
 0x170   :  { %v906_v10 = vsub.f32 %v2438_v49, %v874_v39  ;;  %v905_v13 = vsub.f32 %v2436_v48, %v871_v9  ;;  %2082 = vmatmul.mubr.msk.bf16.vlgmr.msra.gmra.mxu1 %vm963_vm4, %v948_v38 }
 0x171   :  { %v2176_v14 = vpop.eup %2175  ;;  %2092 = vmatpush3.bf16.msra.mxu1 %v2480_v22  ;;  %2093 = vmatprep.mubr.msk.bf16.mxu1 %vm2204_vm1, %v2203_v0 }
 0x172   :  { %v929_v11 = vmul.f32 1.442695, %v906_v10  ;;  %v927_v20 = vmul.f32 1.442695, %v905_v13  ;;  %v1724_v21 = vsel %vm850_vm2, %v2176_v14, 0.0  ;;  %v949_v24 = vpack.c.bf16 %v2176_v14, %v2176_v14  ;;  %2103 = vmatprep.subr.bf16.mxu1 %v2203_v0 }
 0x173   :  { %1725 = vadd.xlane.f32.xlu0 %v1724_v21 }
 0x174   :  { %2088 = vmatmul.mubr.msk.bf16.vlgmr.msra.gmra.mxu0 %vm963_vm4, %v949_v24  ;;  %2183 = vpow2.f32 %v927_v20 }
 0x175   :  { %v2178_v49 = vpop.eup %2177  ;;  %2098 = vmatpush3.bf16.msra.mxu0 %v2486_v31  ;;  %2099 = vmatprep.mubr.msk.bf16.mxu0 %vm2204_vm1, %v2203_v0  ;;  %2185 = vpow2.f32 %v929_v11 }
 0x176   :  { %v1727_v48 = vsel %vm850_vm2, %v2178_v49, 0.0  ;;  %v950_v22 = vpack.c.bf16 %v2178_v49, %v2178_v49  ;;  %2109 = vmatprep.subr.bf16.mxu0 %v2203_v0 }
 0x177   :  { %v880_v25 = vpop.xlane.xlu1 %879  ;;  %v877_v26 = vpop.xlane.xlu0 %876  ;;  %1728 = vadd.xlane.f32.xlu0 %v1727_v48 }
 0x178   :  { %v908_v30 = vsub.f32 %v2454_v1, %v880_v25  ;;  %v907_v33 = vsub.f32 %v2452_v63, %v877_v26  ;;  %2094 = vmatmul.mubr.msk.bf16.vlgmr.msra.gmra.mxu1 %vm963_vm4, %v950_v22  ;;  %v1782_v26 = vlaneseq }
 0x179   :  { %2104 = vmatpush3.bf16.msra.mxu1 %v2500_v42  ;;  %2105 = vmatprep.mubr.msk.bf16.mxu1 %vm2204_vm1, %v2203_v0  ;;  %v2180_v31 = vpop.eup %2179 }
 0x17a   :  { %v933_v34 = vmul.f32 1.442695, %v908_v30  ;;  %v931_v35 = vmul.f32 1.442695, %v907_v33  ;;  %2115 = vmatprep.subr.bf16.mxu1 %v2203_v0  ;;  %v2182_v41 = vpop.eup %2181  ;;  %v1730_v44 = vsel %vm850_vm2, %v2180_v31, 0.0  ;;  %v951_v45 = vpack.c.bf16 %v2180_v31, %v2180_v31 }
 0x17b   :  { %1731 = vadd.xlane.f32.xlu0 %v1730_v44  ;;  %v952_v63 = vpack.c.bf16 %v2182_v41, %v2182_v41  ;;  %v1733_v46 = vsel %vm850_vm2, %v2182_v41, 0.0  ;;  %v1785_v30 = vshrl.u32 %v1782_v26, 7 }
 0x17c   :  { %2187 = vpow2.f32 %v933_v34  ;;  %2100 = vmatmul.mubr.msk.bf16.vlgmr.msra.gmra.mxu0 %vm963_vm4, %v951_v45 }
 0x17d   :  { %2189 = vpow2.f32 %v931_v35  ;;  %2110 = vmatpush3.bf16.msra.mxu0 %v2506_v51  ;;  %2111 = vmatprep.mubr.msk.bf16.mxu0 %vm2204_vm1, %v2203_v0 }
 0x17e   :  { %2121 = vmatprep.subr.bf16.mxu0 %v2203_v0 }
 0x17f   :  { %v886_v1 = vpop.xlane.xlu1 %885  ;;  %v883_v42 = vpop.xlane.xlu0 %882  ;;  %1734 = vadd.xlane.f32.xlu0 %v1733_v46 }
 0x180   :  { %v910_v47 = vsub.f32 %v2473_v17, %v886_v1  ;;  %v909_v50 = vsub.f32 %v2471_v16, %v883_v42  ;;  %2106 = vmatmul.mubr.msk.bf16.vlgmr.msra.gmra.mxu1 %vm963_vm4, %v952_v63 }
 0x181   :  { %2116 = vmatpush3.bf16.msra.mxu1 %v2520_v60  ;;  %2117 = vmatprep.mubr.msk.bf16.mxu1 %vm2204_vm1, %v2203_v0  ;;  %v2184_v51 = vpop.eup %2183 }
 0x182   :  { %v937_v52 = vmul.f32 1.442695, %v910_v47  ;;  %v935_v53 = vmul.f32 1.442695, %v909_v50  ;;  %2127 = vmatprep.subr.bf16.mxu1 %v2203_v0  ;;  %v2186_v54 = vpop.eup %2185  ;;  %v953_v55 = vpack.c.bf16 %v2184_v51, %v2184_v51  ;;  %v1736_v4 = vsel %vm850_vm2, %v2184_v51, 0.0 }
 0x183   :  { %v954_v16 = vpack.c.bf16 %v2186_v54, %v2186_v54 }
 0x184   :  { %2191 = vpow2.f32 %v935_v53  ;;  %2112 = vmatmul.mubr.msk.bf16.vlgmr.msra.gmra.mxu0 %vm963_vm4, %v953_v55 }
 0x185   :  { %2193 = vpow2.f32 %v937_v52  ;;  %2122 = vmatpush3.bf16.msra.mxu0 %v2526_v6  ;;  %2123 = vmatprep.mubr.msk.bf16.mxu0 %vm2204_vm1, %v2203_v0 }
 0x186   :  { %2133 = vmatprep.subr.bf16.mxu0 %v2203_v0 }
 0x187   :  { %v892_v17 = vpop.xlane.xlu1 %891  ;;  %v889_v60 = vpop.xlane.xlu0 %888 }
 0x188   :  { %v912_v58 = vsub.f32 %v2493_v37, %v892_v17  ;;  %v911_v59 = vsub.f32 %v2491_v36, %v889_v60  ;;  %2118 = vmatmul.mubr.msk.bf16.vlgmr.msra.gmra.mxu1 %vm963_vm4, %v954_v16 }
 0x189   :  { %v2188_v61 = vpop.eup %2187  ;;  %2128 = vmatpush3.bf16.msra.mxu1 %v2532_v12  ;;  %2129 = vmatprep.mubr.msk.bf16.mxu1 %vm2204_vm1, %v2203_v0 }
 0x18a   :  { %v2190_v6 = vpop.eup %2189  ;;  %v941_v62 = vmul.f32 1.442695, %v912_v58  ;;  %v939_v2 = vmul.f32 1.442695, %v911_v59  ;;  %v1745_v18 = vsel %vm850_vm2, %v2188_v61, 0.0  ;;  %2139 = vmatprep.subr.bf16.mxu1 %v2203_v0  ;;  %v956_v36 = vpack.c.bf16 %v2188_v61, %v2188_v61 }
 0x18b   :  { %1746 = vadd.xlane.f32.xlu1 %v1745_v18  ;;  %v1742_v37 = vsel %vm850_vm2, %v2190_v6, 0.0  ;;  %v955_v3 = vpack.c.bf16 %v2190_v6, %v2190_v6 }
 0x18c   :  { %1743 = vadd.xlane.f32.xlu0 %v1742_v37  ;;  %2195 = vpow2.f32 %v939_v2 }
 0x18d   :  { %2124 = vmatmul.mubr.msk.bf16.vlgmr.msra.gmra.mxu0 %vm963_vm4, %v955_v3  ;;  %2197 = vpow2.f32 %v941_v62 }
 0x18e   :  { %2134 = vmatpush3.bf16.msra.mxu0 %v2538_v15  ;;  %2135 = vmatprep.mubr.msk.bf16.mxu0 %vm2204_vm1, %v2203_v0 }
 0x18f   :  { %v898_v12 = vpop.xlane.xlu1 %897  ;;  %v895_v19 = vpop.xlane.xlu0 %894  ;;  %2145 = vmatprep.subr.bf16.mxu0 %v2203_v0 }
 0x190   :  { %v914_v5 = vsub.f32 %v2513_v57, %v898_v12  ;;  %1737 = vadd.xlane.f32.xlu0 %v1736_v4  ;;  %v913_v7 = vsub.f32 %v2511_v56, %v895_v19  ;;  %2130 = vmatmul.mubr.msk.bf16.vlgmr.msra.gmra.mxu1 %vm963_vm4, %v956_v36  ;;  %v1739_v57 = vsel %vm850_vm2, %v2186_v54, 0.0 }
 0x191   :  { %2140 = vmatpush3.bf16.msra.mxu1 %v2544_v23  ;;  %2141 = vmatprep.mubr.msk.bf16.mxu1 %vm2204_vm1, %v2203_v0  ;;  %v2192_v15 = vpop.eup %2191 }
 0x192   :  { %v945_v28 = vmul.f32 1.442695, %v914_v5  ;;  %v943_v8 = vmul.f32 1.442695, %v913_v7  ;;  %2151 = vmatprep.subr.bf16.mxu1 %v2203_v0  ;;  %v2194_v29 = vpop.eup %2193  ;;  %v1748_v38 = vsel %vm850_vm2, %v2192_v15, 0.0  ;;  %v957_v39 = vpack.c.bf16 %v2192_v15, %v2192_v15 }
 0x193   :  { %1749 = vadd.xlane.f32.xlu1 %v1748_v38  ;;  %v958_v56 = vpack.c.bf16 %v2194_v29, %v2194_v29  ;;  %v1751_v23 = vsel %vm850_vm2, %v2194_v29, 0.0 }
 0x194   :  { %1740 = vadd.xlane.f32.xlu0 %v1739_v57  ;;  %2199 = vpow2.f32 %v943_v8 }
 0x195   :  { %2136 = vmatmul.mubr.msk.bf16.vlgmr.msra.gmra.mxu0 %vm963_vm4, %v957_v39  ;;  %2201 = vpow2.f32 %v945_v28 }
 0x196   :  { %2146 = vmatpush3.bf16.msra.mxu0 %v2553_v27  ;;  %2147 = vmatprep.mubr.msk.bf16.mxu0 %vm2204_vm1, %v2203_v0 }
 0x197   :  { %2157 = vmatprep.subr.bf16.mxu0 %v2203_v0  ;;  %1752 = vadd.xlane.f32.xlu1 %v1751_v23 }
 0x198   :  { %2142 = vmatmul.mubr.msk.bf16.vlgmr.msra.gmra.mxu1 %vm963_vm4, %v958_v56 }
 0x199   :  { %2152 = vmatpush3.bf16.msra.mxu1 %v2556_v32  ;;  %2153 = vmatprep.mubr.msk.bf16.mxu1 %vm2204_vm1, %v2203_v0  ;;  %v2196_v9 = vpop.eup %2195 }
 0x19a   :  { %2163 = vmatprep.subr.bf16.mxu1 %v2203_v0  ;;  %v2198_v10 = vpop.eup %2197  ;;  %v1754_v27 = vsel %vm850_vm2, %v2196_v9, 0.0  ;;  %v959_v13 = vpack.c.bf16 %v2196_v9, %v2196_v9 }
 0x19b   :  { %1755 = vadd.xlane.f32.xlu1 %v1754_v27  ;;  %v960_v14 = vpack.c.bf16 %v2198_v10, %v2198_v10  ;;  %v1757_v32 = vsel %vm850_vm2, %v2198_v10, 0.0 }
 0x19d   :  { %2148 = vmatmul.mubr.msk.bf16.vlgmr.msra.gmra.mxu0 %vm963_vm4, %v959_v13 }
 0x19e   :  { %2158 = vmatpush3.bf16.msra.mxu0 %v2565_v40  ;;  %2159 = vmatprep.mubr.msk.bf16.mxu0 %vm2204_vm1, %v2203_v0 }
 0x19f   :  { %1758 = vadd.xlane.f32.xlu1 %v1757_v32 }
 0x1a0   :  { %2154 = vmatmul.mubr.msk.bf16.vlgmr.msra.gmra.mxu1 %vm963_vm4, %v960_v14 }
 0x1a1   :  { %2164 = vmatpush3.bf16.msra.mxu1 %v2568_v43  ;;  %2165 = vmatprep.mubr.msk.bf16.mxu1 %vm2204_vm1, %v2203_v0  ;;  %v2200_v11 = vpop.eup %2199  ;;  %v1783_v0 = vand.u32 127, %v1782_v26 }
 0x1a2   :  { %v2202_v20 = vpop.eup %2201  ;;  %v1760_v21 = vsel %vm850_vm2, %v2200_v11, 0.0  ;;  %v961_v24 = vpack.c.bf16 %v2200_v11, %v2200_v11 }
 0x1a3   :  { %1761 = vadd.xlane.f32.xlu1 %v1760_v21  ;;  %v962_v40 = vpack.c.bf16 %v2202_v20, %v2202_v20  ;;  %v1763_v49 = vsel %vm850_vm2, %v2202_v20, 0.0  ;;  %v1786_v34 = vsub.s32 %v1783_v0, %v1785_v30 }
 0x1a5   :  { %2160 = vmatmul.mubr.msk.bf16.vlgmr.msra.gmra.mxu0 %vm963_vm4, %v961_v24 }
 0x1a7   :  { %1764 = vadd.xlane.f32.xlu1 %v1763_v49 }
 0x1a8   :  { %2166 = vmatmul.mubr.msk.bf16.vlgmr.msra.gmra.mxu1 %vm963_vm4, %v962_v40 }
 0x1f4   :  { %v1720_v48 = vpop.xlane.xlu0 %1719 }
 0x1f5   :  { %v1787_v45 = vrot.slane %v1720_v48, %v1786_v34 }
 0x1f8   :  { %v1723_v31 = vpop.xlane.xlu1 %1722 }
 0x1f9   :  { %v1791_v41 = vrot.slane %v1723_v31, %v1786_v34 }
 0x1fb   :  { %v1849_v47 = vsel %vm1848_vm5, %v1791_v41, %v1787_v45 }
 0x1fc   :  { %v1726_v22 = vpop.xlane.xlu0 %1725 }
 0x1fd   :  { %v1795_v44 = vrot.slane %v1726_v22, %v1786_v34 }
 0x1ff   :  { %v1851_v51 = vsel %vm1850_vm6, %v1795_v44, %v1849_v47 }
 0x200   :  { %v1729_v43 = vpop.xlane.xlu0 %1728 }
 0x201   :  { %v1799_v63 = vrot.slane %v1729_v43, %v1786_v34 }
 0x203   :  { %v1853_v53 = vsel %vm1852_vm7, %v1799_v63, %v1851_v51 }
 0x204   :  { %v1732_v25 = vpop.xlane.xlu0 %1731 }
 0x205   :  { %v1803_v1 = vrot.slane %v1732_v25, %v1786_v34 }
 0x207   :  { %v1855_v54 = vsel %vm1854_vm8, %v1803_v1, %v1853_v53 }
 0x208   :  { %v1735_v33 = vpop.xlane.xlu0 %1734 }
 0x209   :  { %v1807_v50 = vrot.slane %v1735_v33, %v1786_v34 }
 0x20b   :  { %v1857_v17 = vsel %vm1856_vm9, %v1807_v50, %v1855_v54 }
 0x214   :  { %v1747_v42 = vpop.xlane.xlu1 %1746 }
 0x215   :  { %v1744_v35 = vpop.xlane.xlu0 %1743  ;;  %v1823_v2 = vrot.slane %v1747_v42, %v1786_v34 }
 0x216   :  { %v1819_v18 = vrot.slane %v1744_v35, %v1786_v34 }
 0x218   :  { %v1862_v19 = vsel %vm1848_vm5, %v1823_v2, %v1819_v18 }
 0x219   :  { %v1738_v46 = vpop.xlane.xlu0 %1737 }
 0x21a   :  { %v1811_v52 = vrot.slane %v1738_v46, %v1786_v34 }
 0x21c   :  { %v1750_v55 = vpop.xlane.xlu1 %1749  ;;  %v1859_v58 = vsel %vm1858_vm10, %v1811_v52, %v1857_v17 }
 0x21d   :  { %v1741_v16 = vpop.xlane.xlu0 %1740  ;;  %v1827_v37 = vrot.slane %v1750_v55, %v1786_v34 }
 0x21e   :  { %v1815_v60 = vrot.slane %v1741_v16, %v1786_v34 }
 0x21f   :  { %v1863_v15 = vsel %vm1850_vm6, %v1827_v37, %v1862_v19 }
 0x220   :  { %v1861_v59 = vsel %vm1860_vm11, %v1815_v60, %v1859_v58  ;;  %v1753_v61 = vpop.xlane.xlu1 %1752 }
 0x221   :  { %1871 = vst.msk [vmem:[%s2761_s4] sm:$0xff] %vm963_vm4, %v1861_v59  ;;  %v1831_v3 = vrot.slane %v1753_v61, %v1786_v34 }
 0x223   :  { %v1864_v8 = vsel %vm1852_vm7, %v1831_v3, %v1863_v15 }
 0x224   :  { %v1756_v6 = vpop.xlane.xlu1 %1755 }
 0x225   :  { %v1835_v12 = vrot.slane %v1756_v6, %v1786_v34 }
 0x227   :  { %v1865_v57 = vsel %vm1854_vm8, %v1835_v12, %v1864_v8 }
 0x228   :  { %v1759_v62 = vpop.xlane.xlu1 %1758 }
 0x229   :  { %v1839_v5 = vrot.slane %v1759_v62, %v1786_v34 }
 0x22b   :  { %v1866_v56 = vsel %vm1856_vm9, %v1839_v5, %v1865_v57 }
 0x22c   :  { %v1005_v36 = vpop.f32.mrf.mxu0  ;;  %v1762_v4 = vpop.xlane.xlu1 %1761 }
 0x22d   :  { %1702 = vst.msk [vmem:[%s2762_s3] sm:$0x3] %vm1701_vm12, %v1005_v36  ;;  %v1843_v28 = vrot.slane %v1762_v4, %v1786_v34 }
 0x22e   :  { %v2077_v7 = vpop.f32.mrf.mxu0 }
 0x22f   :  { %v1867_v27 = vsel %vm1858_vm10, %v1843_v28, %v1866_v56 }
 0x230   :  { %v1051_v29 = vpop.f32.mrf.mxu1  ;;  %v1008_v38 = vpop.f32.mrf.mxu0 }
 0x231   :  { %1703 = vst.msk [vmem:[%s2762_s3 + $0x2] sm:$0x3] %vm1701_vm12, %v1051_v29  ;;  %v1765_v39 = vpop.xlane.xlu1 %1764 }
 0x232   :  { %v1847_v23 = vrot.slane %v1765_v39, %v1786_v34  ;;  %v2078_v9 = vpop.f32.mrf.mxu0  ;;  %v2083_v10 = vpop.f32.mrf.mxu1 }
 0x234   :  { %v1868_v13 = vsel %vm1860_vm11, %v1847_v23, %v1867_v27  ;;  %v1054_v14 = vpop.f32.mrf.mxu1  ;;  %v1097_v32 = vpop.f32.mrf.mxu0 }
 0x235   :  { %1872 = vst.msk [vmem:[%s2761_s4 + $0x8] sm:$0xff] %vm963_vm4, %v1868_v13 }
 0x236   :  { %1704 = vst.msk [vmem:[%s2762_s3 + $0x4] sm:$0x3] %vm1701_vm12, %v1097_v32  ;;  %v2084_v11 = vpop.f32.mrf.mxu1  ;;  %v2089_v20 = vpop.f32.mrf.mxu0 }
 0x238   :  { %v1100_v21 = vpop.f32.mrf.mxu0  ;;  %v1143_v24 = vpop.f32.mrf.mxu1 }
 0x239   :  { %1705 = vst.msk [vmem:[%s2762_s3 + $0x6] sm:$0x3] %vm1701_vm12, %v1143_v24 }
 0x23a   :  { %v2090_v40 = vpop.f32.mrf.mxu0  ;;  %v2095_v49 = vpop.f32.mrf.mxu1 }
 0x23c   :  { %v1146_v48 = vpop.f32.mrf.mxu1  ;;  %v1189_v22 = vpop.f32.mrf.mxu0 }
 0x23d   :  { %1706 = vst.msk [vmem:[%s2762_s3 + $0x8] sm:$0x3] %vm1701_vm12, %v1189_v22 }
 0x23e   :  { %v2096_v43 = vpop.f32.mrf.mxu1  ;;  %v2101_v25 = vpop.f32.mrf.mxu0 }
 0x240   :  { %v1235_v26 = vpop.f32.mrf.mxu1  ;;  %v1192_v0 = vpop.f32.mrf.mxu0 }
 0x241   :  { %1707 = vst.msk [vmem:[%s2762_s3 + $0xa] sm:$0x3] %vm1701_vm12, %v1235_v26 }
 0x242   :  { %v2107_v30 = vpop.f32.mrf.mxu1  ;;  %v2102_v33 = vpop.f32.mrf.mxu0 }
 0x244   :  { %v1238_v31 = vpop.f32.mrf.mxu1  ;;  %v1281_v34 = vpop.f32.mrf.mxu0 }
 0x245   :  { %1708 = vst.msk [vmem:[%s2762_s3 + $0xc] sm:$0x3] %vm1701_vm12, %v1281_v34 }
 0x246   :  { %v2108_v35 = vpop.f32.mrf.mxu1  ;;  %v2113_v41 = vpop.f32.mrf.mxu0 }
 0x248   :  { %v1327_v44 = vpop.f32.mrf.mxu1  ;;  %v1284_v45 = vpop.f32.mrf.mxu0 }
 0x249   :  { %1709 = vst.msk [vmem:[%s2762_s3 + $0xe] sm:$0x3] %vm1701_vm12, %v1327_v44 }
 0x24a   :  { %v2119_v63 = vpop.f32.mrf.mxu1  ;;  %v2114_v1 = vpop.f32.mrf.mxu0 }
 0x24c   :  { %v1330_v42 = vpop.f32.mrf.mxu1 }
 0x24d   :  { %v1373_v46 = vpop.f32.mrf.mxu0 }
 0x24e   :  { %1710 = vst.msk [vmem:[%s2762_s3 + $0x10] sm:$0x3] %vm1701_vm12, %v1373_v46  ;;  %v2120_v47 = vpop.f32.mrf.mxu1 }
 0x24f   :  { %v2125_v50 = vpop.f32.mrf.mxu0 }
 0x250   :  { %v1419_v51 = vpop.f32.mrf.mxu1 }
 0x251   :  { %v1376_v52 = vpop.f32.mrf.mxu0  ;;  %1711 = vst.msk [vmem:[%s2762_s3 + $0x12] sm:$0x3] %vm1701_vm12, %v1419_v51 }
 0x252   :  { %v2131_v53 = vpop.f32.mrf.mxu1 }
 0x253   :  { %v2126_v54 = vpop.f32.mrf.mxu0 }
 0x254   :  { %v1422_v55 = vpop.f32.mrf.mxu1 }
 0x255   :  { %v1465_v16 = vpop.f32.mrf.mxu0 }
 0x256   :  { %1712 = vst.msk [vmem:[%s2762_s3 + $0x14] sm:$0x3] %vm1701_vm12, %v1465_v16  ;;  %v2132_v17 = vpop.f32.mrf.mxu1 }
 0x257   :  { %v2137_v60 = vpop.f32.mrf.mxu0 }
 0x258   :  { %v1511_v58 = vpop.f32.mrf.mxu1 }
 0x259   :  { %v1468_v59 = vpop.f32.mrf.mxu0  ;;  %1713 = vst.msk [vmem:[%s2762_s3 + $0x16] sm:$0x3] %vm1701_vm12, %v1511_v58 }
 0x25a   :  { %v2143_v61 = vpop.f32.mrf.mxu1 }
 0x25b   :  { %v2138_v6 = vpop.f32.mrf.mxu0 }
 0x25c   :  { %v1514_v62 = vpop.f32.mrf.mxu1 }
 0x25d   :  { %v1557_v2 = vpop.f32.mrf.mxu0 }
 0x25e   :  { %1714 = vst.msk [vmem:[%s2762_s3 + $0x18] sm:$0x3] %vm1701_vm12, %v1557_v2  ;;  %v2144_v18 = vpop.f32.mrf.mxu1 }
 0x25f   :  { %v2149_v37 = vpop.f32.mrf.mxu0 }
 0x260   :  { %v1603_v3 = vpop.f32.mrf.mxu1 }
 0x261   :  { %v1560_v36 = vpop.f32.mrf.mxu0  ;;  %1715 = vst.msk [vmem:[%s2762_s3 + $0x1a] sm:$0x3] %vm1701_vm12, %v1603_v3 }
 0x262   :  { %v2155_v12 = vpop.f32.mrf.mxu1 }
 0x263   :  { %v2150_v4 = vpop.f32.mrf.mxu0 }
 0x264   :  { %v1606_v19 = vpop.f32.mrf.mxu1 }
 0x265   :  { %v1649_v5 = vpop.f32.mrf.mxu0 }
 0x266   :  { %1716 = vst.msk [vmem:[%s2762_s3 + $0x1c] sm:$0x3] %vm1701_vm12, %v1649_v5  ;;  %v2156_v7 = vpop.f32.mrf.mxu1 }
 0x267   :  { %v2161_v15 = vpop.f32.mrf.mxu0 }
 0x268   :  { %v1695_v28 = vpop.f32.mrf.mxu1 }
 0x269   :  { %v1652_v8 = vpop.f32.mrf.mxu0  ;;  %1717 = vst.msk [vmem:[%s2762_s3 + $0x1e] sm:$0x3] %vm1701_vm12, %v1695_v28 }
 0x26a   :  { %v2167_v29 = vpop.f32.mrf.mxu1 }
 0x26b   :  { %v2162_v38 = vpop.f32.mrf.mxu0 }
 0x26c   :  { %v1698_v57 = vpop.f32.mrf.mxu1 }
 0x26e   :  { %v2168_v39 = vpop.f32.mrf.mxu1 }

// kernel: higentra_forward.14
= control target key start
LH: loop header
LB: loop body
LE: loop exit
PB: predicated region body
PF: predicated region fallthrough
CT: control target
= control target key end

     0   :  { %vm60_vm0 = vcmask 523264   ;;  %vm131_vm1 = vcmask 261120   ;;  %s249_s1 = inlined_call_operand.vmem [shape: bf16[64,32], index: 1, kind: input, shape index: {}]   ;;  %s250_s0 = inlined_call_operand.vmem [shape: f32[32,64], index: 0, kind: input, shape index: {}]   ;;  %s251_s3 = inlined_call_operand.vmem [shape: f32[32,32], index: 3, kind: input, shape index: {}, may-alias: {3,4}]   ;;  %s252_s2 = inlined_call_operand.vmem [shape: f32[1,32], index: 2, kind: input, shape index: {}]   ;;  %s253_s4 = inlined_call_operand.vmem [shape: f32[32,32], index: 4, kind: output, shape index: {}, may-alias: {3,4}]  }
   0x1   :  { %v165_v0 = vld [vmem:[%s249_s1 + $0x18] sm:$0xff]   ;;  %v166_v1 = vld [vmem:[%s249_s1 + $0x10] sm:$0xff]   ;;  %v167_v2 = vld [vmem:[%s249_s1 + $0x8] sm:$0xff]  }
   0x2   :  { %153 = vmatprep.subr.bf16.mxu0 %v165_v0  ;;  %v22_v3 = vld [vmem:[%s250_s0] sm:$0xff]  ;;  %v23_v4 = vld [vmem:[%s250_s0 + $0x8] sm:$0xff]  ;;  %v24_v7 = vld [vmem:[%s250_s0 + $0x10] sm:$0xff] }
   0x3   :  { %154 = vmatpush3.bf16.msra.mxu0 %v165_v0  ;;  %v26_v5 = vpack.c.bf16 %v23_v4, %v22_v3  ;;  %v168_v6 = vld [vmem:[%s249_s1] sm:$0xff]   ;;  %v25_v8 = vld [vmem:[%s250_s0 + $0x18] sm:$0xff]  ;;  %v20_v10 = vld [vmem:[%s251_s3 + $0x10] sm:$0xff] }
   0x4   :  { %155 = vmatprep.subr.bf16.mxu0 %v166_v1  ;;  %v27_v9 = vpack.c.bf16 %v25_v8, %v24_v7  ;;  %v146_v12 = vld [vmem:[%s252_s2] ss:$0 sm:$0xff]  ;;  %v21_v16 = vld [vmem:[%s251_s3 + $0x18] sm:$0xff]  ;;  %v19_v20 = vld [vmem:[%s251_s3 + $0x8] sm:$0xff] }
   0x5   :  { %161 = vmatprep.mubr.msk.bf16.mxu0 %vm60_vm0, %v26_v5  ;;  %v18_v13 = vld [vmem:[%s251_s3] sm:$0xff] }
   0x7   :  { %156 = vmatpush3.bf16.msra.mxu0 %v166_v1 }
   0x8   :  { %157 = vmatprep.subr.bf16.mxu0 %v167_v2 }
   0xb   :  { %158 = vmatpush3.bf16.msra.mxu0 %v167_v2 }
   0xc   :  { %159 = vmatprep.subr.bf16.mxu0 %v168_v6 }
   0xf   :  { %160 = vmatpush3.bf16.msra.mxu0 %v168_v6 }
  0x12   :  { %162 = vmatmul.mubr.msk.bf16.vlgmr.msra.gmra.mxu0 %vm60_vm0, %v27_v9 }
  0xd2   :  { %v163_v11 = vpop.f32.mrf.mxu0 }
  0xd3   :  { %v118_v14 = vadd.f32 %v163_v11, %v20_v10 }
  0xd4   :  { %v101_v15 = vpop.f32.mrf.mxu0 }
  0xd5   :  { %v129_v17 = vadd.f32 %v146_v12, %v118_v14  ;;  %v116_v18 = vadd.f32 %v101_v15, %v18_v13 }
  0xd6   :  { %v164_v19 = vpop.f32.mrf.mxu0 }
  0xd7   :  { %134 = vst.msk [vmem:[%s253_s4 + $0x10] sm:$0xff] %vm131_vm1, %v129_v17  ;;  %v127_v21 = vadd.f32 %v146_v12, %v116_v18  ;;  %v119_v22 = vadd.f32 %v164_v19, %v21_v16 }
  0xd8   :  { %v104_v23 = vpop.f32.mrf.mxu0 }
  0xd9   :  { %132 = vst.msk [vmem:[%s253_s4] sm:$0xff] %vm131_vm1, %v127_v21  ;;  %v130_v24 = vadd.f32 %v146_v12, %v119_v22  ;;  %v117_v25 = vadd.f32 %v104_v23, %v19_v20 }
  0xdb   :  { %135 = vst.msk [vmem:[%s253_s4 + $0x18] sm:$0xff] %vm131_vm1, %v130_v24  ;;  %v128_v26 = vadd.f32 %v146_v12, %v117_v25 }
  0xdd   :  { %133 = vst.msk [vmem:[%s253_s4 + $0x8] sm:$0xff] %vm131_vm1, %v128_v26 }

// kernel: higentra_forward.15
= control target key start
LH: loop header
LB: loop body
LE: loop exit
PB: predicated region body
PF: predicated region fallthrough
CT: control target
= control target key end

     0   :  { %vm33_vm0 = vcmask 261120   ;;  %s585_s0 = inlined_call_operand.vmem [shape: f32[32,32], index: 0, kind: input, shape index: {}, may-alias: {0,7}]   ;;  %s586_s3 = inlined_call_operand.vmem [shape: bf16[32,128], index: 3, kind: input, shape index: {}]   ;;  %s587_s1 = inlined_call_operand.vmem [shape: f32[1,32], index: 1, kind: input, shape index: {}]   ;;  %s588_s2 = inlined_call_operand.vmem [shape: f32[1,32], index: 2, kind: input, shape index: {}]   ;;  %s589_s5 = inlined_call_operand.vmem [shape: bf16[128,32], index: 5, kind: input, shape index: {}]   ;;  %s590_s4 = inlined_call_operand.vmem [shape: f32[1,128], index: 4, kind: input, shape index: {}]   ;;  %s591_s6 = inlined_call_operand.vmem [shape: f32[1,32], index: 6, kind: input, shape index: {}]   ;;  %s592_s7 = inlined_call_operand.vmem [shape: f32[32,32], index: 7, kind: output, shape index: {}, may-alias: {0,7}]  }
   0x1   :  { %v488_v0 = vld [vmem:[%s585_s0] sm:$0xff]  ;;  %v493_v1 = vld [vmem:[%s585_s0 + $0x10] sm:$0xff]  ;;  %v498_v2 = vld [vmem:[%s585_s0 + $0x8] sm:$0xff] }
   0x2   :  { %v34_v3 = vsel %vm33_vm0, %v488_v0, 0.0  ;;  %v40_v4 = vsel %vm33_vm0, %v493_v1, 0.0  ;;  %v507_v5 = vld [vmem:[%s585_s0 + $0x18] sm:$0xff]  ;;  %v37_v6 = vsel %vm33_vm0, %v498_v2, 0.0  ;;  %v419_v28 = vld [vmem:[%s586_s3 + $0x8] sm:$0xff]   ;;  %v420_v29 = vld [vmem:[%s586_s3] sm:$0xff]  }
   0x3   :  { %35 = vadd.xlane.f32.xlu0 %v34_v3  ;;  %41 = vadd.xlane.f32.xlu1 %v40_v4  ;;  %v43_v7 = vsel %vm33_vm0, %v507_v5, 0.0  ;;  %v361_v44 = vld [vmem:[%s587_s1] ss:$0 sm:$0xff]  ;;  %v421_v62 = vld [vmem:[%s589_s5 + $0x38] sm:$0xff]   ;;  %v422_v63 = vld [vmem:[%s589_s5 + $0x30] sm:$0xff]  }
   0x4   :  { %391 = vmatprep.subr.bf16.mxu0 %v419_v28  ;;  %v362_v49 = vld [vmem:[%s588_s2] ss:$0 sm:$0xff]  ;;  %399 = vmatprep.subr.bf16.mxu1 %v421_v62  ;;  %v423_v3 = vld [vmem:[%s589_s5 + $0x28] sm:$0xff]  }
   0x5   :  { %392 = vmatpush3.bf16.msra.mxu0 %v419_v28  ;;  %400 = vmatpush3.bf16.msra.mxu1 %v421_v62  ;;  %v424_v4 = vld [vmem:[%s589_s5 + $0x20] sm:$0xff]  }
   0x6   :  { %393 = vmatprep.subr.bf16.mxu0 %v420_v29  ;;  %401 = vmatprep.subr.bf16.mxu1 %v422_v63 }
   0x7   :  { %38 = vadd.xlane.f32.xlu0 %v37_v6  ;;  %44 = vadd.xlane.f32.xlu1 %v43_v7  ;;  %v425_v6 = vld [vmem:[%s589_s5 + $0x18] sm:$0xff]   ;;  %v426_v7 = vld [vmem:[%s589_s5 + $0x10] sm:$0xff]  }
   0x9   :  { %394 = vmatpush3.bf16.msra.mxu0 %v420_v29  ;;  %402 = vmatpush3.bf16.msra.mxu1 %v422_v63 }
   0xa   :  { %403 = vmatprep.subr.bf16.mxu1 %v423_v3 }
   0xd   :  { %404 = vmatpush3.bf16.msra.mxu1 %v423_v3 }
   0xe   :  { %405 = vmatprep.subr.bf16.mxu1 %v424_v4 }
  0x11   :  { %406 = vmatpush3.bf16.msra.mxu1 %v424_v4 }
  0x12   :  { %407 = vmatprep.subr.bf16.mxu1 %v425_v6 }
  0x15   :  { %408 = vmatpush3.bf16.msra.mxu1 %v425_v6 }
  0x16   :  { %409 = vmatprep.subr.bf16.mxu1 %v426_v7 }
  0x19   :  { %410 = vmatpush3.bf16.msra.mxu1 %v426_v7 }
  0x8c   :  { %v36_v8 = vpop.xlane.xlu0 %35  ;;  %v42_v9 = vpop.xlane.xlu1 %41 }
  0x8d   :  { %v47_v10 = vmul.f32 0.03125, %v36_v8  ;;  %v49_v11 = vmul.f32 0.03125, %v42_v9  ;;  %v427_v8 = vld [vmem:[%s589_s5 + $0x8] sm:$0xff]   ;;  %v428_v9 = vld [vmem:[%s589_s5] sm:$0xff]  }
  0x8e   :  { %411 = vmatprep.subr.bf16.mxu1 %v427_v8 }
  0x8f   :  { %v51_v12 = vsub.f32 %v488_v0, %v47_v10  ;;  %v53_v13 = vsub.f32 %v493_v1, %v49_v11  ;;  %412 = vmatpush3.bf16.msra.mxu1 %v427_v8  ;;  %v363_v10 = vld [vmem:[%s590_s4] ss:$0 sm:$0xff] }
  0x90   :  { %v39_v14 = vpop.xlane.xlu0 %38  ;;  %v45_v15 = vpop.xlane.xlu1 %44  ;;  %413 = vmatprep.subr.bf16.mxu1 %v428_v9 }
  0x91   :  { %v48_v16 = vmul.f32 0.03125, %v39_v14  ;;  %v50_v17 = vmul.f32 0.03125, %v45_v15  ;;  %v55_v18 = vmul.f32 %v51_v12, %v51_v12  ;;  %v57_v19 = vmul.f32 %v53_v13, %v53_v13 }
  0x93   :  { %v52_v20 = vsub.f32 %v498_v2, %v48_v16  ;;  %v54_v21 = vsub.f32 %v507_v5, %v50_v17  ;;  %v59_v22 = vsel %vm33_vm0, %v55_v18, 0.0  ;;  %v65_v23 = vsel %vm33_vm0, %v57_v19, 0.0  ;;  %414 = vmatpush3.bf16.msra.mxu1 %v428_v9 }
  0x94   :  { %60 = vadd.xlane.f32.xlu0 %v59_v22 }
  0x95   :  { %v56_v24 = vmul.f32 %v52_v20, %v52_v20  ;;  %v58_v25 = vmul.f32 %v54_v21, %v54_v21 }
  0x97   :  { %v62_v26 = vsel %vm33_vm0, %v56_v24, 0.0  ;;  %v68_v27 = vsel %vm33_vm0, %v58_v25, 0.0 }
  0x98   :  { %66 = vadd.xlane.f32.xlu0 %v65_v23  ;;  %63 = vadd.xlane.f32.xlu1 %v62_v26 }
  0x9c   :  { %69 = vadd.xlane.f32.xlu1 %v68_v27 }
 0x11d   :  { %v61_v30 = vpop.xlane.xlu0 %60 }
 0x11e   :  { %v71_v31 = vmul.f32 0.03125, %v61_v30 }
 0x120   :  { %v75_v32 = vadd.f32 1e-05, %v71_v31 }
 0x121   :  { %v64_v33 = vpop.xlane.xlu1 %63  ;;  %v67_v34 = vpop.xlane.xlu0 %66 }
 0x122   :  { %429 = vrsqrt.f32 %v75_v32  ;;  %v72_v35 = vmul.f32 0.03125, %v64_v33  ;;  %v73_v36 = vmul.f32 0.03125, %v67_v34 }
 0x124   :  { %v76_v37 = vadd.f32 1e-05, %v72_v35  ;;  %v77_v38 = vadd.f32 1e-05, %v73_v36 }
 0x125   :  { %v70_v39 = vpop.xlane.xlu1 %69 }
 0x126   :  { %431 = vrsqrt.f32 %v76_v37  ;;  %v74_v40 = vmul.f32 0.03125, %v70_v39 }
 0x127   :  { %433 = vrsqrt.f32 %v77_v38 }
 0x128   :  { %v78_v41 = vadd.f32 1e-05, %v74_v40 }
 0x12a   :  { %435 = vrsqrt.f32 %v78_v41 }
 0x12f   :  { %v430_v42 = vpop.eup %429 }
 0x130   :  { %v83_v43 = vmul.f32 %v430_v42, %v51_v12 }
 0x132   :  { %v93_v48 = vmul.f32 %v361_v44, %v83_v43 }
 0x133   :  { %v432_v45 = vpop.eup %431 }
 0x134   :  { %v434_v46 = vpop.eup %433  ;;  %v84_v47 = vmul.f32 %v432_v45, %v52_v20  ;;  %v103_v53 = vadd.f32 %v362_v49, %v93_v48 }
 0x135   :  { %v85_v50 = vmul.f32 %v434_v46, %v53_v13 }
 0x136   :  { %v94_v51 = vmul.f32 %v361_v44, %v84_v47 }
 0x137   :  { %v436_v52 = vpop.eup %435  ;;  %v95_v56 = vmul.f32 %v361_v44, %v85_v50 }
 0x138   :  { %v104_v54 = vadd.f32 %v362_v49, %v94_v51  ;;  %v86_v55 = vmul.f32 %v436_v52, %v54_v21 }
 0x139   :  { %v105_v59 = vadd.f32 %v362_v49, %v95_v56 }
 0x13a   :  { %v107_v57 = vpack.c.bf16 %v104_v54, %v103_v53  ;;  %v96_v58 = vmul.f32 %v361_v44, %v86_v55 }
 0x13c   :  { %395 = vmatprep.mubr.msk.bf16.mxu0 %vm33_vm0, %v107_v57  ;;  %v106_v60 = vadd.f32 %v362_v49, %v96_v58  ;;  %v376_v58 = vld [vmem:[%s591_s6] ss:$0 sm:$0xff] }
 0x13e   :  { %v108_v61 = vpack.c.bf16 %v106_v60, %v105_v59 }
 0x140   :  { %396 = vmatmul.mubr.msk.bf16.vlgmr.msra.gmra.mxu0 %vm33_vm0, %v108_v61 }
 0x200   :  { %v397_v11 = vpop.f32.mrf.mxu0 }
 0x201   :  { %v181_v12 = vadd.f32 %v397_v11, %v363_v10 }
 0x202   :  { %v172_v13 = vpop.f32.mrf.mxu0 }
 0x203   :  { %v193_v14 = vmul.f32 0.044715, %v181_v12  ;;  %v173_v15 = vadd.f32 %v363_v10, %v172_v13  ;;  %v189_v50 = vmul.f32 0.5, %v181_v12 }
 0x204   :  { %v398_v16 = vpop.f32.mrf.mxu0 }
 0x205   :  { %v197_v17 = vmul.f32 %v193_v14, %v181_v12  ;;  %v191_v18 = vmul.f32 0.044715, %v173_v15  ;;  %v184_v19 = vadd.f32 %v398_v16, %v363_v10  ;;  %v187_v47 = vmul.f32 0.5, %v173_v15 }
 0x206   :  { %v175_v20 = vpop.f32.mrf.mxu0 }
 0x207   :  { %v201_v21 = vmul.f32 %v197_v17, %v181_v12  ;;  %v194_v22 = vmul.f32 0.044715, %v184_v19  ;;  %v176_v23 = vadd.f32 %v363_v10, %v175_v20  ;;  %v195_v24 = vmul.f32 %v191_v18, %v173_v15 }
 0x208   :  { %v190_v45 = vmul.f32 0.5, %v184_v19 }
 0x209   :  { %v198_v25 = vmul.f32 %v194_v22, %v184_v19  ;;  %v192_v26 = vmul.f32 0.044715, %v176_v23  ;;  %v199_v27 = vmul.f32 %v195_v24, %v173_v15  ;;  %v205_v28 = vadd.f32 %v201_v21, %v181_v12 }
 0x20a   :  { %v188_v48 = vmul.f32 0.5, %v176_v23 }
 0x20b   :  { %v202_v29 = vmul.f32 %v198_v25, %v184_v19  ;;  %v196_v30 = vmul.f32 %v192_v26, %v176_v23  ;;  %v203_v31 = vadd.f32 %v199_v27, %v173_v15  ;;  %v209_v32 = vmul.f32 0.7978846, %v205_v28 }
 0x20d   :  { %v200_v33 = vmul.f32 %v196_v30, %v176_v23  ;;  %v207_v34 = vmul.f32 0.7978846, %v203_v31  ;;  %v206_v35 = vadd.f32 %v202_v29, %v184_v19 }
 0x20f   :  { %v204_v36 = vadd.f32 %v200_v33, %v176_v23  ;;  %437 = vtanh.f32 %v207_v34  ;;  %v210_v37 = vmul.f32 0.7978846, %v206_v35 }
 0x210   :  { %439 = vtanh.f32 %v209_v32 }
 0x211   :  { %v208_v38 = vmul.f32 0.7978846, %v204_v36  ;;  %441 = vtanh.f32 %v210_v37 }
 0x213   :  { %443 = vtanh.f32 %v208_v38 }
 0x21c   :  { %v438_v39 = vpop.eup %437 }
 0x21d   :  { %v440_v40 = vpop.eup %439  ;;  %v215_v42 = vadd.f32 1.0, %v438_v39 }
 0x21e   :  { %v442_v41 = vpop.eup %441  ;;  %v217_v46 = vadd.f32 1.0, %v440_v40 }
 0x21f   :  { %v218_v43 = vadd.f32 1.0, %v442_v41  ;;  %v219_v52 = vmul.f32 %v215_v42, %v187_v47 }
 0x220   :  { %v444_v44 = vpop.eup %443  ;;  %v221_v54 = vmul.f32 %v217_v46, %v189_v50 }
 0x221   :  { %v216_v49 = vadd.f32 1.0, %v444_v44  ;;  %v222_v51 = vmul.f32 %v218_v43, %v190_v45 }
 0x223   :  { %v220_v53 = vmul.f32 %v216_v49, %v188_v48  ;;  %v224_v56 = vpack.c.bf16 %v222_v51, %v221_v54 }
 0x225   :  { %v223_v55 = vpack.c.bf16 %v220_v53, %v219_v52 }
 0x227   :  { %415 = vmatprep.mubr.bf16.mxu1 %v223_v55 }
 0x228   :  { %416 = vmatmul.mubr.bf16.vlgmr.msra.gmra.mxu1 %v224_v56 }
 0x2e8   :  { %v417_v57 = vpop.f32.mrf.mxu1 }
 0x2e9   :  { %v340_v59 = vadd.f32 %v417_v57, %v493_v1 }
 0x2ea   :  { %v323_v60 = vpop.f32.mrf.mxu1 }
 0x2eb   :  { %v351_v61 = vadd.f32 %v376_v58, %v340_v59  ;;  %v338_v62 = vadd.f32 %v323_v60, %v488_v0 }
 0x2ec   :  { %v418_v63 = vpop.f32.mrf.mxu1 }
 0x2ed   :  { %355 = vst.msk [vmem:[%s592_s7 + $0x10] sm:$0xff] %vm33_vm0, %v351_v61  ;;  %v349_v3 = vadd.f32 %v376_v58, %v338_v62  ;;  %v341_v4 = vadd.f32 %v418_v63, %v507_v5 }
 0x2ee   :  { %v326_v6 = vpop.f32.mrf.mxu1 }
 0x2ef   :  { %353 = vst.msk [vmem:[%s592_s7] sm:$0xff] %vm33_vm0, %v349_v3  ;;  %v352_v1 = vadd.f32 %v376_v58, %v341_v4  ;;  %v339_v7 = vadd.f32 %v326_v6, %v498_v2 }
 0x2f1   :  { %356 = vst.msk [vmem:[%s592_s7 + $0x18] sm:$0xff] %vm33_vm0, %v352_v1  ;;  %v350_v0 = vadd.f32 %v376_v58, %v339_v7 }
 0x2f3   :  { %354 = vst.msk [vmem:[%s592_s7 + $0x8] sm:$0xff] %vm33_vm0, %v350_v0 }

// kernel: higentra_forward.21
= control target key start
LH: loop header
LB: loop body
LE: loop exit
PB: predicated region body
PF: predicated region fallthrough
CT: control target
= control target key end

     0   :  { %vm31_vm0 = vcmask 254976   ;;  %s347_s0 = inlined_call_operand.vmem [shape: f32[2,32], index: 0, kind: input, shape index: {}]   ;;  %s348_s1 = inlined_call_operand.vmem [shape: f32[1,32], index: 1, kind: input, shape index: {}]   ;;  %s349_s2 = inlined_call_operand.vmem [shape: f32[1,32], index: 2, kind: input, shape index: {}]   ;;  %s350_s3 = inlined_call_operand.vmem [shape: bf16[32,32], index: 3, kind: input, shape index: {}]   ;;  %s351_s4 = inlined_call_operand.vmem [shape: f32[1,32], index: 4, kind: input, shape index: {}]   ;;  %s352_s5 = inlined_call_operand.vmem [shape: bf16[32,2], index: 5, kind: input, shape index: {}]   ;;  %s353_s6 = inlined_call_operand.vmem [shape: f32[1,2], index: 6, kind: input, shape index: {}]   ;;  %s354_s7 = inlined_call_operand.hbm [shape: f32[2,2], index: 7, kind: output, shape index: {}]  }
   0x1   :  { %v28_v0 = vld [vmem:[%s347_s0] sm:$0x3] }
   0x2   :  { %v32_v1 = vsel %vm31_vm0, %v28_v0, 0.0 }
   0x3   :  { %33 = vadd.xlane.f32.xlu0 %v32_v1 }
   0x4   :  { %12 = vsyncpa [#allocation3], 0  ;;  %v246_v7 = vld [vmem:[%s350_s3 + $0x8] sm:$0xff]   ;;  %v274_v8 = vmov 0.0   ;;  %vm275_vm1 = vmmov 0   ;;  %v247_v9 = vld [vmem:[%s350_s3] sm:$0xff]  }
   0x5   :  { %227 = vmatprep.subr.bf16.mxu0 %v274_v8  ;;  %231 = vmatprep.mubr.msk.bf16.mxu0 %vm275_vm1, %v274_v8  ;;  %v248_v10 = vld [vmem:[%s352_s5 + $0x8] sm:$0xff]   ;;  %v211_v15 = vld [vmem:[%s348_s1] ss:$0 sm:$0xff]  ;;  %vm84_vm2 = vcmask 261120   ;;  %s276_s15 = smov [#allocation2]   ;;  %vm195_vm3 = vcmask 9216  }
   0x6   :  { %228 = vmatpush3.bf16.msra.mxu0 %v246_v7  ;;  %235 = vmatprep.subr.bf16.mxu1 %v274_v8  ;;  %v212_v17 = vld [vmem:[%s349_s2] ss:$0 sm:$0xff]  ;;  %s203_s16 = sshll.u32 %s276_s15, 4  ;;  %s204_s16 = int_to_ptr.vmem [resolvable:$true] %s203_s16 }
   0x7   :  { %229 = vmatprep.subr.bf16.mxu0 %v274_v8  ;;  %239 = vmatprep.mubr.msk.bf16.mxu1 %vm275_vm1, %v274_v8  ;;  %v249_v21 = vld [vmem:[%s352_s5] sm:$0xff]   ;;  %p257_p1 = scmp.lt.s32.totalorder %s204_s16, %s204_s16 }
   0x8   :  { %236 = vmatpush3.bf16.msra.mxu1 %v248_v10  ;;  %v213_v22 = vld [vmem:[%s351_s4] ss:$0 sm:$0xff]  ;;  %s252_s4 = scalar_lea.vmem %s204_s16, 32 }
   0x9   :  { %237 = vmatprep.subr.bf16.mxu1 %v274_v8  ;;  %v217_v29 = vld [vmem:[%s353_s6] ss:$0 sm:$0xff]  ;;  %p253_p0 = scmp.ne.s32.totalorder %s204_s16, %s252_s4  ;;  %p258_p2 = scmp.lt.s32.totalorder %s252_s4, %s252_s4 }
   0xa   :  { %230 = vmatpush3.bf16.msra.mxu0 %v247_v9 }
   0xb   :  { %p259_p3 = por %p258_p2, %p257_p1 }
   0xc   :  { %238 = vmatpush3.bf16.msra.mxu1 %v249_v21 }
   0xd   :  { %p260_p4 = pnand %p259_p3, %p253_p0 }
  0x8c   :  { %v34_v2 = vpop.xlane.xlu0 %33 }
  0x8d   :  { %v36_v3 = vmul.f32 0.03125, %v34_v2 }
  0x8f   :  { %v37_v4 = vsub.f32 %v28_v0, %v36_v3 }
  0x91   :  { %v38_v5 = vmul.f32 %v37_v4, %v37_v4 }
  0x93   :  { %v39_v6 = vsel %vm31_vm0, %v38_v5, 0.0 }
  0x94   :  { %40 = vadd.xlane.f32.xlu0 %v39_v6 }
 0x11d   :  { %v41_v11 = vpop.xlane.xlu0 %40 }
 0x11e   :  { %v42_v12 = vmul.f32 0.03125, %v41_v11 }
 0x120   :  { %v43_v13 = vadd.f32 1e-05, %v42_v12 }
 0x122   :  { %250 = vrsqrt.f32 %v43_v13 }
 0x12f   :  { %v251_v14 = vpop.eup %250 }
 0x130   :  { %v45_v16 = vmul.f32 %v251_v14, %v37_v4 }
 0x132   :  { %v52_v18 = vmul.f32 %v211_v15, %v45_v16 }
 0x134   :  { %v59_v19 = vadd.f32 %v212_v17, %v52_v18 }
 0x136   :  { %v60_v20 = vpack.c.bf16 %v59_v19, %v59_v19 }
 0x138   :  { %232 = vmatmul.mubr.msk.bf16.vlgmr.msra.gmra.mxu0 %vm84_vm2, %v60_v20 }
 0x1f8   :  { %v122_v23 = vpop.f32.mrf.mxu0 }
 0x1f9   :  { %v123_v24 = vadd.f32 %v213_v22, %v122_v23 }
 0x1fa   :  { %v233_v25 = vpop.f32.mrf.mxu0 }
 0x1fb   :  { %v128_v26 = vpack.c.bf16 %v123_v24, %v123_v24 }
 0x1fc   :  { %v125_v27 = vpop.f32.mrf.mxu0 }
 0x1fd   :  { %240 = vmatmul.mubr.msk.bf16.vlgmr.msra.gmra.mxu1 %vm84_vm2, %v128_v26 }
 0x1fe   :  { %v234_v28 = vpop.f32.mrf.mxu0 }
 0x2bd   :  { %v189_v30 = vpop.f32.mrf.mxu1 }
 0x2be   :  { %v190_v31 = vadd.f32 %v217_v29, %v189_v30 }
 0x2bf   :  { %v241_v32 = vpop.f32.mrf.mxu1 }
 0x2c0   :  { %196 = vst.msk [vmem:[#allocation2] sm:$0x3] %vm195_vm3, %v190_v31 }
 0x2c1   :  { %v192_v33 = vpop.f32.mrf.mxu1 }
 0x2c2   :  { %263 = shalt.err (!%p260_p4)
}
 0x2c3   :  { %206 = dma.vmem_to_hbm [thread:$0]  %s204_s16, 32, %s354_s7, [#allocation3]   ;;  %v242_v34 = vpop.f32.mrf.mxu1 }
 0x2c4   :  { %272 = dma.done.wait [#allocation3], 32  }
 0x2c5   :  { %273 = vsyncadd [#allocation3], 4294967264 }
 0x2c6   :  { %210 = vsyncpa [#allocation3], 1 }

// kernel: higentra_forward.13
= control target key start
LH: loop header
LB: loop body
LE: loop exit
PB: predicated region body
PF: predicated region fallthrough
CT: control target
= control target key end

     0   :  { %v4365_v0 = vmov 0.0   ;;  %vm209_vm0 = vcmask 261120   ;;  %vm4366_vm1 = vmmov 0   ;;  %vm1682_vm2 = vcmask 9216   ;;  %s5447_s1 = inlined_call_operand.vmem [shape: f32[32,2,32], index: 1, kind: input, shape index: {}]   ;;  %s5448_s0 = inlined_call_operand.vmem [shape: f32[32,2,32], index: 0, kind: input, shape index: {}]   ;;  %s5449_s2 = inlined_call_operand.vmem [shape: f32[32,2,32], index: 2, kind: input, shape index: {}]   ;;  %s5450_s3 = inlined_call_operand.vmem [shape: f32[32,2,32], index: 3, kind: output, shape index: {0}]   ;;  %s5451_s4 = inlined_call_operand.vmem [shape: f32[32,2], index: 4, kind: output, shape index: {1}]  }
   0x1   :  { %3915 = vmatprep.subr.bf16.mxu0 %v4365_v0  ;;  %3921 = vmatprep.subr.bf16.mxu1 %v4365_v0  ;;  %v81_v1 = vld [vmem:[%s5447_s1] sm:$0x3]  ;;  %v82_v2 = vld [vmem:[%s5447_s1 + $0x2] sm:$0x3]  ;;  %v83_v5 = vld [vmem:[%s5447_s1 + $0x4] sm:$0x3] }
   0x2   :  { %v113_v3 = vpack.c.bf16 %v81_v1, %v81_v1  ;;  %v114_v4 = vpack.c.bf16 %v82_v2, %v82_v2  ;;  %3917 = vmatprep.mubr.msk.bf16.mxu0 %vm4366_vm1, %v4365_v0  ;;  %3923 = vmatprep.mubr.msk.bf16.mxu1 %vm4366_vm1, %v4365_v0  ;;  %v84_v6 = vld [vmem:[%s5447_s1 + $0x6] sm:$0x3]  ;;  %v17_v9 = vld [vmem:[%s5448_s0] sm:$0x3]  ;;  %v18_v10 = vld [vmem:[%s5448_s0 + $0x2] sm:$0x3]  ;;  %v115_v11 = vpack.c.bf16 %v83_v5, %v83_v5 }
   0x3   :  { %v116_v12 = vpack.c.bf16 %v84_v6, %v84_v6  ;;  %v49_v13 = vpack.c.bf16 %v17_v9, %v17_v9  ;;  %v50_v14 = vpack.c.bf16 %v18_v10, %v18_v10  ;;  %v85_v17 = vld [vmem:[%s5447_s1 + $0x8] sm:$0x3]  ;;  %v86_v18 = vld [vmem:[%s5447_s1 + $0xa] sm:$0x3]  ;;  %v19_v19 = vld [vmem:[%s5448_s0 + $0x4] sm:$0x3] }
   0x4   :  { %v214_v7 = vsel %vm209_vm0, %v113_v3, 0  ;;  %v260_v8 = vsel %vm209_vm0, %v114_v4, 0  ;;  %v306_v15 = vsel %vm209_vm0, %v115_v11, 0  ;;  %v20_v20 = vld [vmem:[%s5448_s0 + $0x6] sm:$0x3]  ;;  %v117_v21 = vpack.c.bf16 %v85_v17, %v85_v17 }
   0x5   :  { %3916 = vmatpush3.bf16.xpose.msra.mxu0 %v214_v7  ;;  %3922 = vmatpush3.bf16.xpose.msra.mxu1 %v260_v8  ;;  %v352_v16 = vsel %vm209_vm0, %v116_v12, 0  ;;  %v118_v22 = vpack.c.bf16 %v86_v18, %v86_v18  ;;  %v51_v23 = vpack.c.bf16 %v19_v19, %v19_v19  ;;  %v52_v24 = vpack.c.bf16 %v20_v20, %v20_v20  ;;  %v87_v27 = vld [vmem:[%s5447_s1 + $0xc] sm:$0x3]  ;;  %v88_v28 = vld [vmem:[%s5447_s1 + $0xe] sm:$0x3] }
   0x6   :  { %3927 = vmatprep.subr.bf16.mxu0 %v4365_v0  ;;  %3933 = vmatprep.subr.bf16.mxu1 %v4365_v0  ;;  %v398_v25 = vsel %vm209_vm0, %v117_v21, 0  ;;  %v21_v29 = vld [vmem:[%s5448_s0 + $0x8] sm:$0x3]  ;;  %v22_v30 = vld [vmem:[%s5448_s0 + $0xa] sm:$0x3]  ;;  %v119_v31 = vpack.c.bf16 %v87_v27, %v87_v27  ;;  %v120_v32 = vpack.c.bf16 %v88_v28, %v88_v28  ;;  %vm1911_vm3 = vcmask 1040384  }
   0x7   :  { %v444_v26 = vsel %vm209_vm0, %v118_v22, 0  ;;  %v53_v33 = vpack.c.bf16 %v21_v29, %v21_v29  ;;  %v54_v34 = vpack.c.bf16 %v22_v30, %v22_v30  ;;  %v89_v37 = vld [vmem:[%s5447_s1 + $0x10] sm:$0x3]  ;;  %v90_v38 = vld [vmem:[%s5447_s1 + $0x12] sm:$0x3]  ;;  %vm1907_vm4 = vcmask 15360  }
   0x8   :  { %v490_v35 = vsel %vm209_vm0, %v119_v31, 0  ;;  %v536_v36 = vsel %vm209_vm0, %v120_v32, 0  ;;  %v23_v39 = vld [vmem:[%s5448_s0 + $0xc] sm:$0x3]  ;;  %v24_v40 = vld [vmem:[%s5448_s0 + $0xe] sm:$0x3]  ;;  %v121_v41 = vpack.c.bf16 %v89_v37, %v89_v37  ;;  %v122_v42 = vpack.c.bf16 %v90_v38, %v90_v38 }
   0x9   :  { %v55_v43 = vpack.c.bf16 %v23_v39, %v23_v39  ;;  %v56_v44 = vpack.c.bf16 %v24_v40, %v24_v40  ;;  %v91_v47 = vld [vmem:[%s5447_s1 + $0x14] sm:$0x3]  ;;  %v92_v48 = vld [vmem:[%s5447_s1 + $0x16] sm:$0x3]  ;;  %v25_v49 = vld [vmem:[%s5448_s0 + $0x10] sm:$0x3] }
   0xa   :  { %v582_v45 = vsel %vm209_vm0, %v121_v41, 0  ;;  %v628_v46 = vsel %vm209_vm0, %v122_v42, 0  ;;  %v26_v50 = vld [vmem:[%s5448_s0 + $0x12] sm:$0x3]  ;;  %v123_v51 = vpack.c.bf16 %v91_v47, %v91_v47  ;;  %v124_v52 = vpack.c.bf16 %v92_v48, %v92_v48  ;;  %v93_v57 = vld [vmem:[%s5447_s1 + $0x18] sm:$0x3] }
   0xb   :  { %v57_v53 = vpack.c.bf16 %v25_v49, %v25_v49  ;;  %v58_v54 = vpack.c.bf16 %v26_v50, %v26_v50  ;;  %v94_v58 = vld [vmem:[%s5447_s1 + $0x1a] sm:$0x3]  ;;  %v27_v59 = vld [vmem:[%s5448_s0 + $0x14] sm:$0x3]  ;;  %v28_v60 = vld [vmem:[%s5448_s0 + $0x16] sm:$0x3]  ;;  %v125_v61 = vpack.c.bf16 %v93_v57, %v93_v57 }
   0xc   :  { %3918 = vmatmul.mubr.msk.bf16.vlgmr.msra.gmra.mxu0 %vm209_vm0, %v49_v13  ;;  %3924 = vmatmul.mubr.msk.bf16.vlgmr.msra.gmra.mxu1 %vm209_vm0, %v50_v14  ;;  %v674_v55 = vsel %vm209_vm0, %v123_v51, 0  ;;  %v720_v56 = vsel %vm209_vm0, %v124_v52, 0  ;;  %v126_v62 = vpack.c.bf16 %v94_v58, %v94_v58  ;;  %v59_v63 = vpack.c.bf16 %v27_v59, %v27_v59  ;;  %v95_v4 = vld [vmem:[%s5447_s1 + $0x1c] sm:$0x3]  ;;  %v96_v5 = vld [vmem:[%s5447_s1 + $0x1e] sm:$0x3] }
   0xd   :  { %3928 = vmatpush3.bf16.xpose.msra.mxu0 %v306_v15  ;;  %3934 = vmatpush3.bf16.xpose.msra.mxu1 %v352_v16  ;;  %v60_v1 = vpack.c.bf16 %v28_v60, %v28_v60  ;;  %v766_v2 = vsel %vm209_vm0, %v125_v61, 0  ;;  %v29_v6 = vld [vmem:[%s5448_s0 + $0x18] sm:$0x3]  ;;  %v30_v7 = vld [vmem:[%s5448_s0 + $0x1a] sm:$0x3]  ;;  %v127_v8 = vpack.c.bf16 %v95_v4, %v95_v4  ;;  %v128_v9 = vpack.c.bf16 %v96_v5, %v96_v5 }
   0xe   :  { %3929 = vmatprep.mubr.msk.bf16.mxu0 %vm4366_vm1, %v4365_v0  ;;  %3935 = vmatprep.mubr.msk.bf16.mxu1 %vm4366_vm1, %v4365_v0  ;;  %v812_v3 = vsel %vm209_vm0, %v126_v62, 0  ;;  %v61_v10 = vpack.c.bf16 %v29_v6, %v29_v6  ;;  %v62_v11 = vpack.c.bf16 %v30_v7, %v30_v7  ;;  %v97_v14 = vld [vmem:[%s5447_s1 + $0x20] sm:$0x3]  ;;  %v98_v15 = vld [vmem:[%s5447_s1 + $0x22] sm:$0x3]  ;;  %vm3381_vm5 = vcmask 254976  }
   0xf   :  { %3939 = vmatprep.subr.bf16.mxu0 %v4365_v0  ;;  %3945 = vmatprep.subr.bf16.mxu1 %v4365_v0  ;;  %v858_v12 = vsel %vm209_vm0, %v127_v8, 0  ;;  %v904_v13 = vsel %vm209_vm0, %v128_v9, 0  ;;  %v31_v16 = vld [vmem:[%s5448_s0 + $0x1c] sm:$0x3]  ;;  %v32_v17 = vld [vmem:[%s5448_s0 + $0x1e] sm:$0x3]  ;;  %v129_v18 = vpack.c.bf16 %v97_v14, %v97_v14  ;;  %v130_v19 = vpack.c.bf16 %v98_v15, %v98_v15 }
  0x10   :  { %v63_v20 = vpack.c.bf16 %v31_v16, %v31_v16  ;;  %v64_v21 = vpack.c.bf16 %v32_v17, %v32_v17  ;;  %v34_v27 = vld [vmem:[%s5448_s0 + $0x22] sm:$0x3]  ;;  %v36_v37 = vld [vmem:[%s5448_s0 + $0x26] sm:$0x3]  ;;  %v38_v47 = vld [vmem:[%s5448_s0 + $0x2a] sm:$0x3] }
  0x11   :  { %v950_v22 = vsel %vm209_vm0, %v129_v18, 0  ;;  %v66_v31 = vpack.c.bf16 %v34_v27, %v34_v27  ;;  %v68_v41 = vpack.c.bf16 %v36_v37, %v36_v37  ;;  %v70_v51 = vpack.c.bf16 %v38_v47, %v38_v47  ;;  %v40_v57 = vld [vmem:[%s5448_s0 + $0x2e] sm:$0x3]  ;;  %v42_v4 = vld [vmem:[%s5448_s0 + $0x32] sm:$0x3] }
  0x12   :  { %v72_v61 = vpack.c.bf16 %v40_v57, %v40_v57  ;;  %v74_v8 = vpack.c.bf16 %v42_v4, %v42_v4  ;;  %v44_v14 = vld [vmem:[%s5448_s0 + $0x36] sm:$0x3]  ;;  %vm3672_vm6 = vcmask 1041409   ;;  %vm3674_vm7 = vcmask 1042434  }
  0x13   :  { %v76_v18 = vpack.c.bf16 %v44_v14, %v44_v14  ;;  %vm3676_vm8 = vcmask 1043459   ;;  %vm3678_vm9 = vcmask 1044484   ;;  %vm3680_vm10 = vcmask 1045509  }
  0x14   :  { %3930 = vmatmul.mubr.msk.bf16.vlgmr.msra.gmra.mxu0 %vm209_vm0, %v51_v23  ;;  %3936 = vmatmul.mubr.msk.bf16.vlgmr.msra.gmra.mxu1 %vm209_vm0, %v52_v24  ;;  %v996_v23 = vsel %vm209_vm0, %v130_v19, 0  ;;  %v99_v24 = vld [vmem:[%s5447_s1 + $0x24] sm:$0x3]  ;;  %vm3684_vm11 = vcmask 1047559   ;;  %vm3682_vm12 = vcmask 1046534  }
  0x15   :  { %3940 = vmatpush3.bf16.xpose.msra.mxu0 %v398_v25  ;;  %3946 = vmatpush3.bf16.xpose.msra.mxu1 %v444_v26  ;;  %v100_v25 = vld [vmem:[%s5447_s1 + $0x26] sm:$0x3]  ;;  %v33_v26 = vld [vmem:[%s5448_s0 + $0x20] sm:$0x3]  ;;  %v131_v28 = vpack.c.bf16 %v99_v24, %v99_v24  ;;  %v46_v24 = vld [vmem:[%s5448_s0 + $0x3a] sm:$0x3] }
  0x16   :  { %3941 = vmatprep.mubr.msk.bf16.mxu0 %vm4366_vm1, %v4365_v0  ;;  %3947 = vmatprep.mubr.msk.bf16.mxu1 %vm4366_vm1, %v4365_v0  ;;  %v132_v29 = vpack.c.bf16 %v100_v25, %v100_v25  ;;  %v65_v30 = vpack.c.bf16 %v33_v26, %v33_v26 }
  0x17   :  { %3951 = vmatprep.subr.bf16.mxu0 %v4365_v0  ;;  %3957 = vmatprep.subr.bf16.mxu1 %v4365_v0  ;;  %v1042_v32 = vsel %vm209_vm0, %v131_v28, 0  ;;  %v78_v28 = vpack.c.bf16 %v46_v24, %v46_v24 }
  0x1c   :  { %3942 = vmatmul.mubr.msk.bf16.vlgmr.msra.gmra.mxu0 %vm209_vm0, %v53_v33  ;;  %3948 = vmatmul.mubr.msk.bf16.vlgmr.msra.gmra.mxu1 %vm209_vm0, %v54_v34  ;;  %v1088_v33 = vsel %vm209_vm0, %v132_v29, 0  ;;  %v101_v34 = vld [vmem:[%s5447_s1 + $0x28] sm:$0x3] }
  0x1d   :  { %3952 = vmatpush3.bf16.xpose.msra.mxu0 %v490_v35  ;;  %3958 = vmatpush3.bf16.xpose.msra.mxu1 %v536_v36  ;;  %v102_v35 = vld [vmem:[%s5447_s1 + $0x2a] sm:$0x3]  ;;  %v35_v36 = vld [vmem:[%s5448_s0 + $0x24] sm:$0x3]  ;;  %v133_v38 = vpack.c.bf16 %v101_v34, %v101_v34 }
  0x1e   :  { %3953 = vmatprep.mubr.msk.bf16.mxu0 %vm4366_vm1, %v4365_v0  ;;  %3959 = vmatprep.mubr.msk.bf16.mxu1 %vm4366_vm1, %v4365_v0  ;;  %v134_v39 = vpack.c.bf16 %v102_v35, %v102_v35  ;;  %v67_v40 = vpack.c.bf16 %v35_v36, %v35_v36 }
  0x1f   :  { %3963 = vmatprep.subr.bf16.mxu0 %v4365_v0  ;;  %3969 = vmatprep.subr.bf16.mxu1 %v4365_v0  ;;  %v1134_v42 = vsel %vm209_vm0, %v133_v38, 0 }
  0x24   :  { %3954 = vmatmul.mubr.msk.bf16.vlgmr.msra.gmra.mxu0 %vm209_vm0, %v55_v43  ;;  %3960 = vmatmul.mubr.msk.bf16.vlgmr.msra.gmra.mxu1 %vm209_vm0, %v56_v44  ;;  %v1180_v43 = vsel %vm209_vm0, %v134_v39, 0  ;;  %v103_v44 = vld [vmem:[%s5447_s1 + $0x2c] sm:$0x3] }
  0x25   :  { %3964 = vmatpush3.bf16.xpose.msra.mxu0 %v582_v45  ;;  %3970 = vmatpush3.bf16.xpose.msra.mxu1 %v628_v46  ;;  %v104_v45 = vld [vmem:[%s5447_s1 + $0x2e] sm:$0x3]  ;;  %v37_v46 = vld [vmem:[%s5448_s0 + $0x28] sm:$0x3]  ;;  %v135_v48 = vpack.c.bf16 %v103_v44, %v103_v44 }
  0x26   :  { %3965 = vmatprep.mubr.msk.bf16.mxu0 %vm4366_vm1, %v4365_v0  ;;  %3971 = vmatprep.mubr.msk.bf16.mxu1 %vm4366_vm1, %v4365_v0  ;;  %v136_v49 = vpack.c.bf16 %v104_v45, %v104_v45  ;;  %v69_v50 = vpack.c.bf16 %v37_v46, %v37_v46 }
  0x27   :  { %3975 = vmatprep.subr.bf16.mxu0 %v4365_v0  ;;  %3981 = vmatprep.subr.bf16.mxu1 %v4365_v0  ;;  %v1226_v52 = vsel %vm209_vm0, %v135_v48, 0 }
  0x2c   :  { %3966 = vmatmul.mubr.msk.bf16.vlgmr.msra.gmra.mxu0 %vm209_vm0, %v57_v53  ;;  %3972 = vmatmul.mubr.msk.bf16.vlgmr.msra.gmra.mxu1 %vm209_vm0, %v58_v54  ;;  %v1272_v53 = vsel %vm209_vm0, %v136_v49, 0  ;;  %v105_v54 = vld [vmem:[%s5447_s1 + $0x30] sm:$0x3] }
  0x2d   :  { %3976 = vmatpush3.bf16.xpose.msra.mxu0 %v674_v55  ;;  %3982 = vmatpush3.bf16.xpose.msra.mxu1 %v720_v56  ;;  %v106_v55 = vld [vmem:[%s5447_s1 + $0x32] sm:$0x3]  ;;  %v39_v56 = vld [vmem:[%s5448_s0 + $0x2c] sm:$0x3]  ;;  %v137_v58 = vpack.c.bf16 %v105_v54, %v105_v54 }
  0x2e   :  { %3977 = vmatprep.mubr.msk.bf16.mxu0 %vm4366_vm1, %v4365_v0  ;;  %3983 = vmatprep.mubr.msk.bf16.mxu1 %vm4366_vm1, %v4365_v0  ;;  %v138_v59 = vpack.c.bf16 %v106_v55, %v106_v55  ;;  %v71_v60 = vpack.c.bf16 %v39_v56, %v39_v56 }
  0x2f   :  { %3987 = vmatprep.subr.bf16.mxu0 %v4365_v0  ;;  %3993 = vmatprep.subr.bf16.mxu1 %v4365_v0  ;;  %v1318_v62 = vsel %vm209_vm0, %v137_v58, 0 }
  0x34   :  { %3978 = vmatmul.mubr.msk.bf16.vlgmr.msra.gmra.mxu0 %vm209_vm0, %v59_v63  ;;  %3984 = vmatmul.mubr.msk.bf16.vlgmr.msra.gmra.mxu1 %vm209_vm0, %v60_v1  ;;  %v1364_v63 = vsel %vm209_vm0, %v138_v59, 0  ;;  %v107_v1 = vld [vmem:[%s5447_s1 + $0x34] sm:$0x3] }
  0x35   :  { %3988 = vmatpush3.bf16.xpose.msra.mxu0 %v766_v2  ;;  %3994 = vmatpush3.bf16.xpose.msra.mxu1 %v812_v3  ;;  %v108_v2 = vld [vmem:[%s5447_s1 + $0x36] sm:$0x3]  ;;  %v41_v3 = vld [vmem:[%s5448_s0 + $0x30] sm:$0x3]  ;;  %v139_v5 = vpack.c.bf16 %v107_v1, %v107_v1 }
  0x36   :  { %3989 = vmatprep.mubr.msk.bf16.mxu0 %vm4366_vm1, %v4365_v0  ;;  %3995 = vmatprep.mubr.msk.bf16.mxu1 %vm4366_vm1, %v4365_v0  ;;  %v140_v6 = vpack.c.bf16 %v108_v2, %v108_v2  ;;  %v73_v7 = vpack.c.bf16 %v41_v3, %v41_v3 }
  0x37   :  { %3999 = vmatprep.subr.bf16.mxu0 %v4365_v0  ;;  %4005 = vmatprep.subr.bf16.mxu1 %v4365_v0  ;;  %v1410_v9 = vsel %vm209_vm0, %v139_v5, 0 }
  0x3c   :  { %3990 = vmatmul.mubr.msk.bf16.vlgmr.msra.gmra.mxu0 %vm209_vm0, %v61_v10  ;;  %3996 = vmatmul.mubr.msk.bf16.vlgmr.msra.gmra.mxu1 %vm209_vm0, %v62_v11  ;;  %v1456_v10 = vsel %vm209_vm0, %v140_v6, 0  ;;  %v109_v11 = vld [vmem:[%s5447_s1 + $0x38] sm:$0x3] }
  0x3d   :  { %4000 = vmatpush3.bf16.xpose.msra.mxu0 %v858_v12  ;;  %4006 = vmatpush3.bf16.xpose.msra.mxu1 %v904_v13  ;;  %v110_v12 = vld [vmem:[%s5447_s1 + $0x3a] sm:$0x3]  ;;  %v43_v13 = vld [vmem:[%s5448_s0 + $0x34] sm:$0x3]  ;;  %v141_v15 = vpack.c.bf16 %v109_v11, %v109_v11 }
  0x3e   :  { %4001 = vmatprep.mubr.msk.bf16.mxu0 %vm4366_vm1, %v4365_v0  ;;  %4007 = vmatprep.mubr.msk.bf16.mxu1 %vm4366_vm1, %v4365_v0  ;;  %v142_v16 = vpack.c.bf16 %v110_v12, %v110_v12  ;;  %v75_v17 = vpack.c.bf16 %v43_v13, %v43_v13 }
  0x3f   :  { %4011 = vmatprep.subr.bf16.mxu0 %v4365_v0  ;;  %4017 = vmatprep.subr.bf16.mxu1 %v4365_v0  ;;  %v1502_v19 = vsel %vm209_vm0, %v141_v15, 0  ;;  %v146_v15 = vld [vmem:[%s5449_s2 + $0x2] sm:$0x3] }
  0x44   :  { %4002 = vmatmul.mubr.msk.bf16.vlgmr.msra.gmra.mxu0 %vm209_vm0, %v63_v20  ;;  %4008 = vmatmul.mubr.msk.bf16.vlgmr.msra.gmra.mxu1 %vm209_vm0, %v64_v21  ;;  %v1548_v20 = vsel %vm209_vm0, %v142_v16, 0  ;;  %v111_v21 = vld [vmem:[%s5447_s1 + $0x3c] sm:$0x3]  ;;  %v178_v16 = vpack.c.bf16 %v146_v15, %v146_v15 }
  0x45   :  { %4012 = vmatpush3.bf16.xpose.msra.mxu0 %v950_v22  ;;  %4018 = vmatpush3.bf16.xpose.msra.mxu1 %v996_v23  ;;  %v112_v22 = vld [vmem:[%s5447_s1 + $0x3e] sm:$0x3]  ;;  %v45_v23 = vld [vmem:[%s5448_s0 + $0x38] sm:$0x3]  ;;  %v143_v25 = vpack.c.bf16 %v111_v21, %v111_v21 }
  0x46   :  { %4013 = vmatprep.mubr.msk.bf16.mxu0 %vm4366_vm1, %v4365_v0  ;;  %4019 = vmatprep.mubr.msk.bf16.mxu1 %vm4366_vm1, %v4365_v0  ;;  %v144_v26 = vpack.c.bf16 %v112_v22, %v112_v22  ;;  %v77_v27 = vpack.c.bf16 %v45_v23, %v45_v23  ;;  %v1959_v21 = vsel %vm1911_vm3, %v178_v16, 0 }
  0x47   :  { %4023 = vmatprep.subr.bf16.mxu0 %v4365_v0  ;;  %4029 = vmatprep.subr.bf16.mxu1 %v4365_v0  ;;  %v1594_v29 = vsel %vm209_vm0, %v143_v25, 0 }
  0x4c   :  { %4014 = vmatmul.mubr.msk.bf16.vlgmr.msra.gmra.mxu0 %vm209_vm0, %v65_v30  ;;  %4020 = vmatmul.mubr.msk.bf16.vlgmr.msra.gmra.mxu1 %vm209_vm0, %v66_v31  ;;  %v1640_v30 = vsel %vm209_vm0, %v144_v26, 0  ;;  %v47_v31 = vld [vmem:[%s5448_s0 + $0x3c] sm:$0x3] }
  0x4d   :  { %4024 = vmatpush3.bf16.xpose.msra.mxu0 %v1042_v32  ;;  %4030 = vmatpush3.bf16.xpose.msra.mxu1 %v1088_v33  ;;  %v48_v32 = vld [vmem:[%s5448_s0 + $0x3e] sm:$0x3]  ;;  %v79_v33 = vpack.c.bf16 %v47_v31, %v47_v31 }
  0x4e   :  { %4025 = vmatprep.mubr.msk.bf16.mxu0 %vm4366_vm1, %v4365_v0  ;;  %4031 = vmatprep.mubr.msk.bf16.mxu1 %vm4366_vm1, %v4365_v0  ;;  %v80_v34 = vpack.c.bf16 %v48_v32, %v48_v32 }
  0x4f   :  { %4035 = vmatprep.subr.bf16.mxu0 %v4365_v0  ;;  %4041 = vmatprep.subr.bf16.mxu1 %v4365_v0 }
  0x54   :  { %4026 = vmatmul.mubr.msk.bf16.vlgmr.msra.gmra.mxu0 %vm209_vm0, %v67_v40  ;;  %4032 = vmatmul.mubr.msk.bf16.vlgmr.msra.gmra.mxu1 %vm209_vm0, %v68_v41 }
  0x55   :  { %4036 = vmatpush3.bf16.xpose.msra.mxu0 %v1134_v42  ;;  %4042 = vmatpush3.bf16.xpose.msra.mxu1 %v1180_v43 }
  0x56   :  { %4037 = vmatprep.mubr.msk.bf16.mxu0 %vm4366_vm1, %v4365_v0  ;;  %4043 = vmatprep.mubr.msk.bf16.mxu1 %vm4366_vm1, %v4365_v0 }
  0x57   :  { %4047 = vmatprep.subr.bf16.mxu0 %v4365_v0  ;;  %4053 = vmatprep.subr.bf16.mxu1 %v4365_v0 }
  0x5c   :  { %4038 = vmatmul.mubr.msk.bf16.vlgmr.msra.gmra.mxu0 %vm209_vm0, %v69_v50  ;;  %4044 = vmatmul.mubr.msk.bf16.vlgmr.msra.gmra.mxu1 %vm209_vm0, %v70_v51 }
  0x5d   :  { %4048 = vmatpush3.bf16.xpose.msra.mxu0 %v1226_v52  ;;  %4054 = vmatpush3.bf16.xpose.msra.mxu1 %v1272_v53 }
  0x5e   :  { %4049 = vmatprep.mubr.msk.bf16.mxu0 %vm4366_vm1, %v4365_v0  ;;  %4055 = vmatprep.mubr.msk.bf16.mxu1 %vm4366_vm1, %v4365_v0 }
  0x5f   :  { %4059 = vmatprep.subr.bf16.mxu0 %v4365_v0  ;;  %4065 = vmatprep.subr.bf16.mxu1 %v4365_v0 }
  0x64   :  { %4050 = vmatmul.mubr.msk.bf16.vlgmr.msra.gmra.mxu0 %vm209_vm0, %v71_v60  ;;  %4056 = vmatmul.mubr.msk.bf16.vlgmr.msra.gmra.mxu1 %vm209_vm0, %v72_v61 }
  0x65   :  { %4060 = vmatpush3.bf16.xpose.msra.mxu0 %v1318_v62  ;;  %4066 = vmatpush3.bf16.xpose.msra.mxu1 %v1364_v63 }
  0x66   :  { %4061 = vmatprep.mubr.msk.bf16.mxu0 %vm4366_vm1, %v4365_v0  ;;  %4067 = vmatprep.mubr.msk.bf16.mxu1 %vm4366_vm1, %v4365_v0 }
  0x67   :  { %4071 = vmatprep.subr.bf16.mxu0 %v4365_v0  ;;  %4077 = vmatprep.subr.bf16.mxu1 %v4365_v0 }
  0x6c   :  { %4062 = vmatmul.mubr.msk.bf16.vlgmr.msra.gmra.mxu0 %vm209_vm0, %v73_v7  ;;  %4068 = vmatmul.mubr.msk.bf16.vlgmr.msra.gmra.mxu1 %vm209_vm0, %v74_v8  ;;  %v145_v8 = vld [vmem:[%s5449_s2] sm:$0x3] }
  0x6d   :  { %4072 = vmatpush3.bf16.xpose.msra.mxu0 %v1410_v9  ;;  %4078 = vmatpush3.bf16.xpose.msra.mxu1 %v1456_v10  ;;  %v177_v9 = vpack.c.bf16 %v145_v8, %v145_v8 }
  0x6e   :  { %4073 = vmatprep.mubr.msk.bf16.mxu0 %vm4366_vm1, %v4365_v0  ;;  %4079 = vmatprep.mubr.msk.bf16.mxu1 %vm4366_vm1, %v4365_v0 }
  0x6f   :  { %4083 = vmatprep.subr.bf16.mxu0 %v4365_v0  ;;  %4089 = vmatprep.subr.bf16.mxu1 %v4365_v0  ;;  %v1913_v12 = vsel %vm1911_vm3, %v177_v9, 0 }
  0x74   :  { %4074 = vmatmul.mubr.msk.bf16.vlgmr.msra.gmra.mxu0 %vm209_vm0, %v75_v17  ;;  %4080 = vmatmul.mubr.msk.bf16.vlgmr.msra.gmra.mxu1 %vm209_vm0, %v76_v18 }
  0x75   :  { %4084 = vmatpush3.bf16.xpose.msra.mxu0 %v1502_v19  ;;  %4090 = vmatpush3.bf16.xpose.msra.mxu1 %v1548_v20 }
  0x76   :  { %4085 = vmatprep.mubr.msk.bf16.mxu0 %vm4366_vm1, %v4365_v0  ;;  %4091 = vmatprep.mubr.msk.bf16.mxu1 %vm4366_vm1, %v4365_v0 }
  0x77   :  { %4095 = vmatprep.subr.bf16.mxu0 %v4365_v0  ;;  %4101 = vmatprep.subr.bf16.mxu1 %v4365_v0 }
  0x7c   :  { %4086 = vmatmul.mubr.msk.bf16.vlgmr.msra.gmra.mxu0 %vm209_vm0, %v77_v27  ;;  %4092 = vmatmul.mubr.msk.bf16.vlgmr.msra.gmra.mxu1 %vm209_vm0, %v78_v28 }
  0x7d   :  { %4096 = vmatpush3.bf16.xpose.msra.mxu0 %v1594_v29  ;;  %4102 = vmatpush3.bf16.xpose.msra.mxu1 %v1640_v30 }
  0x7e   :  { %4097 = vmatprep.mubr.msk.bf16.mxu0 %vm4366_vm1, %v4365_v0  ;;  %4103 = vmatprep.mubr.msk.bf16.mxu1 %vm4366_vm1, %v4365_v0 }
  0x7f   :  { %4107 = vmatprep.subr.bf16.mxu0 %v4365_v0  ;;  %4113 = vmatprep.subr.bf16.mxu1 %v4365_v0 }
  0x84   :  { %4098 = vmatmul.mubr.msk.bf16.vlgmr.msra.gmra.mxu0 %vm209_vm0, %v79_v33  ;;  %4104 = vmatmul.mubr.msk.bf16.vlgmr.msra.gmra.mxu1 %vm209_vm0, %v80_v34 }
  0x85   :  { %4109 = vmatprep.mubr.msk.bf16.mxu0 %vm4366_vm1, %v4365_v0  ;;  %4115 = vmatprep.mubr.msk.bf16.mxu1 %vm4366_vm1, %v4365_v0 }
  0x86   :  { %4108 = vmatpush3.bf16.msra.mxu0 %v1913_v12  ;;  %4114 = vmatpush3.bf16.msra.mxu1 %v1959_v21 }
  0x87   :  { %4119 = vmatprep.subr.bf16.mxu0 %v4365_v0  ;;  %4125 = vmatprep.subr.bf16.mxu1 %v4365_v0 }
  0xcc   :  { %v4750_v35 = vpop.f32.mrf.mxu0  ;;  %v4752_v36 = vpop.f32.mrf.mxu1 }
  0xcd   :  { %v1683_v37 = vsel %vm1682_vm2, %v4750_v35, -inf  ;;  %v1686_v40 = vsel %vm1682_vm2, %v4752_v36, -inf }
  0xce   :  { %v3925_v38 = vpop.f32.mrf.mxu1  ;;  %1684 = vmax.xlane.f32.xlu0 %v1683_v37  ;;  %v3919_v39 = vpop.f32.mrf.mxu0 }
  0xd0   :  { %v253_v41 = vpop.f32.mrf.mxu0  ;;  %v299_v42 = vpop.f32.mrf.mxu1 }
  0xd2   :  { %v3926_v43 = vpop.f32.mrf.mxu1  ;;  %1687 = vmax.xlane.f32.xlu0 %v1686_v40  ;;  %v3920_v44 = vpop.f32.mrf.mxu0 }
  0xd4   :  { %v4758_v45 = vpop.f32.mrf.mxu0  ;;  %v4760_v46 = vpop.f32.mrf.mxu1 }
  0xd5   :  { %v1689_v47 = vsel %vm1682_vm2, %v4758_v45, -inf  ;;  %v1692_v50 = vsel %vm1682_vm2, %v4760_v46, -inf }
  0xd6   :  { %v3937_v48 = vpop.f32.mrf.mxu1  ;;  %1690 = vmax.xlane.f32.xlu1 %v1689_v47  ;;  %v3931_v49 = vpop.f32.mrf.mxu0 }
  0xd8   :  { %v345_v51 = vpop.f32.mrf.mxu0  ;;  %v391_v52 = vpop.f32.mrf.mxu1 }
  0xda   :  { %v3938_v53 = vpop.f32.mrf.mxu1  ;;  %1693 = vmax.xlane.f32.xlu1 %v1692_v50  ;;  %v3932_v54 = vpop.f32.mrf.mxu0 }
  0xdc   :  { %v4766_v55 = vpop.f32.mrf.mxu0  ;;  %v4768_v56 = vpop.f32.mrf.mxu1 }
  0xdd   :  { %v1698_v57 = vsel %vm1682_vm2, %v4768_v56, -inf  ;;  %v1695_v58 = vsel %vm1682_vm2, %v4766_v55, -inf }
  0xde   :  { %v3949_v59 = vpop.f32.mrf.mxu1  ;;  %1699 = vmax.xlane.f32.xlu1 %v1698_v57  ;;  %1696 = vmax.xlane.f32.xlu0 %v1695_v58  ;;  %v3943_v60 = vpop.f32.mrf.mxu0 }
  0xe0   :  { %v437_v61 = vpop.f32.mrf.mxu0  ;;  %v483_v62 = vpop.f32.mrf.mxu1 }
  0xe2   :  { %v3944_v63 = vpop.f32.mrf.mxu0  ;;  %v3950_v1 = vpop.f32.mrf.mxu1 }
  0xe4   :  { %v4774_v2 = vpop.f32.mrf.mxu0  ;;  %v4776_v3 = vpop.f32.mrf.mxu1 }
  0xe5   :  { %v1704_v4 = vsel %vm1682_vm2, %v4776_v3, -inf  ;;  %v1701_v5 = vsel %vm1682_vm2, %v4774_v2, -inf }
  0xe6   :  { %v3961_v6 = vpop.f32.mrf.mxu1  ;;  %1705 = vmax.xlane.f32.xlu1 %v1704_v4  ;;  %1702 = vmax.xlane.f32.xlu0 %v1701_v5  ;;  %v3955_v7 = vpop.f32.mrf.mxu0 }
  0xe8   :  { %v529_v10 = vpop.f32.mrf.mxu0  ;;  %v575_v11 = vpop.f32.mrf.mxu1 }
  0xea   :  { %v3956_v13 = vpop.f32.mrf.mxu0  ;;  %v3962_v14 = vpop.f32.mrf.mxu1 }
  0xec   :  { %v4790_v17 = vpop.f32.mrf.mxu0  ;;  %v4792_v18 = vpop.f32.mrf.mxu1 }
  0xed   :  { %v1710_v19 = vsel %vm1682_vm2, %v4792_v18, -inf  ;;  %v1707_v20 = vsel %vm1682_vm2, %v4790_v17, -inf }
  0xee   :  { %v3973_v22 = vpop.f32.mrf.mxu1  ;;  %1711 = vmax.xlane.f32.xlu1 %v1710_v19  ;;  %1708 = vmax.xlane.f32.xlu0 %v1707_v20  ;;  %v3967_v23 = vpop.f32.mrf.mxu0 }
  0xf0   :  { %v621_v24 = vpop.f32.mrf.mxu0  ;;  %v667_v25 = vpop.f32.mrf.mxu1 }
  0xf2   :  { %v3968_v26 = vpop.f32.mrf.mxu0  ;;  %v3974_v27 = vpop.f32.mrf.mxu1 }
  0xf4   :  { %v4800_v28 = vpop.f32.mrf.mxu0  ;;  %v4802_v29 = vpop.f32.mrf.mxu1 }
  0xf5   :  { %v1716_v30 = vsel %vm1682_vm2, %v4802_v29, -inf  ;;  %v1713_v31 = vsel %vm1682_vm2, %v4800_v28, -inf }
  0xf6   :  { %v3985_v32 = vpop.f32.mrf.mxu1  ;;  %1717 = vmax.xlane.f32.xlu1 %v1716_v30  ;;  %1714 = vmax.xlane.f32.xlu0 %v1713_v31  ;;  %v3979_v33 = vpop.f32.mrf.mxu0 }
  0xf8   :  { %v713_v34 = vpop.f32.mrf.mxu0  ;;  %v759_v37 = vpop.f32.mrf.mxu1 }
  0xfa   :  { %v3980_v38 = vpop.f32.mrf.mxu0  ;;  %v3986_v39 = vpop.f32.mrf.mxu1 }
  0xfc   :  { %v4808_v40 = vpop.f32.mrf.mxu0  ;;  %v4810_v41 = vpop.f32.mrf.mxu1 }
  0xfd   :  { %v1722_v42 = vsel %vm1682_vm2, %v4810_v41, -inf  ;;  %v1719_v43 = vsel %vm1682_vm2, %v4808_v40, -inf }
  0xfe   :  { %v3997_v44 = vpop.f32.mrf.mxu1  ;;  %1723 = vmax.xlane.f32.xlu1 %v1722_v42  ;;  %1720 = vmax.xlane.f32.xlu0 %v1719_v43  ;;  %v3991_v47 = vpop.f32.mrf.mxu0 }
 0x100   :  { %v805_v48 = vpop.f32.mrf.mxu0  ;;  %v851_v49 = vpop.f32.mrf.mxu1 }
 0x102   :  { %v3992_v50 = vpop.f32.mrf.mxu0  ;;  %v3998_v51 = vpop.f32.mrf.mxu1 }
 0x104   :  { %v4816_v52 = vpop.f32.mrf.mxu0  ;;  %v4818_v53 = vpop.f32.mrf.mxu1 }
 0x105   :  { %v1728_v54 = vsel %vm1682_vm2, %v4818_v53, -inf  ;;  %v1725_v57 = vsel %vm1682_vm2, %v4816_v52, -inf }
 0x106   :  { %v4009_v58 = vpop.f32.mrf.mxu1  ;;  %1729 = vmax.xlane.f32.xlu1 %v1728_v54  ;;  %1726 = vmax.xlane.f32.xlu0 %v1725_v57  ;;  %v4003_v59 = vpop.f32.mrf.mxu0 }
 0x108   :  { %v897_v60 = vpop.f32.mrf.mxu0  ;;  %v943_v61 = vpop.f32.mrf.mxu1 }
 0x10a   :  { %v4004_v62 = vpop.f32.mrf.mxu0  ;;  %v4010_v63 = vpop.f32.mrf.mxu1 }
 0x10c   :  { %v4824_v1 = vpop.f32.mrf.mxu0  ;;  %v4826_v4 = vpop.f32.mrf.mxu1 }
 0x10d   :  { %v1734_v5 = vsel %vm1682_vm2, %v4826_v4, -inf  ;;  %v1731_v6 = vsel %vm1682_vm2, %v4824_v1, -inf }
 0x10e   :  { %v4021_v7 = vpop.f32.mrf.mxu1  ;;  %1735 = vmax.xlane.f32.xlu1 %v1734_v5  ;;  %1732 = vmax.xlane.f32.xlu0 %v1731_v6  ;;  %v4015_v8 = vpop.f32.mrf.mxu0 }
 0x110   :  { %v989_v9 = vpop.f32.mrf.mxu0  ;;  %v1035_v10 = vpop.f32.mrf.mxu1 }
 0x112   :  { %v4016_v11 = vpop.f32.mrf.mxu0  ;;  %v4022_v12 = vpop.f32.mrf.mxu1 }
 0x114   :  { %v4832_v13 = vpop.f32.mrf.mxu0  ;;  %v4834_v14 = vpop.f32.mrf.mxu1 }
 0x115   :  { %v1740_v15 = vsel %vm1682_vm2, %v4834_v14, -inf  ;;  %v1737_v16 = vsel %vm1682_vm2, %v4832_v13, -inf }
 0x116   :  { %v4033_v19 = vpop.f32.mrf.mxu1  ;;  %1741 = vmax.xlane.f32.xlu1 %v1740_v15  ;;  %1738 = vmax.xlane.f32.xlu0 %v1737_v16  ;;  %v4027_v20 = vpop.f32.mrf.mxu0 }
 0x118   :  { %v1081_v21 = vpop.f32.mrf.mxu0  ;;  %v1127_v22 = vpop.f32.mrf.mxu1 }
 0x11a   :  { %v4028_v23 = vpop.f32.mrf.mxu0  ;;  %v4034_v24 = vpop.f32.mrf.mxu1 }
 0x11c   :  { %v4840_v25 = vpop.f32.mrf.mxu0  ;;  %v4842_v26 = vpop.f32.mrf.mxu1 }
 0x11d   :  { %v1746_v27 = vsel %vm1682_vm2, %v4842_v26, -inf  ;;  %v1743_v30 = vsel %vm1682_vm2, %v4840_v25, -inf }
 0x11e   :  { %v4045_v31 = vpop.f32.mrf.mxu1  ;;  %1747 = vmax.xlane.f32.xlu1 %v1746_v27  ;;  %1744 = vmax.xlane.f32.xlu0 %v1743_v30  ;;  %v4039_v32 = vpop.f32.mrf.mxu0 }
 0x120   :  { %v1173_v33 = vpop.f32.mrf.mxu0  ;;  %v1219_v34 = vpop.f32.mrf.mxu1 }
 0x122   :  { %v4040_v37 = vpop.f32.mrf.mxu0  ;;  %v4046_v38 = vpop.f32.mrf.mxu1 }
 0x124   :  { %v4848_v39 = vpop.f32.mrf.mxu0  ;;  %v4850_v42 = vpop.f32.mrf.mxu1 }
 0x125   :  { %v1752_v43 = vsel %vm1682_vm2, %v4850_v42, -inf  ;;  %v1749_v44 = vsel %vm1682_vm2, %v4848_v39, -inf }
 0x126   :  { %v4057_v47 = vpop.f32.mrf.mxu1  ;;  %1753 = vmax.xlane.f32.xlu1 %v1752_v43  ;;  %1750 = vmax.xlane.f32.xlu0 %v1749_v44  ;;  %v4051_v48 = vpop.f32.mrf.mxu0 }
 0x128   :  { %v1265_v49 = vpop.f32.mrf.mxu0  ;;  %v1311_v50 = vpop.f32.mrf.mxu1 }
 0x12a   :  { %v4052_v51 = vpop.f32.mrf.mxu0  ;;  %v4058_v54 = vpop.f32.mrf.mxu1 }
 0x12c   :  { %v4856_v57 = vpop.f32.mrf.mxu0  ;;  %v4858_v58 = vpop.f32.mrf.mxu1 }
 0x12d   :  { %v1758_v59 = vsel %vm1682_vm2, %v4858_v58, -inf  ;;  %v1755_v60 = vsel %vm1682_vm2, %v4856_v57, -inf }
 0x12e   :  { %v4069_v61 = vpop.f32.mrf.mxu1  ;;  %1759 = vmax.xlane.f32.xlu1 %v1758_v59  ;;  %1756 = vmax.xlane.f32.xlu0 %v1755_v60  ;;  %v4063_v62 = vpop.f32.mrf.mxu0 }
 0x130   :  { %v1357_v63 = vpop.f32.mrf.mxu0  ;;  %v1403_v5 = vpop.f32.mrf.mxu1 }
 0x132   :  { %v4064_v6 = vpop.f32.mrf.mxu0  ;;  %v4070_v7 = vpop.f32.mrf.mxu1 }
 0x134   :  { %v4864_v8 = vpop.f32.mrf.mxu0  ;;  %v4866_v9 = vpop.f32.mrf.mxu1 }
 0x135   :  { %v1764_v10 = vsel %vm1682_vm2, %v4866_v9, -inf  ;;  %v1761_v11 = vsel %vm1682_vm2, %v4864_v8, -inf }
 0x136   :  { %v4081_v12 = vpop.f32.mrf.mxu1  ;;  %1765 = vmax.xlane.f32.xlu1 %v1764_v10  ;;  %1762 = vmax.xlane.f32.xlu0 %v1761_v11  ;;  %v4075_v15 = vpop.f32.mrf.mxu0 }
 0x137   :  { %v147_v12 = vld [vmem:[%s5449_s2 + $0x4] sm:$0x3] }
 0x138   :  { %v1449_v16 = vpop.f32.mrf.mxu0  ;;  %v1495_v19 = vpop.f32.mrf.mxu1 }
 0x13a   :  { %v4076_v20 = vpop.f32.mrf.mxu0  ;;  %v4082_v21 = vpop.f32.mrf.mxu1 }
 0x13c   :  { %v4872_v22 = vpop.f32.mrf.mxu0  ;;  %v4874_v23 = vpop.f32.mrf.mxu1 }
 0x13d   :  { %v1770_v24 = vsel %vm1682_vm2, %v4874_v23, -inf  ;;  %v1767_v27 = vsel %vm1682_vm2, %v4872_v22, -inf }
 0x13e   :  { %v4093_v30 = vpop.f32.mrf.mxu1  ;;  %1771 = vmax.xlane.f32.xlu1 %v1770_v24  ;;  %1768 = vmax.xlane.f32.xlu0 %v1767_v27  ;;  %v4087_v31 = vpop.f32.mrf.mxu0 }
 0x140   :  { %v1541_v32 = vpop.f32.mrf.mxu0  ;;  %v1587_v33 = vpop.f32.mrf.mxu1 }
 0x142   :  { %v4088_v34 = vpop.f32.mrf.mxu0  ;;  %v4094_v37 = vpop.f32.mrf.mxu1 }
 0x144   :  { %v4880_v38 = vpop.f32.mrf.mxu0  ;;  %v4882_v43 = vpop.f32.mrf.mxu1 }
 0x145   :  { %v1776_v44 = vsel %vm1682_vm2, %v4882_v43, -inf  ;;  %v1773_v47 = vsel %vm1682_vm2, %v4880_v38, -inf }
 0x146   :  { %v4105_v48 = vpop.f32.mrf.mxu1  ;;  %1777 = vmax.xlane.f32.xlu1 %v1776_v44  ;;  %1774 = vmax.xlane.f32.xlu0 %v1773_v47  ;;  %v4099_v49 = vpop.f32.mrf.mxu0 }
 0x147   :  { %v150_v49 = vld [vmem:[%s5449_s2 + $0xa] sm:$0x3] }
 0x148   :  { %v1633_v50 = vpop.f32.mrf.mxu0  ;;  %v1679_v51 = vpop.f32.mrf.mxu1 }
 0x14a   :  { %v4100_v54 = vpop.f32.mrf.mxu0  ;;  %v4106_v59 = vpop.f32.mrf.mxu1 }
 0x157   :  { %v1685_v60 = vpop.xlane.xlu0 %1684 }
 0x158   :  { %v1779_v61 = vsub.f32 %v4750_v35, %v1685_v60  ;;  %v179_v35 = vpack.c.bf16 %v147_v12, %v147_v12 }
 0x15a   :  { %v1811_v62 = vmul.f32 1.442695, %v1779_v61  ;;  %v2005_v30 = vsel %vm1911_vm3, %v179_v35, 0 }
 0x15b   :  { %v1688_v63 = vpop.xlane.xlu0 %1687 }
 0x15c   :  { %4301 = vpow2.f32 %v1811_v62  ;;  %v1780_v5 = vsub.f32 %v4752_v36, %v1688_v63  ;;  %v148_v36 = vld [vmem:[%s5449_s2 + $0x6] sm:$0x3]  ;;  %v182_v62 = vpack.c.bf16 %v150_v49, %v150_v49 }
 0x15d   :  { %v180_v31 = vpack.c.bf16 %v148_v36, %v148_v36 }
 0x15e   :  { %v1813_v6 = vmul.f32 1.442695, %v1780_v5  ;;  %v2143_v12 = vsel %vm1911_vm3, %v182_v62, 0 }
 0x15f   :  { %v1691_v7 = vpop.xlane.xlu1 %1690  ;;  %v2051_v48 = vsel %vm1911_vm3, %v180_v31, 0 }
 0x160   :  { %4303 = vpow2.f32 %v1813_v6  ;;  %v1781_v10 = vsub.f32 %v4758_v45, %v1691_v7 }
 0x162   :  { %v1815_v11 = vmul.f32 1.442695, %v1781_v10 }
 0x163   :  { %v1694_v15 = vpop.xlane.xlu1 %1693 }
 0x164   :  { %4305 = vpow2.f32 %v1815_v11  ;;  %v1782_v16 = vsub.f32 %v4760_v46, %v1694_v15  ;;  %v149_v46 = vld [vmem:[%s5449_s2 + $0x8] sm:$0x3] }
 0x166   :  { %v1817_v19 = vmul.f32 1.442695, %v1782_v16 }
 0x167   :  { %v1700_v20 = vpop.xlane.xlu1 %1699  ;;  %v1697_v21 = vpop.xlane.xlu0 %1696 }
 0x168   :  { %4307 = vpow2.f32 %v1817_v19  ;;  %v1784_v45 = vsub.f32 %v4768_v56, %v1700_v20  ;;  %v1783_v24 = vsub.f32 %v4766_v55, %v1697_v21  ;;  %v181_v55 = vpack.c.bf16 %v149_v46, %v149_v46  ;;  %v152_v19 = vld [vmem:[%s5449_s2 + $0xe] sm:$0x3] }
 0x169   :  { %v4302_v27 = vpop.eup %4301 }
 0x16a   :  { %v1821_v32 = vmul.f32 1.442695, %v1784_v45  ;;  %v1819_v33 = vmul.f32 1.442695, %v1783_v24  ;;  %v3414_v34 = vsel %vm1682_vm2, %v4302_v27, 0.0  ;;  %v1875_v37 = vpack.c.bf16 %v4302_v27, %v4302_v27 }
 0x16b   :  { %3415 = vadd.xlane.f32.xlu0 %v3414_v34  ;;  %v2097_v61 = vsel %vm1911_vm3, %v181_v55, 0  ;;  %v184_v27 = vpack.c.bf16 %v152_v19, %v152_v19 }
 0x16c   :  { %4110 = vmatmul.mubr.msk.bf16.vlgmr.msra.gmra.mxu0 %vm1907_vm4, %v1875_v37  ;;  %4309 = vpow2.f32 %v1819_v33 }
 0x16d   :  { %v4304_v56 = vpop.eup %4303  ;;  %4120 = vmatpush3.bf16.msra.mxu0 %v2005_v30  ;;  %4121 = vmatprep.mubr.msk.bf16.mxu0 %vm4366_vm1, %v4365_v0  ;;  %4311 = vpow2.f32 %v1821_v32  ;;  %v2235_v33 = vsel %vm1911_vm3, %v184_v27, 0 }
 0x16e   :  { %v3417_v44 = vsel %vm1682_vm2, %v4304_v56, 0.0  ;;  %v1876_v47 = vpack.c.bf16 %v4304_v56, %v4304_v56  ;;  %4131 = vmatprep.subr.bf16.mxu0 %v4365_v0 }
 0x16f   :  { %3418 = vadd.xlane.f32.xlu1 %v3417_v44  ;;  %v1706_v50 = vpop.xlane.xlu1 %1705  ;;  %v1703_v51 = vpop.xlane.xlu0 %1702  ;;  %v154_v44 = vld [vmem:[%s5449_s2 + $0x12] sm:$0x3] }
 0x170   :  { %v1786_v54 = vsub.f32 %v4776_v3, %v1706_v50  ;;  %v1785_v59 = vsub.f32 %v4774_v2, %v1703_v51  ;;  %4116 = vmatmul.mubr.msk.bf16.vlgmr.msra.gmra.mxu1 %vm1907_vm4, %v1876_v47  ;;  %v151_v2 = vld [vmem:[%s5449_s2 + $0xc] sm:$0x3] }
 0x171   :  { %v4306_v60 = vpop.eup %4305  ;;  %4126 = vmatpush3.bf16.msra.mxu1 %v2051_v48  ;;  %4127 = vmatprep.mubr.msk.bf16.mxu1 %vm4366_vm1, %v4365_v0  ;;  %v183_v35 = vpack.c.bf16 %v151_v2, %v151_v2  ;;  %v156_v2 = vld [vmem:[%s5449_s2 + $0x16] sm:$0x3] }
 0x172   :  { %v1825_v63 = vmul.f32 1.442695, %v1786_v54  ;;  %v1823_v5 = vmul.f32 1.442695, %v1785_v59  ;;  %v3420_v6 = vsel %vm1682_vm2, %v4306_v60, 0.0  ;;  %v1877_v7 = vpack.c.bf16 %v4306_v60, %v4306_v60  ;;  %4137 = vmatprep.subr.bf16.mxu1 %v4365_v0 }
 0x173   :  { %3421 = vadd.xlane.f32.xlu0 %v3420_v6  ;;  %v186_v54 = vpack.c.bf16 %v154_v44, %v154_v44  ;;  %v188_v19 = vpack.c.bf16 %v156_v2, %v156_v2 }
 0x174   :  { %4122 = vmatmul.mubr.msk.bf16.vlgmr.msra.gmra.mxu0 %vm1907_vm4, %v1877_v7  ;;  %4313 = vpow2.f32 %v1823_v5 }
 0x175   :  { %v4308_v3 = vpop.eup %4307  ;;  %4132 = vmatpush3.bf16.msra.mxu0 %v2097_v61  ;;  %4133 = vmatprep.mubr.msk.bf16.mxu0 %vm4366_vm1, %v4365_v0  ;;  %4315 = vpow2.f32 %v1825_v63  ;;  %v155_v61 = vld [vmem:[%s5449_s2 + $0x14] sm:$0x3]  ;;  %v2327_v63 = vsel %vm1911_vm3, %v186_v54, 0  ;;  %v160_v54 = vld [vmem:[%s5449_s2 + $0x1e] sm:$0x3] }
 0x176   :  { %v3423_v10 = vsel %vm1682_vm2, %v4308_v3, 0.0  ;;  %v1878_v11 = vpack.c.bf16 %v4308_v3, %v4308_v3  ;;  %4143 = vmatprep.subr.bf16.mxu0 %v4365_v0  ;;  %v187_v7 = vpack.c.bf16 %v155_v61, %v155_v61 }
 0x177   :  { %v1712_v15 = vpop.xlane.xlu1 %1711  ;;  %v1709_v16 = vpop.xlane.xlu0 %1708  ;;  %3424 = vadd.xlane.f32.xlu0 %v3423_v10 }
 0x178   :  { %v1788_v36 = vsub.f32 %v4792_v18, %v1712_v15  ;;  %v1787_v20 = vsub.f32 %v4790_v17, %v1709_v16  ;;  %4128 = vmatmul.mubr.msk.bf16.vlgmr.msra.gmra.mxu1 %vm1907_vm4, %v1878_v11  ;;  %v2189_v18 = vsel %vm1911_vm3, %v183_v35, 0  ;;  %v153_v17 = vld [vmem:[%s5449_s2 + $0x10] sm:$0x3] }
 0x179   :  { %4138 = vmatpush3.bf16.msra.mxu1 %v2143_v12  ;;  %4139 = vmatprep.mubr.msk.bf16.mxu1 %vm4366_vm1, %v4365_v0  ;;  %v4310_v21 = vpop.eup %4309  ;;  %v185_v55 = vpack.c.bf16 %v153_v17, %v153_v17 }
 0x17a   :  { %v1829_v45 = vmul.f32 1.442695, %v1788_v36  ;;  %v1827_v24 = vmul.f32 1.442695, %v1787_v20  ;;  %4149 = vmatprep.subr.bf16.mxu1 %v4365_v0  ;;  %v4312_v30 = vpop.eup %4311  ;;  %v3426_v31 = vsel %vm1682_vm2, %v4310_v21, 0.0  ;;  %v1879_v46 = vpack.c.bf16 %v4310_v21, %v4310_v21 }
 0x17b   :  { %3427 = vadd.xlane.f32.xlu0 %v3426_v31  ;;  %v1880_v32 = vpack.c.bf16 %v4312_v30, %v4312_v30  ;;  %v3429_v56 = vsel %vm1682_vm2, %v4312_v30, 0.0  ;;  %v157_v20 = vld [vmem:[%s5449_s2 + $0x18] sm:$0x3]  ;;  %v158_v31 = vld [vmem:[%s5449_s2 + $0x1a] sm:$0x3] }
 0x17c   :  { %4317 = vpow2.f32 %v1829_v45  ;;  %4134 = vmatmul.mubr.msk.bf16.vlgmr.msra.gmra.mxu0 %vm1907_vm4, %v1879_v46  ;;  %v2419_v45 = vsel %vm1911_vm3, %v188_v19, 0  ;;  %v189_v30 = vpack.c.bf16 %v157_v20, %v157_v20 }
 0x17d   :  { %4319 = vpow2.f32 %v1827_v24  ;;  %4144 = vmatpush3.bf16.msra.mxu0 %v2189_v18  ;;  %4145 = vmatprep.mubr.msk.bf16.mxu0 %vm4366_vm1, %v4365_v0 }
 0x17e   :  { %4155 = vmatprep.subr.bf16.mxu0 %v4365_v0 }
 0x17f   :  { %v1718_v34 = vpop.xlane.xlu1 %1717  ;;  %v1715_v37 = vpop.xlane.xlu0 %1714  ;;  %3430 = vadd.xlane.f32.xlu0 %v3429_v56 }
 0x180   :  { %v1790_v47 = vsub.f32 %v4802_v29, %v1718_v34  ;;  %v1789_v48 = vsub.f32 %v4800_v28, %v1715_v37  ;;  %4140 = vmatmul.mubr.msk.bf16.vlgmr.msra.gmra.mxu1 %vm1907_vm4, %v1880_v32  ;;  %v2281_v28 = vsel %vm1911_vm3, %v185_v55, 0  ;;  %v190_v34 = vpack.c.bf16 %v158_v31, %v158_v31 }
 0x181   :  { %4150 = vmatpush3.bf16.msra.mxu1 %v2235_v33  ;;  %4151 = vmatprep.mubr.msk.bf16.mxu1 %vm4366_vm1, %v4365_v0  ;;  %v4314_v49 = vpop.eup %4313 }
 0x182   :  { %v1833_v50 = vmul.f32 1.442695, %v1790_v47  ;;  %v1831_v51 = vmul.f32 1.442695, %v1789_v48  ;;  %4161 = vmatprep.subr.bf16.mxu1 %v4365_v0  ;;  %v4960_v59 = vpop.eup %4315  ;;  %v3432_v60 = vsel %vm1682_vm2, %v4314_v49, 0.0  ;;  %v1881_v29 = vpack.c.bf16 %v4314_v49, %v4314_v49 }
 0x183   :  { %3433 = vadd.xlane.f32.xlu0 %v3432_v60  ;;  %v1882_v62 = vpack.c.bf16 %v4960_v59, %v4960_v59  ;;  %v2511_v47 = vsel %vm1911_vm3, %v190_v34, 0 }
 0x184   :  { %4321 = vpow2.f32 %v1831_v51  ;;  %4146 = vmatmul.mubr.msk.bf16.vlgmr.msra.gmra.mxu0 %vm1907_vm4, %v1881_v29 }
 0x185   :  { %4323 = vpow2.f32 %v1833_v50  ;;  %4156 = vmatpush3.bf16.msra.mxu0 %v2281_v28  ;;  %4157 = vmatprep.mubr.msk.bf16.mxu0 %vm4366_vm1, %v4365_v0 }
 0x186   :  { %4167 = vmatprep.subr.bf16.mxu0 %v4365_v0 }
 0x187   :  { %v1724_v5 = vpop.xlane.xlu1 %1723  ;;  %v1721_v6 = vpop.xlane.xlu0 %1720 }
 0x188   :  { %v1792_v3 = vsub.f32 %v4810_v41, %v1724_v5  ;;  %v1791_v10 = vsub.f32 %v4808_v40, %v1721_v6  ;;  %4152 = vmatmul.mubr.msk.bf16.vlgmr.msra.gmra.mxu1 %vm1907_vm4, %v1882_v62  ;;  %v2373_v40 = vsel %vm1911_vm3, %v187_v7, 0 }
 0x189   :  { %v4318_v11 = vpop.eup %4317  ;;  %4162 = vmatpush3.bf16.msra.mxu1 %v2327_v63  ;;  %4163 = vmatprep.mubr.msk.bf16.mxu1 %vm4366_vm1, %v4365_v0  ;;  %v192_v63 = vpack.c.bf16 %v160_v54, %v160_v54 }
 0x18a   :  { %v4320_v12 = vpop.eup %4319  ;;  %v1837_v15 = vmul.f32 1.442695, %v1792_v3  ;;  %v1835_v16 = vmul.f32 1.442695, %v1791_v10  ;;  %v3441_v35 = vsel %vm1682_vm2, %v4318_v11, 0.0  ;;  %4173 = vmatprep.subr.bf16.mxu1 %v4365_v0  ;;  %v1884_v21 = vpack.c.bf16 %v4318_v11, %v4318_v11 }
 0x18b   :  { %3442 = vadd.xlane.f32.xlu1 %v3441_v35  ;;  %v3438_v41 = vsel %vm1682_vm2, %v4320_v12, 0.0  ;;  %v1883_v36 = vpack.c.bf16 %v4320_v12, %v4320_v12  ;;  %v2603_v3 = vsel %vm1911_vm3, %v192_v63, 0 }
 0x18c   :  { %3439 = vadd.xlane.f32.xlu0 %v3438_v41  ;;  %4325 = vpow2.f32 %v1835_v16  ;;  %v162_v16 = vld [vmem:[%s5449_s2 + $0x22] sm:$0x3] }
 0x18d   :  { %4158 = vmatmul.mubr.msk.bf16.vlgmr.msra.gmra.mxu0 %vm1907_vm4, %v1883_v36  ;;  %4327 = vpow2.f32 %v1837_v15  ;;  %v194_v20 = vpack.c.bf16 %v162_v16, %v162_v16  ;;  %v168_v16 = vld [vmem:[%s5449_s2 + $0x2e] sm:$0x3] }
 0x18e   :  { %4168 = vmatpush3.bf16.msra.mxu0 %v2373_v40  ;;  %4169 = vmatprep.mubr.msk.bf16.mxu0 %vm4366_vm1, %v4365_v0 }
 0x18f   :  { %v1730_v24 = vpop.xlane.xlu1 %1729  ;;  %v1727_v27 = vpop.xlane.xlu0 %1726  ;;  %4179 = vmatprep.subr.bf16.mxu0 %v4365_v0 }
 0x190   :  { %v1794_v46 = vsub.f32 %v4818_v53, %v1730_v24  ;;  %v1793_v18 = vsub.f32 %v4816_v52, %v1727_v27  ;;  %4164 = vmatmul.mubr.msk.bf16.vlgmr.msra.gmra.mxu1 %vm1907_vm4, %v1884_v21  ;;  %v2465_v53 = vsel %vm1911_vm3, %v189_v30, 0  ;;  %v159_v52 = vld [vmem:[%s5449_s2 + $0x1c] sm:$0x3]  ;;  %v2695_v30 = vsel %vm1911_vm3, %v194_v20, 0 }
 0x191   :  { %4174 = vmatpush3.bf16.msra.mxu1 %v2419_v45  ;;  %4175 = vmatprep.mubr.msk.bf16.mxu1 %vm4366_vm1, %v4365_v0  ;;  %v4322_v17 = vpop.eup %4321  ;;  %v191_v51 = vpack.c.bf16 %v159_v52, %v159_v52  ;;  %v200_v20 = vpack.c.bf16 %v168_v16, %v168_v16 }
 0x192   :  { %v1841_v32 = vmul.f32 1.442695, %v1794_v46  ;;  %v1839_v33 = vmul.f32 1.442695, %v1793_v18  ;;  %4185 = vmatprep.subr.bf16.mxu1 %v4365_v0  ;;  %v4324_v37 = vpop.eup %4323  ;;  %v3444_v56 = vsel %vm1682_vm2, %v4322_v17, 0.0  ;;  %v1885_v55 = vpack.c.bf16 %v4322_v17, %v4322_v17 }
 0x193   :  { %3445 = vadd.xlane.f32.xlu1 %v3444_v56  ;;  %v1886_v44 = vpack.c.bf16 %v4324_v37, %v4324_v37  ;;  %v3447_v49 = vsel %vm1682_vm2, %v4324_v37, 0.0  ;;  %v164_v17 = vld [vmem:[%s5449_s2 + $0x26] sm:$0x3] }
 0x194   :  { %4329 = vpow2.f32 %v1839_v33  ;;  %v196_v52 = vpack.c.bf16 %v164_v17, %v164_v17 }
 0x195   :  { %4170 = vmatmul.mubr.msk.bf16.vlgmr.msra.gmra.mxu0 %vm1907_vm4, %v1885_v55  ;;  %4331 = vpow2.f32 %v1841_v32 }
 0x196   :  { %4180 = vmatpush3.bf16.msra.mxu0 %v2465_v53  ;;  %4181 = vmatprep.mubr.msk.bf16.mxu0 %vm4366_vm1, %v4365_v0 }
 0x197   :  { %v1736_v48 = vpop.xlane.xlu1 %1735  ;;  %v1733_v50 = vpop.xlane.xlu0 %1732  ;;  %4191 = vmatprep.subr.bf16.mxu0 %v4365_v0  ;;  %3448 = vadd.xlane.f32.xlu1 %v3447_v49 }
 0x198   :  { %v1796_v60 = vsub.f32 %v4826_v4, %v1736_v48  ;;  %v1795_v29 = vsub.f32 %v4824_v1, %v1733_v50  ;;  %4176 = vmatmul.mubr.msk.bf16.vlgmr.msra.gmra.mxu1 %vm1907_vm4, %v1886_v44  ;;  %v2557_v4 = vsel %vm1911_vm3, %v191_v51, 0  ;;  %v161_v1 = vld [vmem:[%s5449_s2 + $0x20] sm:$0x3]  ;;  %v2787_v50 = vsel %vm1911_vm3, %v196_v52, 0  ;;  %v171_v52 = vld [vmem:[%s5449_s2 + $0x34] sm:$0x3] }
 0x199   :  { %4186 = vmatpush3.bf16.msra.mxu1 %v2511_v47  ;;  %4187 = vmatprep.mubr.msk.bf16.mxu1 %vm4366_vm1, %v4365_v0  ;;  %v4326_v28 = vpop.eup %4325  ;;  %v193_v15 = vpack.c.bf16 %v161_v1, %v161_v1  ;;  %v165_v47 = vld [vmem:[%s5449_s2 + $0x28] sm:$0x3] }
 0x19a   :  { %v1845_v61 = vmul.f32 1.442695, %v1796_v60  ;;  %v1843_v62 = vmul.f32 1.442695, %v1795_v29  ;;  %4197 = vmatprep.subr.bf16.mxu1 %v4365_v0  ;;  %v4328_v5 = vpop.eup %4327  ;;  %v3450_v6 = vsel %vm1682_vm2, %v4326_v28, 0.0  ;;  %v1887_v7 = vpack.c.bf16 %v4326_v28, %v4326_v28 }
 0x19b   :  { %3451 = vadd.xlane.f32.xlu1 %v3450_v6  ;;  %v1888_v2 = vpack.c.bf16 %v4328_v5, %v4328_v5  ;;  %v3453_v11 = vsel %vm1682_vm2, %v4328_v5, 0.0  ;;  %v197_v60 = vpack.c.bf16 %v165_v47, %v165_v47  ;;  %v166_v29 = vld [vmem:[%s5449_s2 + $0x2a] sm:$0x3] }
 0x19c   :  { %4333 = vpow2.f32 %v1845_v61  ;;  %v198_v6 = vpack.c.bf16 %v166_v29, %v166_v29 }
 0x19d   :  { %4335 = vpow2.f32 %v1843_v62  ;;  %4182 = vmatmul.mubr.msk.bf16.vlgmr.msra.gmra.mxu0 %vm1907_vm4, %v1887_v7 }
 0x19e   :  { %4192 = vmatpush3.bf16.msra.mxu0 %v2557_v4  ;;  %4193 = vmatprep.mubr.msk.bf16.mxu0 %vm4366_vm1, %v4365_v0 }
 0x19f   :  { %v1742_v10 = vpop.xlane.xlu1 %1741  ;;  %v1739_v12 = vpop.xlane.xlu0 %1738  ;;  %4203 = vmatprep.subr.bf16.mxu0 %v4365_v0  ;;  %3454 = vadd.xlane.f32.xlu1 %v3453_v11 }
 0x1a0   :  { %v1798_v35 = vsub.f32 %v4834_v14, %v1742_v10  ;;  %v1797_v19 = vsub.f32 %v4832_v13, %v1739_v12  ;;  %4188 = vmatmul.mubr.msk.bf16.vlgmr.msra.gmra.mxu1 %vm1907_vm4, %v1888_v2  ;;  %v2649_v14 = vsel %vm1911_vm3, %v193_v15, 0  ;;  %v163_v13 = vld [vmem:[%s5449_s2 + $0x24] sm:$0x3] }
 0x1a1   :  { %4198 = vmatpush3.bf16.msra.mxu1 %v2603_v3  ;;  %4199 = vmatprep.mubr.msk.bf16.mxu1 %vm4366_vm1, %v4365_v0  ;;  %v4330_v41 = vpop.eup %4329  ;;  %v195_v18 = vpack.c.bf16 %v163_v13, %v163_v13  ;;  %v2879_v3 = vsel %vm1911_vm3, %v198_v6, 0  ;;  %v2971_v13 = vsel %vm1911_vm3, %v200_v20, 0 }
 0x1a2   :  { %v1849_v36 = vmul.f32 1.442695, %v1798_v35  ;;  %v1847_v40 = vmul.f32 1.442695, %v1797_v19  ;;  %4209 = vmatprep.subr.bf16.mxu1 %v4365_v0  ;;  %v4332_v21 = vpop.eup %4331  ;;  %v3456_v45 = vsel %vm1682_vm2, %v4330_v41, 0.0  ;;  %v1889_v24 = vpack.c.bf16 %v4330_v41, %v4330_v41 }
 0x1a3   :  { %3457 = vadd.xlane.f32.xlu1 %v3456_v45  ;;  %v1890_v27 = vpack.c.bf16 %v4332_v21, %v4332_v21  ;;  %v3459_v48 = vsel %vm1682_vm2, %v4332_v21, 0.0 }
 0x1a4   :  { %4337 = vpow2.f32 %v1847_v40 }
 0x1a5   :  { %4194 = vmatmul.mubr.msk.bf16.vlgmr.msra.gmra.mxu0 %vm1907_vm4, %v1889_v24  ;;  %4339 = vpow2.f32 %v1849_v36 }
 0x1a6   :  { %4204 = vmatpush3.bf16.msra.mxu0 %v2649_v14  ;;  %4205 = vmatprep.mubr.msk.bf16.mxu0 %vm4366_vm1, %v4365_v0 }
 0x1a7   :  { %v1748_v31 = vpop.xlane.xlu1 %1747  ;;  %v1745_v46 = vpop.xlane.xlu0 %1744  ;;  %4215 = vmatprep.subr.bf16.mxu0 %v4365_v0 }
 0x1a8   :  { %v1800_v32 = vsub.f32 %v4842_v26, %v1748_v31  ;;  %v1799_v33 = vsub.f32 %v4840_v25, %v1745_v46  ;;  %4200 = vmatmul.mubr.msk.bf16.vlgmr.msra.gmra.mxu1 %vm1907_vm4, %v1890_v27  ;;  %v2741_v25 = vsel %vm1911_vm3, %v195_v18, 0  ;;  %v170_v18 = vld [vmem:[%s5449_s2 + $0x32] sm:$0x3] }
 0x1a9   :  { %v4334_v34 = vpop.eup %4333  ;;  %4210 = vmatpush3.bf16.msra.mxu1 %v2695_v30  ;;  %4211 = vmatprep.mubr.msk.bf16.mxu1 %vm4366_vm1, %v4365_v0 }
 0x1aa   :  { %v4336_v37 = vpop.eup %4335  ;;  %v1853_v56 = vmul.f32 1.442695, %v1800_v32  ;;  %v1851_v55 = vmul.f32 1.442695, %v1799_v33  ;;  %v3465_v53 = vsel %vm1682_vm2, %v4334_v34, 0.0  ;;  %4221 = vmatprep.subr.bf16.mxu1 %v4365_v0  ;;  %v1892_v49 = vpack.c.bf16 %v4334_v34, %v4334_v34 }
 0x1ab   :  { %3466 = vadd.xlane.f32.xlu1 %v3465_v53  ;;  %v3462_v26 = vsel %vm1682_vm2, %v4336_v37, 0.0  ;;  %v1891_v44 = vpack.c.bf16 %v4336_v37, %v4336_v37 }
 0x1ac   :  { %3463 = vadd.xlane.f32.xlu0 %v3462_v26  ;;  %4341 = vpow2.f32 %v1851_v55 }
 0x1ad   :  { %4206 = vmatmul.mubr.msk.bf16.vlgmr.msra.gmra.mxu0 %vm1907_vm4, %v1891_v44  ;;  %4343 = vpow2.f32 %v1853_v56  ;;  %v202_v56 = vpack.c.bf16 %v170_v18, %v170_v18 }
 0x1ae   :  { %4216 = vmatpush3.bf16.msra.mxu0 %v2741_v25  ;;  %4217 = vmatprep.mubr.msk.bf16.mxu0 %vm4366_vm1, %v4365_v0 }
 0x1af   :  { %v1754_v51 = vpop.xlane.xlu1 %1753  ;;  %3460 = vadd.xlane.f32.xlu1 %v3459_v48  ;;  %v1751_v54 = vpop.xlane.xlu0 %1750  ;;  %4227 = vmatprep.subr.bf16.mxu0 %v4365_v0  ;;  %v3063_v44 = vsel %vm1911_vm3, %v202_v56, 0  ;;  %v203_v48 = vpack.c.bf16 %v171_v52, %v171_v52 }
 0x1b0   :  { %v1802_v28 = vsub.f32 %v4850_v42, %v1754_v51  ;;  %v1801_v61 = vsub.f32 %v4848_v39, %v1751_v54  ;;  %4212 = vmatmul.mubr.msk.bf16.vlgmr.msra.gmra.mxu1 %vm1907_vm4, %v1892_v49  ;;  %v2833_v42 = vsel %vm1911_vm3, %v197_v60, 0  ;;  %v167_v39 = vld [vmem:[%s5449_s2 + $0x2c] sm:$0x3]  ;;  %v172_v49 = vld [vmem:[%s5449_s2 + $0x36] sm:$0x3] }
 0x1b1   :  { %4222 = vmatpush3.bf16.msra.mxu1 %v2787_v50  ;;  %4223 = vmatprep.mubr.msk.bf16.mxu1 %vm4366_vm1, %v4365_v0  ;;  %v4338_v62 = vpop.eup %4337  ;;  %v199_v15 = vpack.c.bf16 %v167_v39, %v167_v39 }
 0x1b2   :  { %v1857_v63 = vmul.f32 1.442695, %v1802_v28  ;;  %v1855_v5 = vmul.f32 1.442695, %v1801_v61  ;;  %4233 = vmatprep.subr.bf16.mxu1 %v4365_v0  ;;  %v4340_v7 = vpop.eup %4339  ;;  %v3468_v4 = vsel %vm1682_vm2, %v4338_v62, 0.0  ;;  %v1893_v1 = vpack.c.bf16 %v4338_v62, %v4338_v62 }
 0x1b3   :  { %3469 = vadd.xlane.f32.xlu0 %v3468_v4  ;;  %v1894_v2 = vpack.c.bf16 %v4340_v7, %v4340_v7  ;;  %v3471_v12 = vsel %vm1682_vm2, %v4340_v7, 0.0  ;;  %v204_v62 = vpack.c.bf16 %v172_v49, %v172_v49 }
 0x1b4   :  { %4345 = vpow2.f32 %v1855_v5  ;;  %v173_v5 = vld [vmem:[%s5449_s2 + $0x38] sm:$0x3] }
 0x1b5   :  { %4218 = vmatmul.mubr.msk.bf16.vlgmr.msra.gmra.mxu0 %vm1907_vm4, %v1893_v1  ;;  %4347 = vpow2.f32 %v1857_v63  ;;  %v3155_v7 = vsel %vm1911_vm3, %v204_v62, 0  ;;  %v3435_v1 = vsel %vm1682_vm2, %v4960_v59, 0.0  ;;  %v205_v39 = vpack.c.bf16 %v173_v5, %v173_v5 }
 0x1b6   :  { %4228 = vmatpush3.bf16.msra.mxu0 %v2833_v42  ;;  %4229 = vmatprep.mubr.msk.bf16.mxu0 %vm4366_vm1, %v4365_v0 }
 0x1b7   :  { %v1760_v10 = vpop.xlane.xlu1 %1759  ;;  %v1757_v11 = vpop.xlane.xlu0 %1756  ;;  %4239 = vmatprep.subr.bf16.mxu0 %v4365_v0  ;;  %3472 = vadd.xlane.f32.xlu0 %v3471_v12 }
 0x1b8   :  { %v1804_v35 = vsub.f32 %v4858_v58, %v1760_v10  ;;  %v1803_v19 = vsub.f32 %v4856_v57, %v1757_v11  ;;  %4224 = vmatmul.mubr.msk.bf16.vlgmr.msra.gmra.mxu1 %vm1907_vm4, %v1894_v2  ;;  %v2925_v58 = vsel %vm1911_vm3, %v199_v15, 0  ;;  %v169_v57 = vld [vmem:[%s5449_s2 + $0x30] sm:$0x3]  ;;  %v174_v2 = vld [vmem:[%s5449_s2 + $0x3a] sm:$0x3] }
 0x1b9   :  { %4234 = vmatpush3.bf16.msra.mxu1 %v2879_v3  ;;  %4235 = vmatprep.mubr.msk.bf16.mxu1 %vm4366_vm1, %v4365_v0  ;;  %v4342_v41 = vpop.eup %4341  ;;  %v201_v46 = vpack.c.bf16 %v169_v57, %v169_v57  ;;  %v206_v15 = vpack.c.bf16 %v174_v2, %v174_v2 }
 0x1ba   :  { %v1861_v36 = vmul.f32 1.442695, %v1804_v35  ;;  %v1859_v40 = vmul.f32 1.442695, %v1803_v19  ;;  %4245 = vmatprep.subr.bf16.mxu1 %v4365_v0  ;;  %v4344_v21 = vpop.eup %4343  ;;  %v3474_v45 = vsel %vm1682_vm2, %v4342_v41, 0.0  ;;  %v1895_v24 = vpack.c.bf16 %v4342_v41, %v4342_v41 }
 0x1bb   :  { %3475 = vadd.xlane.f32.xlu0 %v3474_v45  ;;  %v1896_v14 = vpack.c.bf16 %v4344_v21, %v4344_v21  ;;  %v3477_v31 = vsel %vm1682_vm2, %v4344_v21, 0.0  ;;  %v175_v41 = vld [vmem:[%s5449_s2 + $0x3c] sm:$0x3]  ;;  %v176_v45 = vld [vmem:[%s5449_s2 + $0x3e] sm:$0x3] }
 0x1bc   :  { %4349 = vpow2.f32 %v1861_v36  ;;  %v207_v21 = vpack.c.bf16 %v175_v41, %v175_v41 }
 0x1bd   :  { %4351 = vpow2.f32 %v1859_v40  ;;  %4230 = vmatmul.mubr.msk.bf16.vlgmr.msra.gmra.mxu0 %vm1907_vm4, %v1895_v24  ;;  %v3247_v40 = vsel %vm1911_vm3, %v206_v15, 0 }
 0x1be   :  { %4240 = vmatpush3.bf16.msra.mxu0 %v2925_v58  ;;  %4241 = vmatprep.mubr.msk.bf16.mxu0 %vm4366_vm1, %v4365_v0  ;;  %v208_v58 = vpack.c.bf16 %v176_v45, %v176_v45 }
 0x1bf   :  { %v1766_v27 = vpop.xlane.xlu1 %1765  ;;  %v1763_v30 = vpop.xlane.xlu0 %1762  ;;  %4251 = vmatprep.subr.bf16.mxu0 %v4365_v0  ;;  %3478 = vadd.xlane.f32.xlu0 %v3477_v31 }
 0x1c0   :  { %v1806_v17 = vsub.f32 %v4866_v9, %v1766_v27  ;;  %v1805_v32 = vsub.f32 %v4864_v8, %v1763_v30  ;;  %4236 = vmatmul.mubr.msk.bf16.vlgmr.msra.gmra.mxu1 %vm1907_vm4, %v1896_v14  ;;  %v3017_v8 = vsel %vm1911_vm3, %v201_v46, 0  ;;  %v3293_v27 = vsel %vm1911_vm3, %v207_v21, 0 }
 0x1c1   :  { %4246 = vmatpush3.bf16.msra.mxu1 %v2971_v13  ;;  %4247 = vmatprep.mubr.msk.bf16.mxu1 %vm4366_vm1, %v4365_v0  ;;  %v4346_v33 = vpop.eup %4345  ;;  %v3339_v31 = vsel %vm1911_vm3, %v208_v58, 0 }
 0x1c2   :  { %v1865_v34 = vmul.f32 1.442695, %v1806_v17  ;;  %v1863_v37 = vmul.f32 1.442695, %v1805_v32  ;;  %4257 = vmatprep.subr.bf16.mxu1 %v4365_v0  ;;  %v5123_v55 = vpop.eup %4347  ;;  %v3480_v53 = vsel %vm1682_vm2, %v4346_v33, 0.0  ;;  %v1897_v9 = vpack.c.bf16 %v4346_v33, %v4346_v33 }
 0x1c3   :  { %3481 = vadd.xlane.f32.xlu0 %v3480_v53  ;;  %v1898_v26 = vpack.c.bf16 %v5123_v55, %v5123_v55 }
 0x1c4   :  { %4353 = vpow2.f32 %v1863_v37 }
 0x1c5   :  { %4242 = vmatmul.mubr.msk.bf16.vlgmr.msra.gmra.mxu0 %vm1907_vm4, %v1897_v9  ;;  %4355 = vpow2.f32 %v1865_v34 }
 0x1c6   :  { %4252 = vmatpush3.bf16.msra.mxu0 %v3017_v8  ;;  %4253 = vmatprep.mubr.msk.bf16.mxu0 %vm4366_vm1, %v4365_v0 }
 0x1c7   :  { %v1772_v25 = vpop.xlane.xlu1 %1771  ;;  %v1769_v47 = vpop.xlane.xlu0 %1768  ;;  %4263 = vmatprep.subr.bf16.mxu0 %v4365_v0 }
 0x1c8   :  { %v1808_v50 = vsub.f32 %v4874_v23, %v1772_v25  ;;  %v1807_v51 = vsub.f32 %v4872_v22, %v1769_v47  ;;  %4248 = vmatmul.mubr.msk.bf16.vlgmr.msra.gmra.mxu1 %vm1907_vm4, %v1898_v26  ;;  %v3109_v22 = vsel %vm1911_vm3, %v203_v48, 0  ;;  %v3542_v47 = vlaneseq }
 0x1c9   :  { %v4350_v54 = vpop.eup %4349  ;;  %4258 = vmatpush3.bf16.msra.mxu1 %v3063_v44  ;;  %4259 = vmatprep.mubr.msk.bf16.mxu1 %vm4366_vm1, %v4365_v0 }
 0x1ca   :  { %v4352_v60 = vpop.eup %4351  ;;  %v1869_v29 = vmul.f32 1.442695, %v1808_v50  ;;  %v1867_v28 = vmul.f32 1.442695, %v1807_v51  ;;  %v3489_v61 = vsel %vm1682_vm2, %v4350_v54, 0.0  ;;  %4269 = vmatprep.subr.bf16.mxu1 %v4365_v0  ;;  %v1900_v6 = vpack.c.bf16 %v4350_v54, %v4350_v54 }
 0x1cb   :  { %v1899_v63 = vpack.c.bf16 %v4352_v60, %v4352_v60  ;;  %3490 = vadd.xlane.f32.xlu1 %v3489_v61  ;;  %v3486_v23 = vsel %vm1682_vm2, %v4352_v60, 0.0  ;;  %v3543_v50 = vand.u32 127, %v3542_v47  ;;  %v3545_v51 = vshrl.u32 %v3542_v47, 7 }
 0x1cc   :  { %3487 = vadd.xlane.f32.xlu0 %v3486_v23  ;;  %4357 = vpow2.f32 %v1867_v28 }
 0x1cd   :  { %4254 = vmatmul.mubr.msk.bf16.vlgmr.msra.gmra.mxu0 %vm1907_vm4, %v1899_v63  ;;  %4359 = vpow2.f32 %v1869_v29  ;;  %v5220_v28 = vsub.s32 %v3543_v50, %v3545_v51 }
 0x1ce   :  { %4264 = vmatpush3.bf16.msra.mxu0 %v3109_v22  ;;  %4265 = vmatprep.mubr.msk.bf16.mxu0 %vm4366_vm1, %v4365_v0 }
 0x1cf   :  { %v1778_v4 = vpop.xlane.xlu1 %1777  ;;  %v1775_v42 = vpop.xlane.xlu0 %1774  ;;  %4275 = vmatprep.subr.bf16.mxu0 %v4365_v0 }
 0x1d0   :  { %v1810_v3 = vsub.f32 %v4882_v43, %v1778_v4  ;;  %3436 = vadd.xlane.f32.xlu0 %v3435_v1  ;;  %v1809_v10 = vsub.f32 %v4880_v38, %v1775_v42  ;;  %4260 = vmatmul.mubr.msk.bf16.vlgmr.msra.gmra.mxu1 %vm1907_vm4, %v1900_v6  ;;  %v3483_v43 = vsel %vm1682_vm2, %v5123_v55, 0.0  ;;  %v3201_v38 = vsel %vm1911_vm3, %v205_v39, 0 }
 0x1d1   :  { %4270 = vmatpush3.bf16.msra.mxu1 %v3155_v7  ;;  %4271 = vmatprep.mubr.msk.bf16.mxu1 %vm4366_vm1, %v4365_v0  ;;  %v4354_v59 = vpop.eup %4353 }
 0x1d2   :  { %v1873_v11 = vmul.f32 1.442695, %v1810_v3  ;;  %v1871_v12 = vmul.f32 1.442695, %v1809_v10  ;;  %4281 = vmatprep.subr.bf16.mxu1 %v4365_v0  ;;  %v4356_v16 = vpop.eup %4355  ;;  %v1901_v35 = vpack.c.bf16 %v4354_v59, %v4354_v59  ;;  %v3492_v19 = vsel %vm1682_vm2, %v4354_v59, 0.0 }
 0x1d3   :  { %3493 = vadd.xlane.f32.xlu1 %v3492_v19  ;;  %v1902_v36 = vpack.c.bf16 %v4356_v16, %v4356_v16  ;;  %v3495_v20 = vsel %vm1682_vm2, %v4356_v16, 0.0 }
 0x1d4   :  { %3484 = vadd.xlane.f32.xlu0 %v3483_v43  ;;  %4361 = vpow2.f32 %v1871_v12 }
 0x1d5   :  { %4266 = vmatmul.mubr.msk.bf16.vlgmr.msra.gmra.mxu0 %vm1907_vm4, %v1901_v35  ;;  %4363 = vpow2.f32 %v1873_v11 }
 0x1d6   :  { %4276 = vmatpush3.bf16.msra.mxu0 %v3201_v38  ;;  %4277 = vmatprep.mubr.msk.bf16.mxu0 %vm4366_vm1, %v4365_v0 }
 0x1d7   :  { %4287 = vmatprep.subr.bf16.mxu0 %v4365_v0  ;;  %3496 = vadd.xlane.f32.xlu1 %v3495_v20 }
 0x1d8   :  { %4272 = vmatmul.mubr.msk.bf16.vlgmr.msra.gmra.mxu1 %vm1907_vm4, %v1902_v36 }
 0x1d9   :  { %4282 = vmatpush3.bf16.msra.mxu1 %v3247_v40  ;;  %4283 = vmatprep.mubr.msk.bf16.mxu1 %vm4366_vm1, %v4365_v0  ;;  %v4358_v24 = vpop.eup %4357 }
 0x1da   :  { %4293 = vmatprep.subr.bf16.mxu1 %v4365_v0  ;;  %v4360_v57 = vpop.eup %4359  ;;  %v1903_v14 = vpack.c.bf16 %v4358_v24, %v4358_v24  ;;  %v3498_v13 = vsel %vm1682_vm2, %v4358_v24, 0.0 }
 0x1db   :  { %3499 = vadd.xlane.f32.xlu1 %v3498_v13  ;;  %v1904_v30 = vpack.c.bf16 %v4360_v57, %v4360_v57  ;;  %v3501_v46 = vsel %vm1682_vm2, %v4360_v57, 0.0 }
 0x1dd   :  { %4278 = vmatmul.mubr.msk.bf16.vlgmr.msra.gmra.mxu0 %vm1907_vm4, %v1903_v14 }
 0x1de   :  { %4288 = vmatpush3.bf16.msra.mxu0 %v3293_v27  ;;  %4289 = vmatprep.mubr.msk.bf16.mxu0 %vm4366_vm1, %v4365_v0 }
 0x1df   :  { %3502 = vadd.xlane.f32.xlu1 %v3501_v46 }
 0x1e0   :  { %4284 = vmatmul.mubr.msk.bf16.vlgmr.msra.gmra.mxu1 %vm1907_vm4, %v1904_v30 }
 0x1e1   :  { %4294 = vmatpush3.bf16.msra.mxu1 %v3339_v31  ;;  %4295 = vmatprep.mubr.msk.bf16.mxu1 %vm4366_vm1, %v4365_v0  ;;  %v4362_v18 = vpop.eup %4361 }
 0x1e2   :  { %v4364_v17 = vpop.eup %4363  ;;  %v1905_v32 = vpack.c.bf16 %v4362_v18, %v4362_v18  ;;  %v3504_v33 = vsel %vm1682_vm2, %v4362_v18, 0.0 }
 0x1e3   :  { %3505 = vadd.xlane.f32.xlu1 %v3504_v33  ;;  %v1906_v34 = vpack.c.bf16 %v4364_v17, %v4364_v17  ;;  %v3507_v37 = vsel %vm1682_vm2, %v4364_v17, 0.0 }
 0x1e5   :  { %4290 = vmatmul.mubr.msk.bf16.vlgmr.msra.gmra.mxu0 %vm1907_vm4, %v1905_v32 }
 0x1e7   :  { %3508 = vadd.xlane.f32.xlu1 %v3507_v37 }
 0x1e8   :  { %4296 = vmatmul.mubr.msk.bf16.vlgmr.msra.gmra.mxu1 %vm1907_vm4, %v1906_v34 }
 0x1f4   :  { %v5202_v56 = vpop.xlane.xlu0 %3415 }
 0x1f8   :  { %v5206_v53 = vpop.xlane.xlu1 %3418 }
 0x1fc   :  { %v5204_v55 = vpop.xlane.xlu0 %3421 }
 0x200   :  { %v5208_v0 = vpop.xlane.xlu0 %3424 }
 0x204   :  { %v5210_v52 = vpop.xlane.xlu0 %3427 }
 0x208   :  { %v5212_v44 = vpop.xlane.xlu0 %3430 }
 0x20c   :  { %v5214_v49 = vpop.xlane.xlu0 %3433 }
 0x214   :  { %v3443_v9 = vpop.xlane.xlu1 %3442 }
 0x215   :  { %v3440_v60 = vpop.xlane.xlu0 %3439  ;;  %v3583_v23 = vrot.slane %v3443_v9, %v5220_v28 }
 0x216   :  { %v3579_v22 = vrot.slane %v3440_v60, %v5220_v28 }
 0x218   :  { %v3686_v2 = vsel %vm3672_vm6, %v3583_v23, %v3579_v22  ;;  %v3555_v22 = vrot.slane %v5204_v55, %v5220_v28 }
 0x21c   :  { %v3446_v8 = vpop.xlane.xlu1 %3445 }
 0x21d   :  { %v3587_v5 = vrot.slane %v3446_v8, %v5220_v28 }
 0x21f   :  { %v3687_v59 = vsel %vm3674_vm7, %v3587_v5, %v3686_v2 }
 0x220   :  { %v3449_v26 = vpop.xlane.xlu1 %3448 }
 0x221   :  { %v3591_v4 = vrot.slane %v3449_v26, %v5220_v28 }
 0x223   :  { %v3688_v15 = vsel %vm3676_vm8, %v3591_v4, %v3687_v59 }
 0x224   :  { %v3452_v25 = vpop.xlane.xlu1 %3451 }
 0x225   :  { %v3595_v1 = vrot.slane %v3452_v25, %v5220_v28 }
 0x227   :  { %v3689_v35 = vsel %vm3678_vm9, %v3595_v1, %v3688_v15  ;;  %v3563_v1 = vrot.slane %v5210_v52, %v5220_v28 }
 0x228   :  { %v3455_v48 = vpop.xlane.xlu1 %3454 }
 0x229   :  { %v3599_v3 = vrot.slane %v3455_v48, %v5220_v28 }
 0x22b   :  { %v3690_v38 = vsel %vm3680_vm10, %v3599_v3, %v3689_v35  ;;  %v3567_v3 = vrot.slane %v5212_v44, %v5220_v28 }
 0x22c   :  { %v1949_v54 = vpop.f32.mrf.mxu0  ;;  %v3458_v61 = vpop.xlane.xlu1 %3457 }
 0x22d   :  { %3382 = vst.msk [vmem:[%s5450_s3] sm:$0x3] %vm3381_vm5, %v1949_v54  ;;  %v3603_v11 = vrot.slane %v3458_v61, %v5220_v28 }
 0x22e   :  { %v4111_v29 = vpop.f32.mrf.mxu0 }
 0x22f   :  { %v3691_v20 = vsel %vm3682_vm12, %v3603_v11, %v3690_v38 }
 0x230   :  { %v1952_v62 = vpop.f32.mrf.mxu0  ;;  %v1995_v63 = vpop.f32.mrf.mxu1 }
 0x231   :  { %3383 = vst.msk [vmem:[%s5450_s3 + $0x2] sm:$0x3] %vm3381_vm5, %v1995_v63  ;;  %v3551_v63 = vrot.slane %v5206_v53, %v5220_v28 }
 0x232   :  { %v4112_v6 = vpop.f32.mrf.mxu0  ;;  %v4117_v7 = vpop.f32.mrf.mxu1 }
 0x233   :  { %v3547_v6 = vrot.slane %v5202_v56, %v5220_v28  ;;  %v3559_v7 = vrot.slane %v5208_v0, %v5220_v28 }
 0x234   :  { %v1998_v42 = vpop.f32.mrf.mxu1  ;;  %v5231_v39 = vpop.xlane.xlu1 %3466 }
 0x235   :  { %v2041_v10 = vpop.f32.mrf.mxu0  ;;  %v5244_v41 = vpop.xlane.xlu0 %3463  ;;  %v3673_v53 = vsel %vm3672_vm6, %v3551_v63, %v3547_v6  ;;  %v3615_v55 = vrot.slane %v5231_v39, %v5220_v28 }
 0x236   :  { %3384 = vst.msk [vmem:[%s5450_s3 + $0x4] sm:$0x3] %vm3381_vm5, %v2041_v10  ;;  %v4118_v12 = vpop.f32.mrf.mxu1  ;;  %v3611_v56 = vrot.slane %v5244_v41, %v5220_v28  ;;  %v3675_v52 = vsel %vm3674_vm7, %v3555_v22, %v3673_v53  ;;  %v3571_v10 = vrot.slane %v5214_v49, %v5220_v28 }
 0x237   :  { %v4123_v16 = vpop.f32.mrf.mxu0  ;;  %v3677_v39 = vsel %vm3676_vm8, %v3559_v7, %v3675_v52 }
 0x238   :  { %v2087_v19 = vpop.f32.mrf.mxu1  ;;  %v3461_v43 = vpop.xlane.xlu1 %3460  ;;  %v3679_v16 = vsel %vm3678_vm9, %v3563_v1, %v3677_v39  ;;  %v3693_v38 = vsel %vm3672_vm6, %v3615_v55, %v3611_v56 }
 0x239   :  { %3385 = vst.msk [vmem:[%s5450_s3 + $0x6] sm:$0x3] %vm3381_vm5, %v2087_v19  ;;  %v3607_v36 = vrot.slane %v3461_v43, %v5220_v28  ;;  %v2044_v40 = vpop.f32.mrf.mxu0  ;;  %v3681_v43 = vsel %vm3680_vm10, %v3567_v3, %v3679_v16 }
 0x23a   :  { %v4129_v21 = vpop.f32.mrf.mxu1 }
 0x23b   :  { %v3692_v45 = vsel %vm3684_vm11, %v3607_v36, %v3691_v20  ;;  %v4124_v24 = vpop.f32.mrf.mxu0  ;;  %v3683_v20 = vsel %vm3682_vm12, %v3571_v10, %v3681_v43 }
 0x23c   :  { %3712 = vst.msk [vmem:[%s5451_s4 + $0x8] sm:$0xff] %vm1907_vm4, %v3692_v45  ;;  %v2090_v58 = vpop.f32.mrf.mxu1  ;;  %v5257_v57 = vpop.xlane.xlu0 %3469 }
 0x23d   :  { %v2133_v14 = vpop.f32.mrf.mxu0  ;;  %v3619_v44 = vrot.slane %v5257_v57, %v5220_v28 }
 0x23e   :  { %3386 = vst.msk [vmem:[%s5450_s3 + $0x8] sm:$0x3] %vm3381_vm5, %v2133_v14  ;;  %v4130_v13 = vpop.f32.mrf.mxu1 }
 0x23f   :  { %v4135_v27 = vpop.f32.mrf.mxu0  ;;  %v3694_v21 = vsel %vm3674_vm7, %v3619_v44, %v3693_v38 }
 0x240   :  { %v2179_v30 = vpop.f32.mrf.mxu1  ;;  %v5267_v31 = vpop.xlane.xlu0 %3472 }
 0x241   :  { %3387 = vst.msk [vmem:[%s5450_s3 + $0xa] sm:$0x3] %vm3381_vm5, %v2179_v30  ;;  %v2136_v46 = vpop.f32.mrf.mxu0  ;;  %v3623_v11 = vrot.slane %v5267_v31, %v5220_v28 }
 0x242   :  { %v4141_v18 = vpop.f32.mrf.mxu1 }
 0x243   :  { %v4136_v17 = vpop.f32.mrf.mxu0  ;;  %v3695_v58 = vsel %vm3676_vm8, %v3623_v11, %v3694_v21 }
 0x244   :  { %v2182_v32 = vpop.f32.mrf.mxu1  ;;  %v5269_v33 = vpop.xlane.xlu0 %3475 }
 0x245   :  { %v2225_v34 = vpop.f32.mrf.mxu0  ;;  %v3627_v35 = vrot.slane %v5269_v33, %v5220_v28 }
 0x246   :  { %3388 = vst.msk [vmem:[%s5450_s3 + $0xc] sm:$0x3] %vm3381_vm5, %v2225_v34  ;;  %v4142_v37 = vpop.f32.mrf.mxu1 }
 0x247   :  { %v4147_v9 = vpop.f32.mrf.mxu0  ;;  %v3696_v13 = vsel %vm3678_vm9, %v3627_v35, %v3695_v58 }
 0x248   :  { %v2271_v8 = vpop.f32.mrf.mxu1  ;;  %v3479_v47 = vpop.xlane.xlu0 %3478 }
 0x249   :  { %3389 = vst.msk [vmem:[%s5450_s3 + $0xe] sm:$0x3] %vm3381_vm5, %v2271_v8  ;;  %v2228_v26 = vpop.f32.mrf.mxu0  ;;  %v3631_v41 = vrot.slane %v3479_v47, %v5220_v28 }
 0x24a   :  { %v4153_v25 = vpop.f32.mrf.mxu1 }
 0x24b   :  { %v4148_v48 = vpop.f32.mrf.mxu0  ;;  %v3697_v31 = vsel %vm3680_vm10, %v3631_v41, %v3696_v13 }
 0x24c   :  { %v2274_v50 = vpop.f32.mrf.mxu1  ;;  %v3482_v61 = vpop.xlane.xlu0 %3481 }
 0x24d   :  { %v2317_v51 = vpop.f32.mrf.mxu0  ;;  %v3635_v45 = vrot.slane %v3482_v61, %v5220_v28 }
 0x24e   :  { %3390 = vst.msk [vmem:[%s5450_s3 + $0x10] sm:$0x3] %vm3381_vm5, %v2317_v51  ;;  %v4154_v54 = vpop.f32.mrf.mxu1 }
 0x24f   :  { %v4159_v60 = vpop.f32.mrf.mxu0  ;;  %v3698_v32 = vsel %vm3682_vm12, %v3635_v45, %v3697_v31 }
 0x250   :  { %v2363_v29 = vpop.f32.mrf.mxu1 }
 0x251   :  { %v2320_v62 = vpop.f32.mrf.mxu0  ;;  %3391 = vst.msk [vmem:[%s5450_s3 + $0x12] sm:$0x3] %vm3381_vm5, %v2363_v29 }
 0x252   :  { %v4165_v23 = vpop.f32.mrf.mxu1 }
 0x253   :  { %v4160_v5 = vpop.f32.mrf.mxu0 }
 0x254   :  { %v2366_v4 = vpop.f32.mrf.mxu1  ;;  %v3491_v12 = vpop.xlane.xlu1 %3490 }
 0x255   :  { %v5297_v42 = vpop.xlane.xlu0 %3487  ;;  %v2409_v2 = vpop.f32.mrf.mxu0  ;;  %v3647_v61 = vrot.slane %v3491_v12, %v5220_v28 }
 0x256   :  { %3392 = vst.msk [vmem:[%s5450_s3 + $0x14] sm:$0x3] %vm3381_vm5, %v2409_v2  ;;  %v4166_v0 = vpop.f32.mrf.mxu1  ;;  %v3643_v62 = vrot.slane %v5297_v42, %v5220_v28 }
 0x257   :  { %v4171_v59 = vpop.f32.mrf.mxu0 }
 0x258   :  { %v2455_v15 = vpop.f32.mrf.mxu1  ;;  %v3700_v2 = vsel %vm3672_vm6, %v3647_v61, %v3643_v62 }
 0x259   :  { %3393 = vst.msk [vmem:[%s5450_s3 + $0x16] sm:$0x3] %vm3381_vm5, %v2455_v15  ;;  %v3437_v49 = vpop.xlane.xlu0 %3436  ;;  %v2412_v19 = vpop.f32.mrf.mxu0 }
 0x25a   :  { %v3575_v36 = vrot.slane %v3437_v49, %v5220_v28  ;;  %v4177_v40 = vpop.f32.mrf.mxu1 }
 0x25b   :  { %v4172_v24 = vpop.f32.mrf.mxu0 }
 0x25c   :  { %v3685_v57 = vsel %vm3684_vm11, %v3575_v36, %v3683_v20  ;;  %v2458_v14 = vpop.f32.mrf.mxu1  ;;  %v3494_v27 = vpop.xlane.xlu1 %3493 }
 0x25d   :  { %3711 = vst.msk [vmem:[%s5451_s4] sm:$0xff] %vm1907_vm4, %v3685_v57  ;;  %v3485_v30 = vpop.xlane.xlu0 %3484  ;;  %v2501_v18 = vpop.f32.mrf.mxu0  ;;  %v3651_v22 = vrot.slane %v3494_v27, %v5220_v28 }
 0x25e   :  { %v3639_v46 = vrot.slane %v3485_v30, %v5220_v28  ;;  %v4178_v17 = vpop.f32.mrf.mxu1  ;;  %3394 = vst.msk [vmem:[%s5450_s3 + $0x18] sm:$0x3] %vm3381_vm5, %v2501_v18 }
 0x25f   :  { %v4183_v34 = vpop.f32.mrf.mxu0  ;;  %v3701_v56 = vsel %vm3674_vm7, %v3651_v22, %v3700_v2 }
 0x260   :  { %v3699_v33 = vsel %vm3684_vm11, %v3639_v46, %v3698_v32  ;;  %v2547_v37 = vpop.f32.mrf.mxu1  ;;  %v3497_v9 = vpop.xlane.xlu1 %3496 }
 0x261   :  { %3713 = vst.msk [vmem:[%s5451_s4 + $0x10] sm:$0xff] %vm1907_vm4, %v3699_v33  ;;  %v2504_v8 = vpop.f32.mrf.mxu0  ;;  %v3655_v5 = vrot.slane %v3497_v9, %v5220_v28 }
 0x262   :  { %3395 = vst.msk [vmem:[%s5450_s3 + $0x1a] sm:$0x3] %vm3381_vm5, %v2547_v37  ;;  %v4189_v26 = vpop.f32.mrf.mxu1 }
 0x263   :  { %v4184_v25 = vpop.f32.mrf.mxu0  ;;  %v3702_v0 = vsel %vm3676_vm8, %v3655_v5, %v3701_v56 }
 0x264   :  { %v2550_v47 = vpop.f32.mrf.mxu1  ;;  %v3500_v48 = vpop.xlane.xlu1 %3499 }
 0x265   :  { %v2593_v50 = vpop.f32.mrf.mxu0  ;;  %v3659_v4 = vrot.slane %v3500_v48, %v5220_v28 }
 0x266   :  { %v4190_v51 = vpop.f32.mrf.mxu1  ;;  %3396 = vst.msk [vmem:[%s5450_s3 + $0x1c] sm:$0x3] %vm3381_vm5, %v2593_v50 }
 0x267   :  { %v4195_v54 = vpop.f32.mrf.mxu0  ;;  %v3703_v44 = vsel %vm3678_vm9, %v3659_v4, %v3702_v0 }
 0x268   :  { %v2639_v60 = vpop.f32.mrf.mxu1  ;;  %v3503_v29 = vpop.xlane.xlu1 %3502 }
 0x269   :  { %3397 = vst.msk [vmem:[%s5450_s3 + $0x1e] sm:$0x3] %vm3381_vm5, %v2639_v60  ;;  %v2596_v63 = vpop.f32.mrf.mxu0  ;;  %v3663_v53 = vrot.slane %v3503_v29, %v5220_v28 }
 0x26a   :  { %v4201_v23 = vpop.f32.mrf.mxu1 }
 0x26b   :  { %v4196_v6 = vpop.f32.mrf.mxu0  ;;  %v3704_v39 = vsel %vm3680_vm10, %v3663_v53, %v3703_v44 }
 0x26c   :  { %v2642_v7 = vpop.f32.mrf.mxu1  ;;  %v3506_v1 = vpop.xlane.xlu1 %3505 }
 0x26d   :  { %v2685_v3 = vpop.f32.mrf.mxu0  ;;  %v3667_v42 = vrot.slane %v3506_v1, %v5220_v28 }
 0x26e   :  { %v4202_v55 = vpop.f32.mrf.mxu1  ;;  %3398 = vst.msk [vmem:[%s5450_s3 + $0x20] sm:$0x3] %vm3381_vm5, %v2685_v3 }
 0x26f   :  { %v4207_v52 = vpop.f32.mrf.mxu0  ;;  %v3705_v16 = vsel %vm3682_vm12, %v3667_v42, %v3704_v39 }
 0x270   :  { %v2731_v10 = vpop.f32.mrf.mxu1  ;;  %v3509_v59 = vpop.xlane.xlu1 %3508 }
 0x271   :  { %3399 = vst.msk [vmem:[%s5450_s3 + $0x22] sm:$0x3] %vm3381_vm5, %v2731_v10  ;;  %v3671_v11 = vrot.slane %v3509_v59, %v5220_v28  ;;  %v2688_v12 = vpop.f32.mrf.mxu0 }
 0x272   :  { %v4213_v15 = vpop.f32.mrf.mxu1 }
 0x273   :  { %v3706_v35 = vsel %vm3684_vm11, %v3671_v11, %v3705_v16  ;;  %v4208_v49 = vpop.f32.mrf.mxu0 }
 0x274   :  { %v2734_v19 = vpop.f32.mrf.mxu1  ;;  %3714 = vst.msk [vmem:[%s5451_s4 + $0x18] sm:$0xff] %vm1907_vm4, %v3706_v35 }
 0x275   :  { %v2777_v43 = vpop.f32.mrf.mxu0 }
 0x276   :  { %v4214_v38 = vpop.f32.mrf.mxu1  ;;  %3400 = vst.msk [vmem:[%s5450_s3 + $0x24] sm:$0x3] %vm3381_vm5, %v2777_v43 }
 0x277   :  { %v4219_v28 = vpop.f32.mrf.mxu0 }
 0x278   :  { %v2823_v41 = vpop.f32.mrf.mxu1 }
 0x279   :  { %3401 = vst.msk [vmem:[%s5450_s3 + $0x26] sm:$0x3] %vm3381_vm5, %v2823_v41  ;;  %v2780_v36 = vpop.f32.mrf.mxu0 }
 0x27a   :  { %v4225_v40 = vpop.f32.mrf.mxu1 }
 0x27b   :  { %v4220_v20 = vpop.f32.mrf.mxu0 }
 0x27c   :  { %v2826_v21 = vpop.f32.mrf.mxu1 }
 0x27d   :  { %v2869_v45 = vpop.f32.mrf.mxu0 }
 0x27e   :  { %v4226_v24 = vpop.f32.mrf.mxu1  ;;  %3402 = vst.msk [vmem:[%s5450_s3 + $0x28] sm:$0x3] %vm3381_vm5, %v2869_v45 }
 0x27f   :  { %v4231_v58 = vpop.f32.mrf.mxu0 }
 0x280   :  { %v2915_v57 = vpop.f32.mrf.mxu1 }
 0x281   :  { %3403 = vst.msk [vmem:[%s5450_s3 + $0x2a] sm:$0x3] %vm3381_vm5, %v2915_v57  ;;  %v2872_v14 = vpop.f32.mrf.mxu0 }
 0x282   :  { %v4237_v13 = vpop.f32.mrf.mxu1 }
 0x283   :  { %v4232_v27 = vpop.f32.mrf.mxu0 }
 0x284   :  { %v2918_v30 = vpop.f32.mrf.mxu1 }
 0x285   :  { %v2961_v31 = vpop.f32.mrf.mxu0 }
 0x286   :  { %v4238_v46 = vpop.f32.mrf.mxu1  ;;  %3404 = vst.msk [vmem:[%s5450_s3 + $0x2c] sm:$0x3] %vm3381_vm5, %v2961_v31 }
 0x287   :  { %v4243_v18 = vpop.f32.mrf.mxu0 }
 0x288   :  { %v3007_v17 = vpop.f32.mrf.mxu1 }
 0x289   :  { %3405 = vst.msk [vmem:[%s5450_s3 + $0x2e] sm:$0x3] %vm3381_vm5, %v3007_v17  ;;  %v2964_v32 = vpop.f32.mrf.mxu0 }
 0x28a   :  { %v4249_v33 = vpop.f32.mrf.mxu1 }
 0x28b   :  { %v4244_v34 = vpop.f32.mrf.mxu0 }
 0x28c   :  { %v3010_v37 = vpop.f32.mrf.mxu1 }
 0x28d   :  { %v3053_v9 = vpop.f32.mrf.mxu0 }
 0x28e   :  { %v4250_v8 = vpop.f32.mrf.mxu1  ;;  %3406 = vst.msk [vmem:[%s5450_s3 + $0x30] sm:$0x3] %vm3381_vm5, %v3053_v9 }
 0x28f   :  { %v4255_v26 = vpop.f32.mrf.mxu0 }
 0x290   :  { %v3099_v25 = vpop.f32.mrf.mxu1 }
 0x291   :  { %3407 = vst.msk [vmem:[%s5450_s3 + $0x32] sm:$0x3] %vm3381_vm5, %v3099_v25  ;;  %v3056_v47 = vpop.f32.mrf.mxu0 }
 0x292   :  { %v4261_v48 = vpop.f32.mrf.mxu1 }
 0x293   :  { %v4256_v50 = vpop.f32.mrf.mxu0 }
 0x294   :  { %v3102_v51 = vpop.f32.mrf.mxu1 }
 0x295   :  { %v3145_v54 = vpop.f32.mrf.mxu0 }
 0x296   :  { %v4262_v60 = vpop.f32.mrf.mxu1  ;;  %3408 = vst.msk [vmem:[%s5450_s3 + $0x34] sm:$0x3] %vm3381_vm5, %v3145_v54 }
 0x297   :  { %v4267_v29 = vpop.f32.mrf.mxu0 }
 0x298   :  { %v3191_v61 = vpop.f32.mrf.mxu1 }
 0x299   :  { %3409 = vst.msk [vmem:[%s5450_s3 + $0x36] sm:$0x3] %vm3381_vm5, %v3191_v61  ;;  %v3148_v62 = vpop.f32.mrf.mxu0 }
 0x29a   :  { %v4273_v63 = vpop.f32.mrf.mxu1 }
 0x29b   :  { %v4268_v23 = vpop.f32.mrf.mxu0 }
 0x29c   :  { %v3194_v22 = vpop.f32.mrf.mxu1 }
 0x29d   :  { %v3237_v5 = vpop.f32.mrf.mxu0 }
 0x29e   :  { %v4274_v6 = vpop.f32.mrf.mxu1  ;;  %3410 = vst.msk [vmem:[%s5450_s3 + $0x38] sm:$0x3] %vm3381_vm5, %v3237_v5 }
 0x29f   :  { %v4279_v7 = vpop.f32.mrf.mxu0 }
 0x2a0   :  { %v3283_v4 = vpop.f32.mrf.mxu1 }
 0x2a1   :  { %3411 = vst.msk [vmem:[%s5450_s3 + $0x3a] sm:$0x3] %vm3381_vm5, %v3283_v4  ;;  %v3240_v1 = vpop.f32.mrf.mxu0 }
 0x2a2   :  { %v4285_v2 = vpop.f32.mrf.mxu1 }
 0x2a3   :  { %v4280_v53 = vpop.f32.mrf.mxu0 }
 0x2a4   :  { %v3286_v3 = vpop.f32.mrf.mxu1 }
 0x2a5   :  { %v3329_v55 = vpop.f32.mrf.mxu0 }
 0x2a6   :  { %v4286_v56 = vpop.f32.mrf.mxu1  ;;  %3412 = vst.msk [vmem:[%s5450_s3 + $0x3c] sm:$0x3] %vm3381_vm5, %v3329_v55 }
 0x2a7   :  { %v4291_v42 = vpop.f32.mrf.mxu0 }
 0x2a8   :  { %v3375_v0 = vpop.f32.mrf.mxu1 }
 0x2a9   :  { %3413 = vst.msk [vmem:[%s5450_s3 + $0x3e] sm:$0x3] %vm3381_vm5, %v3375_v0  ;;  %v3332_v52 = vpop.f32.mrf.mxu0 }
 0x2aa   :  { %v4297_v10 = vpop.f32.mrf.mxu1 }
 0x2ab   :  { %v4292_v44 = vpop.f32.mrf.mxu0 }
 0x2ac   :  { %v3378_v59 = vpop.f32.mrf.mxu1 }
 0x2ae   :  { %v4298_v39 = vpop.f32.mrf.mxu1 }

</bundles_post_ra>
